<compile_context>
chip_gen: v6e
topology: v6e:2x2x1
jax: 0.10.0
libtpu: 0.0.40
codegen_flags: <defaults>
</compile_context>

<pallas_src>
import jax
import jax.numpy as jnp
from jax.experimental import pallas as pl
from jax.experimental.pallas import tpu as pltpu

N_GRAPHS = 32    # total graphs in the batch (multiple of GROUP * slabs/step)
GROUP = 4        # graphs packed per lane slab: 4 * 32 features = 128 lanes
N_NODES = 32     # nodes per graph
HIDDEN = 32      # in_dim == hidden_dim (residual adds require equality)
BN_EPS = 1e-5


def pack_params(params, *, group=GROUP):
    """One-time packing of weights/biases (hoisted out of the hot path)."""
    f = params["w1"].shape[0]
    eye_g = jnp.eye(group, dtype=jnp.float32)
    return dict(
        gamma=jnp.tile(params["gamma"].astype(jnp.float32), (1, group)),
        beta=jnp.tile(params["beta"].astype(jnp.float32), (1, group)),
        b1=jnp.tile(params["b1"].astype(jnp.float32), (1, group)),
        b2=jnp.tile(params["b2"].astype(jnp.float32), (1, group)),
        bg=jnp.tile(params["bg"].astype(jnp.float32), (1, group)),
        w1=jnp.kron(eye_g, params["w1"]).astype(jnp.bfloat16),   # [GH, GH]
        w2=jnp.kron(eye_g, params["w2"]).astype(jnp.bfloat16),   # [GH, GH]
        wg=jnp.kron(eye_g, params["wg"]).astype(jnp.bfloat16),   # [GH, G]
        expand=jnp.kron(eye_g, jnp.ones((1, f), jnp.float32)),   # [G, GH]
    )


def gcn_forward(adj_hat, h, packed, *, group=GROUP, slabs_per_step=None):
    b, n, _ = adj_hat.shape
    f = h.shape[-1]
    assert b % group == 0, "batch must be a multiple of the lane-packing group"
    gh = group * f
    # Scaling guard: the kron block-diag weight is (G*H)^2 bf16 with 75%
    # structural zeros. Fine at H=32; for H >= 128 drop the lane packing and
    # batch graphs along M / grid instead.
    assert gh <= 512, "kron block-diag packing only intended for small hidden"

    nb = b // group                       # number of 128-lane slabs
    if slabs_per_step is None:
        # keep >= 2 parallel grid steps when possible (v7x megacore); a single
        # step (slabs_per_step=nb) is marginally better on single-TC v5e/v6e.
        slabs_per_step = nb // 2 if (nb % 2 == 0 and nb >= 2) else nb
    s = slabs_per_step
    assert nb % s == 0
    n_steps = nb // s
    sn = s * n                            # node-rows (M) per grid step
    inv_n = 1.0 / n

    # ---- layout plumbing (plain JAX, outside the kernel) --------------------
    # Features: [n_steps, S*N, G*H], row = slab-major node, lane = (graph, feat).
    h_packed = (h.astype(jnp.float32)
                 .reshape(n_steps, s, group, n, f)
                 .transpose(0, 1, 3, 2, 4)
                 .reshape(n_steps, sn, gh))
    # Adjacency: per lane-block g, block-diagonal over the S stacked slabs,
    # lane-dense bf16 [n_steps, G, S*N, S*N].
    adj_r = adj_hat.astype(jnp.float32).reshape(n_steps, s, group, n, n)
    eye_s = jnp.eye(s, dtype=jnp.float32)
    adj_bd = jnp.einsum('tsgij,su->tgsiuj', adj_r, eye_s).reshape(
        n_steps, group, sn, sn).astype(jnp.bfloat16)

    def kernel(adj_ref, h_ref, gamma_ref, beta_ref, w1_ref, b1_ref,
               w2_ref, b2_ref, wg_ref, bg_ref, expand_ref,
               hg_ref, avg_ref, agg_ref):
        gamma = gamma_ref[...]            # [1, GH]
        beta = beta_ref[...]              # [1, GH]

        def batch_norm(x):                # x: [S*N, GH] f32
            # Per-graph, per-slab stats: reduce over the node axis of the 3D
            # view so statistics never mix across slabs. Fused single-pass
            # sum / sum-of-squares (biased variance, training-mode BN).
            x3 = x.reshape(s, n, gh)
            s1 = jnp.sum(x3, axis=1)                      # [S, GH]
            s2 = jnp.sum(x3 * x3, axis=1)                 # [S, GH]
            mu = s1 * inv_n
            var = s2 * inv_n - mu * mu
            scale = jax.lax.rsqrt(var + BN_EPS)
            xn = ((x3 - mu[:, None, :]) * scale[:, None, :]).reshape(sn, gh)
            return xn * gamma + beta, mu

        def graph_conv(xn, w_ref, b_ref):
            # Dense transform with block-diagonal W: one [S*N,GH]x[GH,GH]
            # bf16 MXU matmul, f32 accumulation.
            xw = jnp.dot(xn.astype(jnp.bfloat16), w_ref[...],
                         preferred_element_type=jnp.float32)      # [S*N, GH]
            xw_b = xw.astype(jnp.bfloat16)
            # Aggregation: per lane-block g, block-diag adjacency over slabs.
            # Results land in static lane slices of a VMEM scratch (no lane
            # concat / relayout).
            for g in range(group):
                agg_ref[:, g * f:(g + 1) * f] = jnp.dot(
                    adj_ref[0, g], xw_b[:, g * f:(g + 1) * f],
                    preferred_element_type=jnp.float32)
            return agg_ref[...] + b_ref[...]

        # --- block 1: h = pre + relu(conv1(g, bn(h))) -------------------------
        h_val = h_ref[0]                                  # [S*N, GH] f32
        xn, mu1 = batch_norm(h_val)
        avg_ref[...] = mu1[None]          # init_avg_h == block-1 BN mean
        h_val = h_val + jnp.maximum(graph_conv(xn, w1_ref, b1_ref), 0.0)

        # --- block 2: h = pre + relu(conv2(g, bn(h))) -------------------------
        xn, _ = batch_norm(h_val)
        h_val = h_val + jnp.maximum(graph_conv(xn, w2_ref, b2_ref), 0.0)

        # --- GlobalAttentionPooling (softmax over nodes, per graph) ----------
        gate = jnp.dot(h_val.astype(jnp.bfloat16), wg_ref[...],
                       preferred_element_type=jnp.float32) + bg_ref[...]
        gate3 = gate.reshape(s, n, group)
        gate3 = gate3 - jnp.max(gate3, axis=1, keepdims=True)
        e = jnp.exp(gate3)
        denom = jnp.sum(e, axis=1, keepdims=True)
        alpha = (e * pl.reciprocal(denom, approx=True)).reshape(sn, group)
        # Broadcast alpha[n, g] across that graph's feature lanes via a tiny
        # matmul with the 0/1 "expand" matrix.
        alpha_w = jnp.dot(alpha, expand_ref[...],
                          preferred_element_type=jnp.float32)     # [S*N, GH]
        weighted = (alpha_w * h_val).reshape(s, n, gh)
        hg_ref[...] = jnp.sum(weighted, axis=1)[None]             # [1, S, GH]

    const2 = lambda shape: pl.BlockSpec(shape, lambda i: (0, 0))

    hg_p, avg_p = pl.pallas_call(
        kernel,
        out_shape=(jax.ShapeDtypeStruct((n_steps, s, gh), jnp.float32),  # hg
                   jax.ShapeDtypeStruct((n_steps, s, gh), jnp.float32)), # avg
        grid_spec=pltpu.PrefetchScalarGridSpec(
            num_scalar_prefetch=0,
            grid=(n_steps,),
            in_specs=[
                pl.BlockSpec((1, group, sn, sn), lambda i: (i, 0, 0, 0)),  # adj
                pl.BlockSpec((1, sn, gh), lambda i: (i, 0, 0)),            # h
                const2((1, gh)), const2((1, gh)),                  # gamma, beta
                const2((gh, gh)), const2((1, gh)),                 # w1, b1
                const2((gh, gh)), const2((1, gh)),                 # w2, b2
                const2((gh, group)), const2((1, group)),           # wg, bg
                const2((group, gh)),                               # expand
            ],
            out_specs=(pl.BlockSpec((1, s, gh), lambda i: (i, 0, 0)),
                       pl.BlockSpec((1, s, gh), lambda i: (i, 0, 0))),
            scratch_shapes=[pltpu.VMEM((sn, gh), jnp.float32)],    # agg slab
        ),
        compiler_params=pltpu.CompilerParams(
            dimension_semantics=("parallel",)),
    )(adj_bd, h_packed, packed["gamma"], packed["beta"],
      packed["w1"], packed["b1"], packed["w2"], packed["b2"],
      packed["wg"], packed["bg"], packed["expand"])

    return hg_p.reshape(b, f), avg_p.reshape(b, f)


def gcn_reference(adj_hat, h, params):
    """Pure-JAX f32 reference with identical (per-graph) semantics."""
    gamma, beta = params["gamma"], params["beta"]

    def bn(x):
        mu = jnp.mean(x, axis=0, keepdims=True)
        var = jnp.mean(jnp.square(x - mu), axis=0, keepdims=True)
        return (x - mu) * jax.lax.rsqrt(var + BN_EPS) * gamma + beta

    def single(a, x):
        init_avg = jnp.mean(x, axis=0)
        x = x + jax.nn.relu(a @ (bn(x) @ params["w1"]) + params["b1"])
        x = x + jax.nn.relu(a @ (bn(x) @ params["w2"]) + params["b2"])
        gate = x @ params["wg"] + params["bg"]            # [N, 1]
        alpha = jax.nn.softmax(gate, axis=0)
        return jnp.sum(alpha * x, axis=0), init_avg

    return jax.vmap(single)(adj_hat, h)


if __name__ == "__main__":
    key = jax.random.PRNGKey(0)
    ks = jax.random.split(key, 10)
    B, N, H = N_GRAPHS, N_NODES, HIDDEN

    # Deterministic random undirected graphs (no self loops), degree >= 1.
    a = (jax.random.uniform(ks[0], (B, N, N)) < 0.2).astype(jnp.float32)
    a = jnp.maximum(a, jnp.swapaxes(a, -1, -2))
    a = a * (1.0 - jnp.eye(N, dtype=jnp.float32))
    deg = jnp.clip(jnp.sum(a, axis=-1), 1.0, None)
    dinv = 1.0 / jnp.sqrt(deg)
    adj_hat = a * dinv[:, :, None] * dinv[:, None, :]     # D^-1/2 A D^-1/2

    # Node features for each graph.
    h = jax.random.normal(ks[1], (B, N, H), dtype=jnp.float32)

    # Deterministic synthetic parameters (shapes from the module __init__).
    params = dict(
        gamma=1.0 + 0.1 * jax.random.normal(ks[2], (1, H), dtype=jnp.float32),
        beta=0.1 * jax.random.normal(ks[3], (1, H), dtype=jnp.float32),
        w1=jax.random.normal(ks[4], (H, H), dtype=jnp.float32) / jnp.sqrt(H),
        b1=0.01 * jax.random.normal(ks[5], (1, H), dtype=jnp.float32),
        w2=jax.random.normal(ks[6], (H, H), dtype=jnp.float32) / jnp.sqrt(H),
        b2=0.01 * jax.random.normal(ks[7], (1, H), dtype=jnp.float32),
        wg=jax.random.normal(ks[8], (H, 1), dtype=jnp.float32) / jnp.sqrt(H),
        bg=jnp.zeros((1, 1), dtype=jnp.float32),
    )

    packed = pack_params(params)                  # one-time packing
    fwd = jax.jit(gcn_forward)
    hg, init_avg_h = jax.block_until_ready(fwd(adj_hat, h, packed))

    assert hg.shape == (B, H) and init_avg_h.shape == (B, H)
    assert bool(jnp.all(jnp.isfinite(hg)))
    assert bool(jnp.all(jnp.isfinite(init_avg_h)))

    # Loose-tolerance parity vs f32 reference (kernel uses bf16 MXU inputs and
    # an approximate reciprocal in the softmax).
    hg_ref, avg_ref = jax.block_until_ready(gcn_reference(adj_hat, h, params))
    assert float(jnp.max(jnp.abs(hg - hg_ref))) < 0.2
    assert float(jnp.max(jnp.abs(init_avg_h - avg_ref))) < 5e-3

    print("KERNEL_OK")
</pallas_src>

<mosaic_0001>
module attributes {stable_mosaic.version = 11 : i64} {
  func.func @kernel(%arg0: i32, %arg1: memref<1x4x128x128xbf16, #tpu.memory_space<vmem>>, %arg2: memref<1x128x128xf32, #tpu.memory_space<vmem>>, %arg3: memref<1x128xf32, #tpu.memory_space<vmem>>, %arg4: memref<1x128xf32, #tpu.memory_space<vmem>>, %arg5: memref<128x128xbf16, #tpu.memory_space<vmem>>, %arg6: memref<1x128xf32, #tpu.memory_space<vmem>>, %arg7: memref<128x128xbf16, #tpu.memory_space<vmem>>, %arg8: memref<1x128xf32, #tpu.memory_space<vmem>>, %arg9: memref<128x4xbf16, #tpu.memory_space<vmem>>, %arg10: memref<1x4xf32, #tpu.memory_space<vmem>>, %arg11: memref<4x128xf32, #tpu.memory_space<vmem>>, %arg12: memref<1x4x128xf32, #tpu.memory_space<vmem>>, %arg13: memref<1x4x128xf32, #tpu.memory_space<vmem>>, %arg14: memref<128x128xf32, #tpu.memory_space<vmem>>) attributes {dimension_semantics = [#tpu.dimension_semantics<parallel>], iteration_bounds = array<i64: 2>, scalar_prefetch = 0 : i64, scratch_operands = 1 : i64, tpu.core_type = #tpu.core_type<tc>, window_params = [{transform_indices = @transform_0, window_bounds = array<i64: 1, 4, 128, 128>}, {transform_indices = @transform_1, window_bounds = array<i64: 1, 128, 128>}, {pipeline_mode = #tpu.pipeline_mode<synchronous>, transform_indices = @transform_2, window_bounds = array<i64: 1, 128>}, {pipeline_mode = #tpu.pipeline_mode<synchronous>, transform_indices = @transform_3, window_bounds = array<i64: 1, 128>}, {pipeline_mode = #tpu.pipeline_mode<synchronous>, transform_indices = @transform_4, window_bounds = array<i64: 128, 128>}, {pipeline_mode = #tpu.pipeline_mode<synchronous>, transform_indices = @transform_5, window_bounds = array<i64: 1, 128>}, {pipeline_mode = #tpu.pipeline_mode<synchronous>, transform_indices = @transform_6, window_bounds = array<i64: 128, 128>}, {pipeline_mode = #tpu.pipeline_mode<synchronous>, transform_indices = @transform_7, window_bounds = array<i64: 1, 128>}, {pipeline_mode = #tpu.pipeline_mode<synchronous>, transform_indices = @transform_8, window_bounds = array<i64: 128, 4>}, {pipeline_mode = #tpu.pipeline_mode<synchronous>, transform_indices = @transform_9, window_bounds = array<i64: 1, 4>}, {pipeline_mode = #tpu.pipeline_mode<synchronous>, transform_indices = @transform_10, window_bounds = array<i64: 4, 128>}, {transform_indices = @transform_11, window_bounds = array<i64: 1, 4, 128>}, {transform_indices = @transform_12, window_bounds = array<i64: 1, 4, 128>}]} {
    %c0 = arith.constant 0 : index
    %c0_0 = arith.constant 0 : index
    %0 = vector.load %arg3[%c0, %c0_0] : memref<1x128xf32, #tpu.memory_space<vmem>>, vector<1x128xf32>
    %c0_1 = arith.constant 0 : index
    %c0_2 = arith.constant 0 : index
    %1 = vector.load %arg4[%c0_1, %c0_2] : memref<1x128xf32, #tpu.memory_space<vmem>>, vector<1x128xf32>
    %c0_3 = arith.constant 0 : index
    %c0_4 = arith.constant 0 : index
    %c0_5 = arith.constant 0 : index
    %2 = vector.load %arg2[%c0_3, %c0_4, %c0_5] : memref<1x128x128xf32, #tpu.memory_space<vmem>>, vector<1x128x128xf32>
    %3 = vector.shape_cast %2 : vector<1x128x128xf32> to vector<128x128xf32>
    %4 = vector.shape_cast %3 : vector<128x128xf32> to vector<4x32x128xf32>
    %cst = arith.constant dense<0.000000e+00> : vector<4x128xf32>
    %5 = vector.multi_reduction <add>, %4, %cst [1] : vector<4x32x128xf32> to vector<4x128xf32>
    %6 = arith.mulf %4, %4 : vector<4x32x128xf32>
    %cst_6 = arith.constant dense<0.000000e+00> : vector<4x128xf32>
    %7 = vector.multi_reduction <add>, %6, %cst_6 [1] : vector<4x32x128xf32> to vector<4x128xf32>
    %cst_7 = arith.constant 3.125000e-02 : f32
    %8 = vector.broadcast %cst_7 : f32 to vector<4x128xf32>
    %9 = arith.mulf %5, %8 : vector<4x128xf32>
    %cst_8 = arith.constant 3.125000e-02 : f32
    %10 = vector.broadcast %cst_8 : f32 to vector<4x128xf32>
    %11 = arith.mulf %7, %10 : vector<4x128xf32>
    %12 = arith.mulf %9, %9 : vector<4x128xf32>
    %13 = arith.subf %11, %12 : vector<4x128xf32>
    %cst_9 = arith.constant 9.99999974E-6 : f32
    %14 = vector.broadcast %cst_9 : f32 to vector<4x128xf32>
    %15 = arith.addf %13, %14 : vector<4x128xf32>
    %16 = math.rsqrt %15 : vector<4x128xf32>
    %17 = vector.shape_cast %9 : vector<4x128xf32> to vector<4x1x128xf32>
    %18 = vector.broadcast %17 : vector<4x1x128xf32> to vector<4x32x128xf32>
    %19 = arith.subf %4, %18 : vector<4x32x128xf32>
    %20 = vector.shape_cast %16 : vector<4x128xf32> to vector<4x1x128xf32>
    %21 = vector.broadcast %20 : vector<4x1x128xf32> to vector<4x32x128xf32>
    %22 = arith.mulf %19, %21 : vector<4x32x128xf32>
    %23 = vector.shape_cast %22 : vector<4x32x128xf32> to vector<128x128xf32>
    %24 = vector.broadcast %0 : vector<1x128xf32> to vector<128x128xf32>
    %25 = arith.mulf %23, %24 : vector<128x128xf32>
    %26 = vector.broadcast %1 : vector<1x128xf32> to vector<128x128xf32>
    %27 = arith.addf %25, %26 : vector<128x128xf32>
    %28 = vector.shape_cast %9 : vector<4x128xf32> to vector<1x4x128xf32>
    %c0_10 = arith.constant 0 : index
    %c0_11 = arith.constant 0 : index
    %c0_12 = arith.constant 0 : index
    %29 = vector.load %arg13[%c0_10, %c0_11, %c0_12] : memref<1x4x128xf32, #tpu.memory_space<vmem>>, vector<1x4x128xf32>
    tpu.vector_store %arg13[%c0_10, %c0_11, %c0_12], %28 {strides = array<i32>} : memref<1x4x128xf32, #tpu.memory_space<vmem>>, vector<1x4x128xf32>,
    %30 = arith.truncf %27 : vector<128x128xf32> to vector<128x128xbf16>
    %c0_13 = arith.constant 0 : index
    %c0_14 = arith.constant 0 : index
    %31 = vector.load %arg5[%c0_13, %c0_14] : memref<128x128xbf16, #tpu.memory_space<vmem>>, vector<128x128xbf16>
    %cst_15 = arith.constant dense<0.000000e+00> : vector<128x128xf32>
    %32 = tpu.matmul %30, %31, %cst_15 {dimension_numbers = #tpu.dot_dimension_numbers<[1], [0], [0], [1], [0, 0, 1, 1], [], []>} : vector<128x128xbf16>, vector<128x128xbf16>, vector<128x128xf32> -> vector<128x128xf32>
    %33 = arith.truncf %32 : vector<128x128xf32> to vector<128x128xbf16>
    %c0_16 = arith.constant 0 : index
    %c0_17 = arith.constant 0 : index
    %c0_18 = arith.constant 0 : index
    %c0_19 = arith.constant 0 : index
    %34 = vector.load %arg1[%c0_16, %c0_17, %c0_18, %c0_19] : memref<1x4x128x128xbf16, #tpu.memory_space<vmem>>, vector<1x1x128x128xbf16>
    %35 = vector.shape_cast %34 : vector<1x1x128x128xbf16> to vector<128x128xbf16>
    %36 = vector.extract_strided_slice %33 {offsets = [0, 0], sizes = [128, 32], strides = [1, 1]} : vector<128x128xbf16> to vector<128x32xbf16>
    %cst_20 = arith.constant dense<0.000000e+00> : vector<128x32xf32>
    %37 = tpu.matmul %35, %36, %cst_20 {dimension_numbers = #tpu.dot_dimension_numbers<[1], [0], [0], [1], [0, 0, 1, 1], [], []>} : vector<128x128xbf16>, vector<128x32xbf16>, vector<128x32xf32> -> vector<128x32xf32>
    %c0_21 = arith.constant 0 : index
    %c0_22 = arith.constant 0 : index
    %38 = vector.load %arg14[%c0_21, %c0_22] : memref<128x128xf32, #tpu.memory_space<vmem>>, vector<128x32xf32>
    tpu.vector_store %arg14[%c0_21, %c0_22], %37 {strides = array<i32>} : memref<128x128xf32, #tpu.memory_space<vmem>>, vector<128x32xf32>,
    %c0_23 = arith.constant 0 : index
    %c1 = arith.constant 1 : index
    %c0_24 = arith.constant 0 : index
    %c0_25 = arith.constant 0 : index
    %39 = vector.load %arg1[%c0_23, %c1, %c0_24, %c0_25] : memref<1x4x128x128xbf16, #tpu.memory_space<vmem>>, vector<1x1x128x128xbf16>
    %40 = vector.shape_cast %39 : vector<1x1x128x128xbf16> to vector<128x128xbf16>
    %41 = vector.extract_strided_slice %33 {offsets = [0, 32], sizes = [128, 32], strides = [1, 1]} : vector<128x128xbf16> to vector<128x32xbf16>
    %cst_26 = arith.constant dense<0.000000e+00> : vector<128x32xf32>
    %42 = tpu.matmul %40, %41, %cst_26 {dimension_numbers = #tpu.dot_dimension_numbers<[1], [0], [0], [1], [0, 0, 1, 1], [], []>} : vector<128x128xbf16>, vector<128x32xbf16>, vector<128x32xf32> -> vector<128x32xf32>
    %c0_27 = arith.constant 0 : index
    %c32 = arith.constant 32 : index
    %43 = vector.load %arg14[%c0_27, %c32] : memref<128x128xf32, #tpu.memory_space<vmem>>, vector<128x32xf32>
    tpu.vector_store %arg14[%c0_27, %c32], %42 {strides = array<i32>} : memref<128x128xf32, #tpu.memory_space<vmem>>, vector<128x32xf32>,
    %c0_28 = arith.constant 0 : index
    %c2 = arith.constant 2 : index
    %c0_29 = arith.constant 0 : index
    %c0_30 = arith.constant 0 : index
    %44 = vector.load %arg1[%c0_28, %c2, %c0_29, %c0_30] : memref<1x4x128x128xbf16, #tpu.memory_space<vmem>>, vector<1x1x128x128xbf16>
    %45 = vector.shape_cast %44 : vector<1x1x128x128xbf16> to vector<128x128xbf16>
    %46 = vector.extract_strided_slice %33 {offsets = [0, 64], sizes = [128, 32], strides = [1, 1]} : vector<128x128xbf16> to vector<128x32xbf16>
    %cst_31 = arith.constant dense<0.000000e+00> : vector<128x32xf32>
    %47 = tpu.matmul %45, %46, %cst_31 {dimension_numbers = #tpu.dot_dimension_numbers<[1], [0], [0], [1], [0, 0, 1, 1], [], []>} : vector<128x128xbf16>, vector<128x32xbf16>, vector<128x32xf32> -> vector<128x32xf32>
    %c0_32 = arith.constant 0 : index
    %c64 = arith.constant 64 : index
    %48 = vector.load %arg14[%c0_32, %c64] : memref<128x128xf32, #tpu.memory_space<vmem>>, vector<128x32xf32>
    tpu.vector_store %arg14[%c0_32, %c64], %47 {strides = array<i32>} : memref<128x128xf32, #tpu.memory_space<vmem>>, vector<128x32xf32>,
    %c0_33 = arith.constant 0 : index
    %c3 = arith.constant 3 : index
    %c0_34 = arith.constant 0 : index
    %c0_35 = arith.constant 0 : index
    %49 = vector.load %arg1[%c0_33, %c3, %c0_34, %c0_35] : memref<1x4x128x128xbf16, #tpu.memory_space<vmem>>, vector<1x1x128x128xbf16>
    %50 = vector.shape_cast %49 : vector<1x1x128x128xbf16> to vector<128x128xbf16>
    %51 = vector.extract_strided_slice %33 {offsets = [0, 96], sizes = [128, 32], strides = [1, 1]} : vector<128x128xbf16> to vector<128x32xbf16>
    %cst_36 = arith.constant dense<0.000000e+00> : vector<128x32xf32>
    %52 = tpu.matmul %50, %51, %cst_36 {dimension_numbers = #tpu.dot_dimension_numbers<[1], [0], [0], [1], [0, 0, 1, 1], [], []>} : vector<128x128xbf16>, vector<128x32xbf16>, vector<128x32xf32> -> vector<128x32xf32>
    %c0_37 = arith.constant 0 : index
    %c96 = arith.constant 96 : index
    %53 = vector.load %arg14[%c0_37, %c96] : memref<128x128xf32, #tpu.memory_space<vmem>>, vector<128x32xf32>
    tpu.vector_store %arg14[%c0_37, %c96], %52 {strides = array<i32>} : memref<128x128xf32, #tpu.memory_space<vmem>>, vector<128x32xf32>,
    %c0_38 = arith.constant 0 : index
    %c0_39 = arith.constant 0 : index
    %54 = vector.load %arg14[%c0_38, %c0_39] : memref<128x128xf32, #tpu.memory_space<vmem>>, vector<128x128xf32>
    %c0_40 = arith.constant 0 : index
    %c0_41 = arith.constant 0 : index
    %55 = vector.load %arg6[%c0_40, %c0_41] : memref<1x128xf32, #tpu.memory_space<vmem>>, vector<1x128xf32>
    %56 = vector.broadcast %55 : vector<1x128xf32> to vector<128x128xf32>
    %57 = arith.addf %54, %56 : vector<128x128xf32>
    %cst_42 = arith.constant 0.000000e+00 : f32
    %58 = vector.broadcast %cst_42 : f32 to vector<128x128xf32>
    %59 = arith.maximumf %57, %58 : vector<128x128xf32>
    %60 = arith.addf %3, %59 : vector<128x128xf32>
    %61 = vector.shape_cast %60 : vector<128x128xf32> to vector<4x32x128xf32>
    %cst_43 = arith.constant dense<0.000000e+00> : vector<4x128xf32>
    %62 = vector.multi_reduction <add>, %61, %cst_43 [1] : vector<4x32x128xf32> to vector<4x128xf32>
    %63 = arith.mulf %61, %61 : vector<4x32x128xf32>
    %cst_44 = arith.constant dense<0.000000e+00> : vector<4x128xf32>
    %64 = vector.multi_reduction <add>, %63, %cst_44 [1] : vector<4x32x128xf32> to vector<4x128xf32>
    %cst_45 = arith.constant 3.125000e-02 : f32
    %65 = vector.broadcast %cst_45 : f32 to vector<4x128xf32>
    %66 = arith.mulf %62, %65 : vector<4x128xf32>
    %cst_46 = arith.constant 3.125000e-02 : f32
    %67 = vector.broadcast %cst_46 : f32 to vector<4x128xf32>
    %68 = arith.mulf %64, %67 : vector<4x128xf32>
    %69 = arith.mulf %66, %66 : vector<4x128xf32>
    %70 = arith.subf %68, %69 : vector<4x128xf32>
    %cst_47 = arith.constant 9.99999974E-6 : f32
    %71 = vector.broadcast %cst_47 : f32 to vector<4x128xf32>
    %72 = arith.addf %70, %71 : vector<4x128xf32>
    %73 = math.rsqrt %72 : vector<4x128xf32>
    %74 = vector.shape_cast %66 : vector<4x128xf32> to vector<4x1x128xf32>
    %75 = vector.broadcast %74 : vector<4x1x128xf32> to vector<4x32x128xf32>
    %76 = arith.subf %61, %75 : vector<4x32x128xf32>
    %77 = vector.shape_cast %73 : vector<4x128xf32> to vector<4x1x128xf32>
    %78 = vector.broadcast %77 : vector<4x1x128xf32> to vector<4x32x128xf32>
    %79 = arith.mulf %76, %78 : vector<4x32x128xf32>
    %80 = vector.shape_cast %79 : vector<4x32x128xf32> to vector<128x128xf32>
    %81 = vector.broadcast %0 : vector<1x128xf32> to vector<128x128xf32>
    %82 = arith.mulf %80, %81 : vector<128x128xf32>
    %83 = vector.broadcast %1 : vector<1x128xf32> to vector<128x128xf32>
    %84 = arith.addf %82, %83 : vector<128x128xf32>
    %85 = arith.truncf %84 : vector<128x128xf32> to vector<128x128xbf16>
    %c0_48 = arith.constant 0 : index
    %c0_49 = arith.constant 0 : index
    %86 = vector.load %arg7[%c0_48, %c0_49] : memref<128x128xbf16, #tpu.memory_space<vmem>>, vector<128x128xbf16>
    %cst_50 = arith.constant dense<0.000000e+00> : vector<128x128xf32>
    %87 = tpu.matmul %85, %86, %cst_50 {dimension_numbers = #tpu.dot_dimension_numbers<[1], [0], [0], [1], [0, 0, 1, 1], [], []>} : vector<128x128xbf16>, vector<128x128xbf16>, vector<128x128xf32> -> vector<128x128xf32>
    %88 = arith.truncf %87 : vector<128x128xf32> to vector<128x128xbf16>
    %c0_51 = arith.constant 0 : index
    %c0_52 = arith.constant 0 : index
    %c0_53 = arith.constant 0 : index
    %c0_54 = arith.constant 0 : index
    %89 = vector.load %arg1[%c0_51, %c0_52, %c0_53, %c0_54] : memref<1x4x128x128xbf16, #tpu.memory_space<vmem>>, vector<1x1x128x128xbf16>
    %90 = vector.shape_cast %89 : vector<1x1x128x128xbf16> to vector<128x128xbf16>
    %91 = vector.extract_strided_slice %88 {offsets = [0, 0], sizes = [128, 32], strides = [1, 1]} : vector<128x128xbf16> to vector<128x32xbf16>
    %cst_55 = arith.constant dense<0.000000e+00> : vector<128x32xf32>
    %92 = tpu.matmul %90, %91, %cst_55 {dimension_numbers = #tpu.dot_dimension_numbers<[1], [0], [0], [1], [0, 0, 1, 1], [], []>} : vector<128x128xbf16>, vector<128x32xbf16>, vector<128x32xf32> -> vector<128x32xf32>
    %c0_56 = arith.constant 0 : index
    %c0_57 = arith.constant 0 : index
    %93 = vector.load %arg14[%c0_56, %c0_57] : memref<128x128xf32, #tpu.memory_space<vmem>>, vector<128x32xf32>
    tpu.vector_store %arg14[%c0_56, %c0_57], %92 {strides = array<i32>} : memref<128x128xf32, #tpu.memory_space<vmem>>, vector<128x32xf32>,
    %c0_58 = arith.constant 0 : index
    %c1_59 = arith.constant 1 : index
    %c0_60 = arith.constant 0 : index
    %c0_61 = arith.constant 0 : index
    %94 = vector.load %arg1[%c0_58, %c1_59, %c0_60, %c0_61] : memref<1x4x128x128xbf16, #tpu.memory_space<vmem>>, vector<1x1x128x128xbf16>
    %95 = vector.shape_cast %94 : vector<1x1x128x128xbf16> to vector<128x128xbf16>
    %96 = vector.extract_strided_slice %88 {offsets = [0, 32], sizes = [128, 32], strides = [1, 1]} : vector<128x128xbf16> to vector<128x32xbf16>
    %cst_62 = arith.constant dense<0.000000e+00> : vector<128x32xf32>
    %97 = tpu.matmul %95, %96, %cst_62 {dimension_numbers = #tpu.dot_dimension_numbers<[1], [0], [0], [1], [0, 0, 1, 1], [], []>} : vector<128x128xbf16>, vector<128x32xbf16>, vector<128x32xf32> -> vector<128x32xf32>
    %c0_63 = arith.constant 0 : index
    %c32_64 = arith.constant 32 : index
    %98 = vector.load %arg14[%c0_63, %c32_64] : memref<128x128xf32, #tpu.memory_space<vmem>>, vector<128x32xf32>
    tpu.vector_store %arg14[%c0_63, %c32_64], %97 {strides = array<i32>} : memref<128x128xf32, #tpu.memory_space<vmem>>, vector<128x32xf32>,
    %c0_65 = arith.constant 0 : index
    %c2_66 = arith.constant 2 : index
    %c0_67 = arith.constant 0 : index
    %c0_68 = arith.constant 0 : index
    %99 = vector.load %arg1[%c0_65, %c2_66, %c0_67, %c0_68] : memref<1x4x128x128xbf16, #tpu.memory_space<vmem>>, vector<1x1x128x128xbf16>
    %100 = vector.shape_cast %99 : vector<1x1x128x128xbf16> to vector<128x128xbf16>
    %101 = vector.extract_strided_slice %88 {offsets = [0, 64], sizes = [128, 32], strides = [1, 1]} : vector<128x128xbf16> to vector<128x32xbf16>
    %cst_69 = arith.constant dense<0.000000e+00> : vector<128x32xf32>
    %102 = tpu.matmul %100, %101, %cst_69 {dimension_numbers = #tpu.dot_dimension_numbers<[1], [0], [0], [1], [0, 0, 1, 1], [], []>} : vector<128x128xbf16>, vector<128x32xbf16>, vector<128x32xf32> -> vector<128x32xf32>
    %c0_70 = arith.constant 0 : index
    %c64_71 = arith.constant 64 : index
    %103 = vector.load %arg14[%c0_70, %c64_71] : memref<128x128xf32, #tpu.memory_space<vmem>>, vector<128x32xf32>
    tpu.vector_store %arg14[%c0_70, %c64_71], %102 {strides = array<i32>} : memref<128x128xf32, #tpu.memory_space<vmem>>, vector<128x32xf32>,
    %c0_72 = arith.constant 0 : index
    %c3_73 = arith.constant 3 : index
    %c0_74 = arith.constant 0 : index
    %c0_75 = arith.constant 0 : index
    %104 = vector.load %arg1[%c0_72, %c3_73, %c0_74, %c0_75] : memref<1x4x128x128xbf16, #tpu.memory_space<vmem>>, vector<1x1x128x128xbf16>
    %105 = vector.shape_cast %104 : vector<1x1x128x128xbf16> to vector<128x128xbf16>
    %106 = vector.extract_strided_slice %88 {offsets = [0, 96], sizes = [128, 32], strides = [1, 1]} : vector<128x128xbf16> to vector<128x32xbf16>
    %cst_76 = arith.constant dense<0.000000e+00> : vector<128x32xf32>
    %107 = tpu.matmul %105, %106, %cst_76 {dimension_numbers = #tpu.dot_dimension_numbers<[1], [0], [0], [1], [0, 0, 1, 1], [], []>} : vector<128x128xbf16>, vector<128x32xbf16>, vector<128x32xf32> -> vector<128x32xf32>
    %c0_77 = arith.constant 0 : index
    %c96_78 = arith.constant 96 : index
    %108 = vector.load %arg14[%c0_77, %c96_78] : memref<128x128xf32, #tpu.memory_space<vmem>>, vector<128x32xf32>
    tpu.vector_store %arg14[%c0_77, %c96_78], %107 {strides = array<i32>} : memref<128x128xf32, #tpu.memory_space<vmem>>, vector<128x32xf32>,
    %c0_79 = arith.constant 0 : index
    %c0_80 = arith.constant 0 : index
    %109 = vector.load %arg14[%c0_79, %c0_80] : memref<128x128xf32, #tpu.memory_space<vmem>>, vector<128x128xf32>
    %c0_81 = arith.constant 0 : index
    %c0_82 = arith.constant 0 : index
    %110 = vector.load %arg8[%c0_81, %c0_82] : memref<1x128xf32, #tpu.memory_space<vmem>>, vector<1x128xf32>
    %111 = vector.broadcast %110 : vector<1x128xf32> to vector<128x128xf32>
    %112 = arith.addf %109, %111 : vector<128x128xf32>
    %cst_83 = arith.constant 0.000000e+00 : f32
    %113 = vector.broadcast %cst_83 : f32 to vector<128x128xf32>
    %114 = arith.maximumf %112, %113 : vector<128x128xf32>
    %115 = arith.addf %60, %114 : vector<128x128xf32>
    %116 = arith.truncf %115 : vector<128x128xf32> to vector<128x128xbf16>
    %c0_84 = arith.constant 0 : index
    %c0_85 = arith.constant 0 : index
    %117 = vector.load %arg9[%c0_84, %c0_85] : memref<128x4xbf16, #tpu.memory_space<vmem>>, vector<128x4xbf16>
    %cst_86 = arith.constant dense<0.000000e+00> : vector<128x4xf32>
    %118 = tpu.matmul %116, %117, %cst_86 {dimension_numbers = #tpu.dot_dimension_numbers<[1], [0], [0], [1], [0, 0, 1, 1], [], []>} : vector<128x128xbf16>, vector<128x4xbf16>, vector<128x4xf32> -> vector<128x4xf32>
    %c0_87 = arith.constant 0 : index
    %c0_88 = arith.constant 0 : index
    %119 = vector.load %arg10[%c0_87, %c0_88] : memref<1x4xf32, #tpu.memory_space<vmem>>, vector<1x4xf32>
    %120 = vector.broadcast %119 : vector<1x4xf32> to vector<128x4xf32>
    %121 = arith.addf %118, %120 : vector<128x4xf32>
    %122 = vector.shape_cast %121 : vector<128x4xf32> to vector<4x32x4xf32>
    %cst_89 = arith.constant dense<0xFF800000> : vector<4x4xf32>
    %123 = vector.multi_reduction <maximumf>, %122, %cst_89 [1] : vector<4x32x4xf32> to vector<4x4xf32>
    %124 = vector.shape_cast %123 : vector<4x4xf32> to vector<4x1x4xf32>
    %125 = vector.broadcast %124 : vector<4x1x4xf32> to vector<4x32x4xf32>
    %126 = arith.subf %122, %125 : vector<4x32x4xf32>
    %127 = math.exp %126 : vector<4x32x4xf32>
    %cst_90 = arith.constant dense<0.000000e+00> : vector<4x4xf32>
    %128 = vector.multi_reduction <add>, %127, %cst_90 [1] : vector<4x32x4xf32> to vector<4x4xf32>
    %129 = vector.shape_cast %128 : vector<4x4xf32> to vector<4x1x4xf32>
    %130 = tpu.reciprocal %129 {approx = true} : vector<4x1x4xf32> -> vector<4x1x4xf32>
    %131 = vector.broadcast %130 : vector<4x1x4xf32> to vector<4x32x4xf32>
    %132 = arith.mulf %127, %131 : vector<4x32x4xf32>
    %133 = vector.shape_cast %132 : vector<4x32x4xf32> to vector<128x4xf32>
    %c0_91 = arith.constant 0 : index
    %c0_92 = arith.constant 0 : index
    %134 = vector.load %arg11[%c0_91, %c0_92] : memref<4x128xf32, #tpu.memory_space<vmem>>, vector<4x128xf32>
    %cst_93 = arith.constant dense<0.000000e+00> : vector<128x128xf32>
    %135 = tpu.matmul %133, %134, %cst_93 {dimension_numbers = #tpu.dot_dimension_numbers<[1], [0], [0], [1], [0, 0, 1, 1], [], []>} : vector<128x4xf32>, vector<4x128xf32>, vector<128x128xf32> -> vector<128x128xf32>
    %136 = arith.mulf %135, %115 : vector<128x128xf32>
    %137 = vector.shape_cast %136 : vector<128x128xf32> to vector<4x32x128xf32>
    %cst_94 = arith.constant dense<0.000000e+00> : vector<4x128xf32>
    %138 = vector.multi_reduction <add>, %137, %cst_94 [1] : vector<4x32x128xf32> to vector<4x128xf32>
    %139 = vector.shape_cast %138 : vector<4x128xf32> to vector<1x4x128xf32>
    %c0_95 = arith.constant 0 : index
    %c0_96 = arith.constant 0 : index
    %c0_97 = arith.constant 0 : index
    %140 = vector.load %arg12[%c0_95, %c0_96, %c0_97] : memref<1x4x128xf32, #tpu.memory_space<vmem>>, vector<1x4x128xf32>
    tpu.vector_store %arg12[%c0_95, %c0_96, %c0_97], %139 {strides = array<i32>} : memref<1x4x128xf32, #tpu.memory_space<vmem>>, vector<1x4x128xf32>,
    return
  }
  func.func @transform_0(%arg0: i32) -> (i32, i32, i32, i32) {
    %c0_i32 = arith.constant 0 : i32
    %c0_i32_0 = arith.constant 0 : i32
    %c0_i32_1 = arith.constant 0 : i32
    %c0_i32_2 = arith.constant 0 : i32
    return %arg0, %c0_i32, %c0_i32_0, %c0_i32_1 : i32, i32, i32, i32
  }
  func.func @transform_1(%arg0: i32) -> (i32, i32, i32) {
    %c0_i32 = arith.constant 0 : i32
    %c0_i32_0 = arith.constant 0 : i32
    %c0_i32_1 = arith.constant 0 : i32
    return %arg0, %c0_i32, %c0_i32_0 : i32, i32, i32
  }
  func.func @transform_2(%arg0: i32) -> (i32, i32) {
    %c0_i32 = arith.constant 0 : i32
    %c0_i32_0 = arith.constant 0 : i32
    %c0_i32_1 = arith.constant 0 : i32
    return %c0_i32, %c0_i32_0 : i32, i32
  }
  func.func @transform_3(%arg0: i32) -> (i32, i32) {
    %c0_i32 = arith.constant 0 : i32
    %c0_i32_0 = arith.constant 0 : i32
    %c0_i32_1 = arith.constant 0 : i32
    return %c0_i32, %c0_i32_0 : i32, i32
  }
  func.func @transform_4(%arg0: i32) -> (i32, i32) {
    %c0_i32 = arith.constant 0 : i32
    %c0_i32_0 = arith.constant 0 : i32
    %c0_i32_1 = arith.constant 0 : i32
    return %c0_i32, %c0_i32_0 : i32, i32
  }
  func.func @transform_5(%arg0: i32) -> (i32, i32) {
    %c0_i32 = arith.constant 0 : i32
    %c0_i32_0 = arith.constant 0 : i32
    %c0_i32_1 = arith.constant 0 : i32
    return %c0_i32, %c0_i32_0 : i32, i32
  }
  func.func @transform_6(%arg0: i32) -> (i32, i32) {
    %c0_i32 = arith.constant 0 : i32
    %c0_i32_0 = arith.constant 0 : i32
    %c0_i32_1 = arith.constant 0 : i32
    return %c0_i32, %c0_i32_0 : i32, i32
  }
  func.func @transform_7(%arg0: i32) -> (i32, i32) {
    %c0_i32 = arith.constant 0 : i32
    %c0_i32_0 = arith.constant 0 : i32
    %c0_i32_1 = arith.constant 0 : i32
    return %c0_i32, %c0_i32_0 : i32, i32
  }
  func.func @transform_8(%arg0: i32) -> (i32, i32) {
    %c0_i32 = arith.constant 0 : i32
    %c0_i32_0 = arith.constant 0 : i32
    %c0_i32_1 = arith.constant 0 : i32
    return %c0_i32, %c0_i32_0 : i32, i32
  }
  func.func @transform_9(%arg0: i32) -> (i32, i32) {
    %c0_i32 = arith.constant 0 : i32
    %c0_i32_0 = arith.constant 0 : i32
    %c0_i32_1 = arith.constant 0 : i32
    return %c0_i32, %c0_i32_0 : i32, i32
  }
  func.func @transform_10(%arg0: i32) -> (i32, i32) {
    %c0_i32 = arith.constant 0 : i32
    %c0_i32_0 = arith.constant 0 : i32
    %c0_i32_1 = arith.constant 0 : i32
    return %c0_i32, %c0_i32_0 : i32, i32
  }
  func.func @transform_11(%arg0: i32) -> (i32, i32, i32) {
    %c0_i32 = arith.constant 0 : i32
    %c0_i32_0 = arith.constant 0 : i32
    %c0_i32_1 = arith.constant 0 : i32
    return %arg0, %c0_i32, %c0_i32_0 : i32, i32, i32
  }
  func.func @transform_12(%arg0: i32) -> (i32, i32, i32) {
    %c0_i32 = arith.constant 0 : i32
    %c0_i32_0 = arith.constant 0 : i32
    %c0_i32_1 = arith.constant 0 : i32
    return %arg0, %c0_i32, %c0_i32_0 : i32, i32, i32
  }
}

</mosaic_0001>

<bundles_post_ra>
// kernel: gcn_forward.1
= control target key start
LH: loop header
LB: loop body
LE: loop exit
PB: predicated region body
PF: predicated region fallthrough
CT: control target
= control target key end

     0   :  { %s5046_s21 = smov 0   ;;  %s6146_s0 = inlined_call_operand.vmem [shape: bf16[2,4,128,128], index: 0, kind: input, shape index: {}]   ;;  %s6147_s1 = inlined_call_operand.vmem [shape: f32[2,128,128], index: 1, kind: input, shape index: {}]   ;;  %s6148_s2 = inlined_call_operand.vmem [shape: f32[1,128], index: 2, kind: input, shape index: {}]   ;;  %s6149_s3 = inlined_call_operand.vmem [shape: f32[1,128], index: 3, kind: input, shape index: {}]   ;;  %s6150_s4 = inlined_call_operand.vmem [shape: bf16[128,128], index: 4, kind: input, shape index: {}]   ;;  %s6151_s5 = inlined_call_operand.vmem [shape: f32[1,128], index: 5, kind: input, shape index: {}]   ;;  %s6152_s6 = inlined_call_operand.vmem [shape: bf16[128,128], index: 6, kind: input, shape index: {}]   ;;  %s6153_s7 = inlined_call_operand.vmem [shape: f32[1,128], index: 7, kind: input, shape index: {}]   ;;  %s6154_s8 = inlined_call_operand.vmem [shape: bf16[128,4], index: 8, kind: input, shape index: {}]   ;;  %s6155_s9 = inlined_call_operand.vmem [shape: f32[1,4], index: 9, kind: input, shape index: {}]   ;;  %s6156_s10 = inlined_call_operand.vmem [shape: f32[4,128], index: 10, kind: input, shape index: {}]   ;;  %s6157_s11 = inlined_call_operand.vmem [shape: f32[2,4,128], index: 11, kind: output, shape index: {0}]   ;;  %s6158_s12 = inlined_call_operand.vmem [shape: f32[2,4,128], index: 12, kind: output, shape index: {1}]  }
   0x1 LB: > { %s4005_s22 = sadd.s32 4294967295, %s4976_s21   ;;  %p4009_p0 = scmp.ge.s32.totalorder %s4976_s21, 1  ;;  %s4976_s21 = sphi %s5046_s21, %s23_s21  }
   0x2   : > { %p375_p1 = scmp.lt.s32.totalorder %s4976_s21, 3 }
   0x4   : > { %p376_p2 = pnand %p4009_p0, %p375_p1 }
   0x5   : > { %p425_p3 = scmp.lt.s32.totalorder (!%p376_p2), %s4005_s22, 1  ;;  %s4978_s18 = smov (!%p376_p2), 96  }
   0x6   : > { %379 = sbr.rel (%p376_p2) target bundleno = 2186 (0x88a), region = 64  ;;  %s4979_s19 = smov (!%p376_p2), 32  }
   0x7   : > { %s4980_s20 = smov (!%p376_p2), 64  }
   0xb   : > { %v4808_v0 = vld [vmem:[%s6150_s4 + $0x38] sm:$0xff]   ;;  %v4809_v1 = vld [vmem:[%s6150_s4 + $0x30] sm:$0xff]   ;;  %s6160_s22 = smov (!%p425_p3, %s4005_s22), 1  ;;  %v4810_v2 = vld [vmem:[%s6150_s4 + $0x28] sm:$0xff]   ;;  %vm1000_vm0 = vcmask 261120   ;;  %vm1275_vm1 = vcmask 523520  }
   0xc   : > { %4419 = vmatprep.subr.bf16.mxu0 %v4808_v0  ;;  %s4225_s29 = sshll.u32 %s6160_s22, 7  ;;  %v4811_v3 = vld [vmem:[%s6150_s4 + $0x20] sm:$0xff]   ;;  %s4224_s17 = sshll.u32 %s6160_s22, 8  ;;  %v4812_v23 = vld [vmem:[%s6150_s4 + $0x18] sm:$0xff]   ;;  %v4813_v45 = vld [vmem:[%s6150_s4 + $0x10] sm:$0xff]   ;;  %vm1542_vm2 = vcmask 785920  }
   0xd   : > { %4420 = vmatpush3.bf16.msra.mxu0 %v4808_v0  ;;  %s5069_s14 = scalar_lea.vmem %s6147_s1, %s4225_s29  ;;  %s5140_s24 = scalar_lea.vmem %s6146_s0, %s4224_s17  ;;  %v4814_v63 = vld [vmem:[%s6150_s4 + $0x8] sm:$0xff]   ;;  %vm1809_vm3 = vcmask 1048320   ;;  %vm3699_vm4 = vcmask 1043456   ;;  %vm3477_vm5 = vcmask 31744   ;;  %vm654_vm6 = vcmask 1041409  }
   0xe   : > { %4421 = vmatprep.subr.bf16.mxu0 %v4809_v1  ;;  %v5075_v4 = vld [vmem:[%s5069_s14] sm:$0xff]  ;;  %v5078_v5 = vld [vmem:[%s5069_s14 + $0x8] sm:$0xff]  ;;  %v5081_v6 = vld [vmem:[%s5069_s14 + $0x10] sm:$0xff]  ;;  %vm656_vm7 = vcmask 1042434   ;;  %s4014_s28 = sshll.u32 %s6160_s22, 2  ;;  %vm658_vm8 = vcmask 1043459  }
   0xf   : > { %v5084_v7 = vld [vmem:[%s5069_s14 + $0x18] sm:$0xff]  ;;  %v498_v8 = vmul.f32 %v5075_v4, %v5075_v4  ;;  %v462_v9 = vadd.f32 %v5078_v5, %v5075_v4  ;;  %v499_v10 = vmul.f32 %v5078_v5, %v5078_v5  ;;  %v500_v11 = vmul.f32 %v5081_v6, %v5081_v6  ;;  %v5098_v13 = vld [vmem:[%s5069_s14 + $0x20] sm:$0xff]  ;;  %v5101_v14 = vld [vmem:[%s5069_s14 + $0x28] sm:$0xff]  ;;  %s438_s16 = scalar_lea.vmem %s6157_s11, %s4014_s28 }
  0x10   : > { %v501_v12 = vmul.f32 %v5084_v7, %v5084_v7  ;;  %v5104_v15 = vld [vmem:[%s5069_s14 + $0x30] sm:$0xff]  ;;  %v5107_v16 = vld [vmem:[%s5069_s14 + $0x38] sm:$0xff]  ;;  %v471_v17 = vadd.f32 %v5101_v14, %v5098_v13  ;;  %v502_v18 = vmul.f32 %v5098_v13, %v5098_v13  ;;  %v503_v19 = vmul.f32 %v5101_v14, %v5101_v14  ;;  %v5118_v21 = vld [vmem:[%s5069_s14 + $0x40] sm:$0xff] }
  0x11   : > { %4422 = vmatpush3.bf16.msra.mxu0 %v4809_v1  ;;  %v504_v20 = vmul.f32 %v5104_v15, %v5104_v15  ;;  %v5121_v22 = vld [vmem:[%s5069_s14 + $0x48] sm:$0xff]  ;;  %v463_v24 = vadd.f32 %v462_v9, %v5081_v6  ;;  %v514_v25 = vadd.f32 %v499_v10, %v498_v8  ;;  %v505_v26 = vmul.f32 %v5107_v16, %v5107_v16  ;;  %v5130_v27 = vld [vmem:[%s5069_s14 + $0x50] sm:$0xff]  ;;  %v5133_v28 = vld [vmem:[%s5069_s14 + $0x58] sm:$0xff] }
  0x12   : > { %4423 = vmatprep.subr.bf16.mxu0 %v4810_v2  ;;  %v480_v29 = vadd.f32 %v5121_v22, %v5118_v21  ;;  %v472_v30 = vadd.f32 %v471_v17, %v5104_v15  ;;  %v523_v31 = vadd.f32 %v503_v19, %v502_v18  ;;  %v506_v32 = vmul.f32 %v5118_v21, %v5118_v21  ;;  %v5148_v34 = vld [vmem:[%s5069_s14 + $0x60] sm:$0xff]  ;;  %v5151_v35 = vld [vmem:[%s5069_s14 + $0x68] sm:$0xff]  ;;  %v5154_v36 = vld [vmem:[%s5069_s14 + $0x70] sm:$0xff] }
  0x13   : > { %v507_v33 = vmul.f32 %v5121_v22, %v5121_v22  ;;  %v464_v37 = vadd.f32 %v463_v24, %v5084_v7  ;;  %v515_v38 = vadd.f32 %v514_v25, %v500_v11  ;;  %v508_v40 = vmul.f32 %v5130_v27, %v5130_v27  ;;  %v5170_v53 = vld [vmem:[%s5069_s14 + $0x78] sm:$0xff] }
  0x14   : > { %v481_v39 = vadd.f32 %v480_v29, %v5130_v27  ;;  %v473_v41 = vadd.f32 %v472_v30, %v5107_v16  ;;  %v524_v42 = vadd.f32 %v523_v31, %v504_v20  ;;  %v509_v43 = vmul.f32 %v5133_v28, %v5133_v28 }
  0x15   : > { %4424 = vmatpush3.bf16.msra.mxu0 %v4810_v2  ;;  %v532_v44 = vadd.f32 %v507_v33, %v506_v32  ;;  %v465_v46 = vrot.slane %v464_v37, 4  ;;  %v516_v47 = vadd.f32 %v515_v38, %v501_v12  ;;  %v489_v49 = vadd.f32 %v5151_v35, %v5148_v34 }
  0x16   : > { %4425 = vmatprep.subr.bf16.mxu0 %v4811_v3  ;;  %v482_v48 = vadd.f32 %v481_v39, %v5133_v28  ;;  %v474_v50 = vrot.slane %v473_v41, 4  ;;  %v525_v51 = vadd.f32 %v524_v42, %v505_v26  ;;  %v510_v54 = vmul.f32 %v5148_v34, %v5148_v34  ;;  %v4815_v26 = vld [vmem:[%s6150_s4] sm:$0xff]  }
  0x17   : > { %v533_v52 = vadd.f32 %v532_v44, %v508_v40  ;;  %v466_v55 = vadd.f32 %v465_v46, %v464_v37  ;;  %v517_v56 = vrot.slane %v516_v47, 4  ;;  %v490_v58 = vadd.f32 %v489_v49, %v5154_v36 }
  0x18   : > { %v483_v57 = vrot.slane %v482_v48, 4  ;;  %v475_v59 = vadd.f32 %v474_v50, %v473_v41  ;;  %v526_v60 = vrot.slane %v525_v51, 4  ;;  %v511_v62 = vmul.f32 %v5151_v35, %v5151_v35 }
  0x19   : > { %4426 = vmatpush3.bf16.msra.mxu0 %v4811_v3  ;;  %v534_v61 = vadd.f32 %v533_v52, %v509_v43  ;;  %v467_v0 = vrot.slane %v466_v55, 2  ;;  %v518_v1 = vadd.f32 %v517_v56, %v516_v47  ;;  %v491_v3 = vadd.f32 %v490_v58, %v5170_v53 }
  0x1a   : > { %4427 = vmatprep.subr.bf16.mxu0 %v4812_v23  ;;  %v484_v2 = vadd.f32 %v483_v57, %v482_v48  ;;  %v476_v8 = vrot.slane %v475_v59, 2  ;;  %v527_v9 = vadd.f32 %v526_v60, %v525_v51  ;;  %v512_v11 = vmul.f32 %v5154_v36, %v5154_v36 }
  0x1b   : > { %v535_v10 = vrot.slane %v534_v61, 4  ;;  %v468_v12 = vadd.f32 %v467_v0, %v466_v55  ;;  %v519_v17 = vrot.slane %v518_v1, 2  ;;  %v492_v19 = vrot.slane %v491_v3, 4 }
  0x1c   : > { %v485_v18 = vrot.slane %v484_v2, 2  ;;  %v477_v20 = vadd.f32 %v476_v8, %v475_v59  ;;  %v513_v25 = vmul.f32 %v5170_v53, %v5170_v53  ;;  %v541_v39 = vadd.f32 %v511_v62, %v510_v54 }
  0x1d   : > { %4428 = vmatpush3.bf16.msra.mxu0 %v4812_v23  ;;  %v528_v23 = vrot.slane %v527_v9, 2  ;;  %v536_v24 = vadd.f32 %v535_v10, %v534_v61  ;;  %v469_v29 = vrot.slane %v468_v12, 1  ;;  %v520_v30 = vadd.f32 %v519_v17, %v518_v1 }
  0x1e   : > { %4429 = vmatprep.subr.bf16.mxu0 %v4813_v45  ;;  %v486_v31 = vadd.f32 %v485_v18, %v484_v2  ;;  %v493_v32 = vadd.f32 %v492_v19, %v491_v3  ;;  %v478_v33 = vrot.slane %v477_v20, 1  ;;  %v542_v47 = vadd.f32 %v541_v39, %v512_v11 }
  0x1f   : > { %v529_v37 = vadd.f32 %v528_v23, %v527_v9  ;;  %v537_v38 = vrot.slane %v536_v24, 2  ;;  %v470_v40 = vadd.f32 %v469_v29, %v468_v12  ;;  %v521_v41 = vrot.slane %v520_v30, 1 }
  0x20   : > { %v487_v42 = vrot.slane %v486_v31, 1  ;;  %v494_v43 = vrot.slane %v493_v32, 2  ;;  %v479_v44 = vadd.f32 %v478_v33, %v477_v20  ;;  %v543_v57 = vadd.f32 %v542_v47, %v513_v25  ;;  %v5215_v33 = vld [vmem:[%s6148_s2] ss:$0 sm:$0xff] }
  0x21   : > { %4430 = vmatpush3.bf16.msra.mxu0 %v4813_v45  ;;  %v530_v45 = vrot.slane %v529_v37, 1  ;;  %v538_v46 = vadd.f32 %v537_v38, %v536_v24  ;;  %v522_v48 = vadd.f32 %v521_v41, %v520_v30  ;;  %v5188_v49 = vmul.f32 0.03125, %v470_v40 }
  0x22   : > { %4431 = vmatprep.subr.bf16.mxu0 %v4814_v63  ;;  %v5190_v51 = vmul.f32 0.03125, %v479_v44  ;;  %v488_v52 = vadd.f32 %v487_v42, %v486_v31  ;;  %v495_v60 = vadd.f32 %v494_v43, %v493_v32  ;;  %v544_v2 = vrot.slane %v543_v57, 4 }
  0x23   : > { %v531_v50 = vadd.f32 %v530_v45, %v529_v37  ;;  %v539_v55 = vrot.slane %v538_v46, 1  ;;  %v554_v56 = vmul.f32 0.03125, %v522_v48  ;;  %v558_v54 = vmul.f32 %v5188_v49, %v5188_v49 }
  0x24   : > { %v559_v59 = vmul.f32 %v5190_v51, %v5190_v51  ;;  %v5196_v0 = vmul.f32 0.03125, %v488_v52  ;;  %v496_v10 = vrot.slane %v495_v60, 1  ;;  %v545_v12 = vadd.f32 %v544_v2, %v543_v57 }
  0x25   : > { %4432 = vmatpush3.bf16.msra.mxu0 %v4814_v63  ;;  %v555_v58 = vmul.f32 0.03125, %v531_v50  ;;  %v562_v61 = vsub.f32 %v554_v56, %v558_v54  ;;  %v540_v63 = vadd.f32 %v539_v55, %v538_v46  ;;  %v574_v25 = vsub.f32 %v5075_v4, %v5188_v49 }
  0x26   : > { %4433 = vmatprep.subr.bf16.mxu0 %v4815_v26  ;;  %v560_v9 = vmul.f32 %v5196_v0, %v5196_v0  ;;  %v497_v18 = vadd.f32 %v496_v10, %v495_v60  ;;  %v546_v19 = vrot.slane %v545_v12, 2  ;;  %v575_v29 = vsub.f32 %v5078_v5, %v5188_v49 }
  0x27   : > { %v563_v62 = vsub.f32 %v555_v58, %v559_v59  ;;  %v566_v1 = vadd.f32 1e-05, %v562_v61  ;;  %v556_v8 = vmul.f32 0.03125, %v540_v63  ;;  %v576_v30 = vsub.f32 %v5081_v6, %v5188_v49 }
  0x28   : > { %v547_v20 = vadd.f32 %v546_v19, %v545_v12  ;;  %v5200_v24 = vmul.f32 0.03125, %v497_v18  ;;  %v577_v31 = vsub.f32 %v5084_v7, %v5188_v49  ;;  %v578_v32 = vsub.f32 %v5098_v13, %v5190_v51  ;;  %v5226_v7 = vld [vmem:[%s6149_s3] ss:$0 sm:$0xff] }
  0x29   : > { %4434 = vmatpush3.bf16.msra.mxu0 %v4815_v26  ;;  %v567_v3 = vadd.f32 1e-05, %v563_v62  ;;  %4896 = vrsqrt.f32 %v566_v1  ;;  %v564_v11 = vsub.f32 %v556_v8, %v560_v9  ;;  %v579_v4 = vsub.f32 %v5101_v14, %v5190_v51 }
  0x2a   : > { %v548_v23 = vrot.slane %v547_v20, 1  ;;  %v580_v5 = vsub.f32 %v5104_v15, %v5190_v51  ;;  %v581_v6 = vsub.f32 %v5107_v16, %v5190_v51  ;;  %v582_v13 = vsub.f32 %v5118_v21, %v5196_v0 }
  0x2b   : > { %4898 = vrsqrt.f32 %v567_v3  ;;  %v568_v17 = vadd.f32 1e-05, %v564_v11  ;;  %v583_v39 = vsub.f32 %v5121_v22, %v5196_v0  ;;  %v584_v14 = vsub.f32 %v5130_v27, %v5196_v0 }
  0x2c   : > { %v549_v26 = vadd.f32 %v548_v23, %v547_v20  ;;  %v561_v15 = vmul.f32 %v5200_v24, %v5200_v24  ;;  %v585_v55 = vsub.f32 %v5133_v28, %v5196_v0 }
  0x2d   : > { %4900 = vrsqrt.f32 %v568_v17 }
  0x2e   : > { %v557_v37 = vmul.f32 0.03125, %v549_v26 }
  0x30   : > { %v565_v56 = vsub.f32 %v557_v37, %v561_v15  ;;  %v588_v37 = vsub.f32 %v5154_v36, %v5200_v24 }
  0x32   : > { %v569_v12 = vadd.f32 1e-05, %v565_v56 }
  0x34   : > { %4902 = vrsqrt.f32 %v569_v12  ;;  %v4818_v12 = vld [vmem:[%s5140_s24 + $0x10] sm:$0xff]  }
  0x36   : > { %v4897_v38 = vpop.eup %4896 }
  0x37   : > { %v590_v40 = vmul.f32 %v4897_v38, %v574_v25  ;;  %v591_v41 = vmul.f32 %v4897_v38, %v575_v29  ;;  %v592_v42 = vmul.f32 %v4897_v38, %v576_v30  ;;  %v593_v43 = vmul.f32 %v4897_v38, %v577_v31 }
  0x38   : > { %v4899_v16 = vpop.eup %4898  ;;  %v589_v38 = vsub.f32 %v5170_v53, %v5200_v24 }
  0x39   : > { %v594_v44 = vmul.f32 %v4899_v16, %v578_v32  ;;  %v595_v45 = vmul.f32 %v4899_v16, %v579_v4  ;;  %v596_v46 = vmul.f32 %v4899_v16, %v580_v5  ;;  %v597_v47 = vmul.f32 %v4899_v16, %v581_v6 }
  0x3a   : > { %v612_v21 = vmul.f32 %v5215_v33, %v590_v40  ;;  %v613_v48 = vmul.f32 %v5215_v33, %v591_v41  ;;  %v614_v22 = vmul.f32 %v5215_v33, %v592_v42  ;;  %v615_v27 = vmul.f32 %v5215_v33, %v593_v43  ;;  %v4901_v54 = vpop.eup %4900 }
  0x3b   : > { %v616_v50 = vmul.f32 %v5215_v33, %v594_v44  ;;  %v617_v52 = vmul.f32 %v5215_v33, %v595_v45  ;;  %v618_v63 = vmul.f32 %v5215_v33, %v596_v46  ;;  %v619_v1 = vmul.f32 %v5215_v33, %v597_v47 }
  0x3c   : > { %v634_v57 = vadd.f32 %v5226_v7, %v612_v21  ;;  %v635_v58 = vadd.f32 %v5226_v7, %v613_v48  ;;  %v636_v59 = vadd.f32 %v5226_v7, %v614_v22  ;;  %v637_v60 = vadd.f32 %v5226_v7, %v615_v27 }
  0x3d   : > { %v638_v61 = vadd.f32 %v5226_v7, %v616_v50  ;;  %v639_v62 = vadd.f32 %v5226_v7, %v617_v52  ;;  %v598_v3 = vmul.f32 %v4901_v54, %v582_v13  ;;  %v599_v8 = vmul.f32 %v4901_v54, %v583_v39 }
  0x3e   : > { %v662_v2 = vpack.c.bf16 %v635_v58, %v634_v57  ;;  %v663_v28 = vpack.c.bf16 %v637_v60, %v636_v59  ;;  %v640_v17 = vadd.f32 %v5226_v7, %v618_v63  ;;  %v641_v18 = vadd.f32 %v5226_v7, %v619_v1  ;;  %v4816_v60 = vld [vmem:[%s5140_s24] sm:$0xff]  }
  0x3f   : > { %v664_v9 = vpack.c.bf16 %v639_v62, %v638_v61  ;;  %v620_v10 = vmul.f32 %v5215_v33, %v598_v3  ;;  %v621_v11 = vmul.f32 %v5215_v33, %v599_v8  ;;  %v600_v19 = vmul.f32 %v4901_v54, %v584_v14  ;;  %4467 = vmatprep.mubr.bf16.mxu1 %v4816_v60  ;;  %v4843_v60 = vld [vmem:[%s5140_s24 + $0xd8] sm:$0xff]  }
  0x40   : > { %4435 = vmatprep.mubr.bf16.mxu0 %v662_v2  ;;  %v601_v20 = vmul.f32 %v4901_v54, %v585_v55  ;;  %v665_v26 = vpack.c.bf16 %v641_v18, %v640_v17  ;;  %v586_v5 = vsub.f32 %v5148_v34, %v5200_v24  ;;  %v587_v6 = vsub.f32 %v5151_v35, %v5200_v24  ;;  %v4819_v17 = vld [vmem:[%s5140_s24 + $0x18] sm:$0xff]   ;;  %v4820_v18 = vld [vmem:[%s5140_s24 + $0x20] sm:$0xff]  }
  0x41   : > { %4436 = vmatmul.mubr.bf16.vlgmr.msra.gmra.mxu0 %v663_v28  ;;  %v642_v23 = vadd.f32 %v5226_v7, %v620_v10  ;;  %v643_v25 = vadd.f32 %v5226_v7, %v621_v11  ;;  %v622_v29 = vmul.f32 %v5215_v33, %v600_v19  ;;  %v4903_v39 = vpop.eup %4902  ;;  %v4822_v10 = vld [vmem:[%s5140_s24 + $0x40] sm:$0xff]   ;;  %v4817_v11 = vld [vmem:[%s5140_s24 + $0x8] sm:$0xff]  }
  0x42   : > { %4439 = vmatprep.mubr.bf16.mxu0 %v664_v9  ;;  %v623_v30 = vmul.f32 %v5215_v33, %v601_v20  ;;  %v602_v14 = vmul.f32 %v4903_v39, %v586_v5  ;;  %v603_v15 = vmul.f32 %v4903_v39, %v587_v6  ;;  %v604_v16 = vmul.f32 %v4903_v39, %v588_v37  ;;  %v4821_v19 = vld [vmem:[%s5140_s24 + $0x28] sm:$0xff]   ;;  %v4823_v20 = vld [vmem:[%s5140_s24 + $0x30] sm:$0xff]  }
  0x43   : > { %v666_v31 = vpack.c.bf16 %v643_v25, %v642_v23  ;;  %v644_v32 = vadd.f32 %v5226_v7, %v622_v29  ;;  %v605_v40 = vmul.f32 %v4903_v39, %v589_v38  ;;  %v4825_v23 = vld [vmem:[%s5140_s24 + $0x38] sm:$0xff]   ;;  %v4826_v25 = vld [vmem:[%s5140_s24 + $0x80] sm:$0xff]  }
  0x44   : > { %v645_v4 = vadd.f32 %v5226_v7, %v623_v30  ;;  %v624_v41 = vmul.f32 %v5215_v33, %v602_v14  ;;  %v625_v34 = vmul.f32 %v5215_v33, %v603_v15  ;;  %v626_v42 = vmul.f32 %v5215_v33, %v604_v16 }
  0x45   : > { %v627_v35 = vmul.f32 %v5215_v33, %v605_v40  ;;  %v4824_v40 = vld [vmem:[%s5140_s24 + $0x48] sm:$0xff]  }
  0x46   : > { %v667_v13 = vpack.c.bf16 %v645_v4, %v644_v32  ;;  %v646_v36 = vadd.f32 %v5226_v7, %v624_v41  ;;  %v647_v43 = vadd.f32 %v5226_v7, %v625_v34  ;;  %v648_v53 = vadd.f32 %v5226_v7, %v626_v42  ;;  %v4828_v41 = vld [vmem:[%s5140_s24 + $0x50] sm:$0xff]  }
  0x47   : > { %v649_v44 = vadd.f32 %v5226_v7, %v627_v35 }
  0x48   : > { %v668_v45 = vpack.c.bf16 %v647_v43, %v646_v36  ;;  %v4829_v36 = vld [vmem:[%s5140_s24 + $0x58] sm:$0xff]   ;;  %v4832_v43 = vld [vmem:[%s5140_s24 + $0x60] sm:$0xff]  }
  0x49   : > { %4440 = vmatmul.mubr.bf16.gmra.mxu0 %v665_v26  ;;  %v669_v46 = vpack.c.bf16 %v649_v44, %v648_v53 }
  0x4a   : > { %4443 = vmatprep.mubr.bf16.mxu0 %v666_v31 }
  0x51   : > { %4444 = vmatmul.mubr.bf16.gmra.mxu0 %v667_v13 }
  0x52   : > { %4447 = vmatprep.mubr.bf16.mxu0 %v668_v45 }
  0x59   : > { %4448 = vmatmul.mubr.bf16.gmra.mxu0 %v669_v46  ;;  %v4827_v46 = vld [vmem:[%s5140_s24 + $0x88] sm:$0xff]  }
  0x5a   : > { %4499 = vmatprep.mubr.bf16.mxu0 %v4822_v10 }
 0x101   : > { %v4437_v47 = vpop.f32.mrf.mxu0 }
 0x103   : > { %v768_v21 = vpop.f32.mrf.mxu0 }
 0x105   : > { %v4438_v48 = vpop.f32.mrf.mxu0 }
 0x106   : > { %v832_v9 = vpack.c.bf16 %v4438_v48, %v4437_v47  ;;  %v4833_v47 = vld [vmem:[%s5140_s24 + $0x68] sm:$0xff]   ;;  %v4830_v48 = vld [vmem:[%s5140_s24 + $0x90] sm:$0xff]  }
 0x107   : > { %v771_v22 = vpop.f32.mrf.mxu0 }
 0x108   : > { %v831_v3 = vpack.c.bf16 %v771_v22, %v768_v21  ;;  %v4836_v22 = vld [vmem:[%s5140_s24 + $0x70] sm:$0xff]  }
 0x109   : > { %v4441_v27 = vpop.f32.mrf.mxu0 }
 0x10b   : > { %v784_v50 = vpop.f32.mrf.mxu0 }
 0x10d   : > { %v4442_v33 = vpop.f32.mrf.mxu0 }
 0x10e   : > { %v834_v8 = vpack.c.bf16 %v4442_v33, %v4441_v27  ;;  %v4837_v33 = vld [vmem:[%s5140_s24 + $0x78] sm:$0xff]  }
 0x10f   : > { %v787_v52 = vpop.f32.mrf.mxu0 }
 0x110   : > { %v833_v63 = vpack.c.bf16 %v787_v52, %v784_v50  ;;  %v4831_v50 = vld [vmem:[%s5140_s24 + $0x98] sm:$0xff]   ;;  %v4834_v52 = vld [vmem:[%s5140_s24 + $0xa0] sm:$0xff]  }
 0x111   : > { %v4445_v55 = vpop.f32.mrf.mxu0 }
 0x113   : > { %v800_v56 = vpop.f32.mrf.mxu0 }
 0x115   : > { %v4446_v54 = vpop.f32.mrf.mxu0 }
 0x116   : > { %v836_v57 = vpack.c.bf16 %v4446_v54, %v4445_v55  ;;  %v4838_v55 = vld [vmem:[%s5140_s24 + $0xc0] sm:$0xff]   ;;  %v4835_v54 = vld [vmem:[%s5140_s24 + $0xa8] sm:$0xff]  }
 0x117   : > { %v803_v58 = vpop.f32.mrf.mxu0 }
 0x118   : > { %1100 = vrot.lane.b32.xlu1 %v836_v57, %s4978_s18  ;;  %v835_v59 = vpack.c.bf16 %v803_v58, %v800_v56  ;;  %v4840_v58 = vld [vmem:[%s5140_s24 + $0xb0] sm:$0xff]  }
 0x119   : > { %v4449_v7 = vpop.f32.mrf.mxu0 }
 0x11b   : > { %v816_v61 = vpop.f32.mrf.mxu0 }
 0x11c   : > { %1098 = vrot.lane.b32.xlu1 %v835_v59, %s4978_s18 }
 0x11d   : > { %v4450_v62 = vpop.f32.mrf.mxu0 }
 0x11e   : > { %v838_v1 = vpack.c.bf16 %v4450_v62, %v4449_v7  ;;  %v4842_v7 = vld [vmem:[%s5140_s24 + $0xd0] sm:$0xff]   ;;  %v4845_v62 = vld [vmem:[%s5140_s24 + $0xe8] sm:$0xff]  }
 0x11f   : > { %v819_v2 = vpop.f32.mrf.mxu0 }
 0x120   : > { %v837_v28 = vpack.c.bf16 %v819_v2, %v816_v61  ;;  %1094 = vrot.lane.b32.xlu1 %v833_v63, %s4978_s18  ;;  %1104 = vrot.lane.b32.xlu0 %v838_v1, %s4978_s18  ;;  %v4844_v61 = vld [vmem:[%s5140_s24 + $0xe0] sm:$0xff]  }
 0x121   : > { %4451 = vmatprep.subr.bf16.mxu1 %v838_v1 }
 0x122   : > { %4452 = vmatpush3.bf16.msra.mxu1 %v838_v1 }
 0x123   : > { %4453 = vmatprep.subr.bf16.mxu1 %v837_v28 }
 0x124   : > { %1090 = vrot.lane.b32.xlu1 %v831_v3, %s4978_s18  ;;  %1102 = vrot.lane.b32.xlu0 %v837_v28, %s4978_s18 }
 0x126   : > { %4454 = vmatpush3.bf16.msra.mxu1 %v837_v28 }
 0x127   : > { %4455 = vmatprep.subr.bf16.mxu1 %v836_v57 }
 0x128   : > { %1638 = vrot.lane.b32.xlu1 %v838_v1, %s4979_s19  ;;  %1096 = vrot.lane.b32.xlu0 %v834_v8, %s4978_s18 }
 0x12a   : > { %4456 = vmatpush3.bf16.msra.mxu1 %v836_v57 }
 0x12b   : > { %4457 = vmatprep.subr.bf16.mxu1 %v835_v59 }
 0x12c   : > { %1636 = vrot.lane.b32.xlu1 %v837_v28, %s4979_s19  ;;  %1092 = vrot.lane.b32.xlu0 %v832_v9, %s4978_s18 }
 0x12e   : > { %4458 = vmatpush3.bf16.msra.mxu1 %v835_v59 }
 0x12f   : > { %4459 = vmatprep.subr.bf16.mxu1 %v834_v8 }
 0x130   : > { %1634 = vrot.lane.b32.xlu1 %v836_v57, %s4979_s19  ;;  %1371 = vrot.lane.b32.xlu0 %v838_v1, %s4980_s20  ;;  %v4847_v1 = vld [vmem:[%s5140_s24 + $0xf8] sm:$0xff]  }
 0x132   : > { %4460 = vmatpush3.bf16.msra.mxu1 %v834_v8 }
 0x133   : > { %4461 = vmatprep.subr.bf16.mxu1 %v833_v63 }
 0x134   : > { %1632 = vrot.lane.b32.xlu1 %v835_v59, %s4979_s19  ;;  %1369 = vrot.lane.b32.xlu0 %v837_v28, %s4980_s20 }
 0x136   : > { %4462 = vmatpush3.bf16.msra.mxu1 %v833_v63 }
 0x137   : > { %4463 = vmatprep.subr.bf16.mxu1 %v832_v9 }
 0x138   : > { %1630 = vrot.lane.b32.xlu1 %v834_v8, %s4979_s19  ;;  %1367 = vrot.lane.b32.xlu0 %v836_v57, %s4980_s20  ;;  %v4839_v57 = vld [vmem:[%s5140_s24 + $0xc8] sm:$0xff]  }
 0x13a   : > { %4464 = vmatpush3.bf16.msra.mxu1 %v832_v9 }
 0x13b   : > { %4465 = vmatprep.subr.bf16.mxu1 %v831_v3 }
 0x13c   : > { %1628 = vrot.lane.b32.xlu1 %v833_v63, %s4979_s19  ;;  %1365 = vrot.lane.b32.xlu0 %v835_v59, %s4980_s20  ;;  %v4841_v59 = vld [vmem:[%s5140_s24 + $0xb8] sm:$0xff]  }
 0x13e   : > { %4466 = vmatpush3.bf16.msra.mxu1 %v831_v3 }
 0x140   : > { %1626 = vrot.lane.b32.xlu1 %v832_v9, %s4979_s19  ;;  %1363 = vrot.lane.b32.xlu0 %v834_v8, %s4980_s20 }
 0x141   : > { %4468 = vmatmul.mubr.bf16.vlgmr.msra.gmra.mxu1 %v4817_v11 }
 0x142   : > { %4471 = vmatprep.mubr.bf16.mxu1 %v4818_v12 }
 0x144   : > { %1624 = vrot.lane.b32.xlu1 %v831_v3, %s4979_s19  ;;  %1361 = vrot.lane.b32.xlu0 %v833_v63, %s4980_s20  ;;  %v4846_v63 = vld [vmem:[%s5140_s24 + $0xf0] sm:$0xff]  }
 0x148   : > { %1359 = vrot.lane.b32.xlu0 %v832_v9, %s4980_s20 }
 0x149   : > { %4472 = vmatmul.mubr.bf16.gmra.mxu1 %v4819_v17 }
 0x14a   : > { %4475 = vmatprep.mubr.bf16.mxu1 %v4820_v18 }
 0x14c   : > { %1357 = vrot.lane.b32.xlu0 %v831_v3, %s4980_s20 }
 0x151   : > { %4476 = vmatmul.mubr.bf16.gmra.mxu1 %v4821_v19 }
 0x152   : > { %4479 = vmatprep.mubr.bf16.mxu1 %v4823_v20 }
 0x159   : > { %4480 = vmatmul.mubr.bf16.gmra.mxu1 %v4825_v23 }
 0x15a   : > { %4531 = vmatprep.mubr.bf16.mxu1 %v4826_v25 }
 0x18a   : > { %v1101_v26 = vpop.permute.xlu1 %1100 }
 0x18e   : > { %v1099_v29 = vpop.permute.xlu1 %1098 }
 0x192   : > { %v1105_v30 = vpop.permute.xlu0 %1104  ;;  %v1095_v31 = vpop.permute.xlu1 %1094 }
 0x193   : > { %4483 = vmatprep.subr.bf16.mxu0 %v1105_v30 }
 0x194   : > { %4484 = vmatpush3.bf16.msra.mxu0 %v1105_v30 }
 0x196   : > { %v1103_v32 = vpop.permute.xlu0 %1102  ;;  %v1091_v5 = vpop.permute.xlu1 %1090 }
 0x197   : > { %4485 = vmatprep.subr.bf16.mxu0 %v1103_v32 }
 0x198   : > { %4486 = vmatpush3.bf16.msra.mxu0 %v1103_v32 }
 0x199   : > { %4487 = vmatprep.subr.bf16.mxu0 %v1101_v26 }
 0x19a   : > { %v1097_v4 = vpop.permute.xlu0 %1096  ;;  %v1639_v37 = vpop.permute.xlu1 %1638 }
 0x19c   : > { %4488 = vmatpush3.bf16.msra.mxu0 %v1101_v26 }
 0x19d   : > { %4489 = vmatprep.subr.bf16.mxu0 %v1099_v29 }
 0x19e   : > { %v1093_v6 = vpop.permute.xlu0 %1092  ;;  %v1637_v39 = vpop.permute.xlu1 %1636 }
 0x1a0   : > { %4490 = vmatpush3.bf16.msra.mxu0 %v1099_v29 }
 0x1a1   : > { %4491 = vmatprep.subr.bf16.mxu0 %v1097_v4 }
 0x1a2   : > { %v1372_v38 = vpop.permute.xlu0 %1371  ;;  %v1635_v15 = vpop.permute.xlu1 %1634 }
 0x1a3   : > { %4515 = vmatprep.subr.bf16.mxu1 %v1372_v38 }
 0x1a4   : > { %4492 = vmatpush3.bf16.msra.mxu0 %v1097_v4  ;;  %4516 = vmatpush3.bf16.msra.mxu1 %v1372_v38 }
 0x1a5   : > { %4493 = vmatprep.subr.bf16.mxu0 %v1095_v31 }
 0x1a6   : > { %v1370_v13 = vpop.permute.xlu0 %1369  ;;  %v1633_v42 = vpop.permute.xlu1 %1632 }
 0x1a7   : > { %4517 = vmatprep.subr.bf16.mxu1 %v1370_v13 }
 0x1a8   : > { %4494 = vmatpush3.bf16.msra.mxu0 %v1095_v31  ;;  %4518 = vmatpush3.bf16.msra.mxu1 %v1370_v13 }
 0x1a9   : > { %4495 = vmatprep.subr.bf16.mxu0 %v1093_v6 }
 0x1aa   : > { %v1368_v14 = vpop.permute.xlu0 %1367  ;;  %v1631_v53 = vpop.permute.xlu1 %1630 }
 0x1ab   : > { %4519 = vmatprep.subr.bf16.mxu1 %v1368_v14 }
 0x1ac   : > { %4496 = vmatpush3.bf16.msra.mxu0 %v1093_v6  ;;  %4520 = vmatpush3.bf16.msra.mxu1 %v1368_v14 }
 0x1ad   : > { %4497 = vmatprep.subr.bf16.mxu0 %v1091_v5 }
 0x1ae   : > { %v1366_v16 = vpop.permute.xlu0 %1365  ;;  %v1629_v21 = vpop.permute.xlu1 %1628 }
 0x1af   : > { %4521 = vmatprep.subr.bf16.mxu1 %v1366_v16 }
 0x1b0   : > { %4498 = vmatpush3.bf16.msra.mxu0 %v1091_v5  ;;  %4522 = vmatpush3.bf16.msra.mxu1 %v1366_v16 }
 0x1b1   : > { %4547 = vmatprep.subr.bf16.mxu0 %v1639_v37 }
 0x1b2   : > { %v1364_v34 = vpop.permute.xlu0 %1363  ;;  %v1627_v27 = vpop.permute.xlu1 %1626 }
 0x1b3   : > { %4523 = vmatprep.subr.bf16.mxu1 %v1364_v34  ;;  %4500 = vmatmul.mubr.bf16.vlgmr.msra.gmra.mxu0 %v4824_v40 }
 0x1b4   : > { %4524 = vmatpush3.bf16.msra.mxu1 %v1364_v34  ;;  %4548 = vmatpush3.bf16.msra.mxu0 %v1639_v37 }
 0x1b5   : > { %4549 = vmatprep.subr.bf16.mxu0 %v1637_v39  ;;  %4503 = vmatprep.mubr.bf16.mxu0 %v4828_v41 }
 0x1b6   : > { %v1362_v35 = vpop.permute.xlu0 %1361  ;;  %v1625_v56 = vpop.permute.xlu1 %1624 }
 0x1b7   : > { %4525 = vmatprep.subr.bf16.mxu1 %v1362_v35 }
 0x1b8   : > { %4526 = vmatpush3.bf16.msra.mxu1 %v1362_v35  ;;  %4550 = vmatpush3.bf16.msra.mxu0 %v1637_v39 }
 0x1b9   : > { %4551 = vmatprep.subr.bf16.mxu0 %v1635_v15 }
 0x1ba   : > { %v1360_v44 = vpop.permute.xlu0 %1359 }
 0x1bb   : > { %4527 = vmatprep.subr.bf16.mxu1 %v1360_v44  ;;  %4504 = vmatmul.mubr.bf16.gmra.mxu0 %v4829_v36 }
 0x1bc   : > { %4528 = vmatpush3.bf16.msra.mxu1 %v1360_v44  ;;  %4552 = vmatpush3.bf16.msra.mxu0 %v1635_v15 }
 0x1bd   : > { %4553 = vmatprep.subr.bf16.mxu0 %v1633_v42  ;;  %4507 = vmatprep.mubr.bf16.mxu0 %v4832_v43 }
 0x1be   : > { %v1358_v45 = vpop.permute.xlu0 %1357 }
 0x1bf   : > { %4529 = vmatprep.subr.bf16.mxu1 %v1358_v45 }
 0x1c0   : > { %4530 = vmatpush3.bf16.msra.mxu1 %v1358_v45  ;;  %4554 = vmatpush3.bf16.msra.mxu0 %v1633_v42 }
 0x1c1   : > { %4555 = vmatprep.subr.bf16.mxu0 %v1631_v53 }
 0x1c3   : > { %4532 = vmatmul.mubr.bf16.vlgmr.msra.gmra.mxu1 %v4827_v46  ;;  %4508 = vmatmul.mubr.bf16.gmra.mxu0 %v4833_v47 }
 0x1c4   : > { %4556 = vmatpush3.bf16.msra.mxu0 %v1631_v53  ;;  %4535 = vmatprep.mubr.bf16.mxu1 %v4830_v48 }
 0x1c5   : > { %4557 = vmatprep.subr.bf16.mxu0 %v1629_v21  ;;  %4511 = vmatprep.mubr.bf16.mxu0 %v4836_v22 }
 0x1c8   : > { %4558 = vmatpush3.bf16.msra.mxu0 %v1629_v21 }
 0x1c9   : > { %4559 = vmatprep.subr.bf16.mxu0 %v1627_v27 }
 0x1cb   : > { %4536 = vmatmul.mubr.bf16.gmra.mxu1 %v4831_v50  ;;  %4512 = vmatmul.mubr.bf16.gmra.mxu0 %v4837_v33 }
 0x1cc   : > { %4560 = vmatpush3.bf16.msra.mxu0 %v1627_v27  ;;  %4539 = vmatprep.mubr.bf16.mxu1 %v4834_v52 }
 0x1cd   : > { %4561 = vmatprep.subr.bf16.mxu0 %v1625_v56  ;;  %4563 = vmatprep.mubr.bf16.mxu0 %v4838_v55 }
 0x1d0   : > { %4562 = vmatpush3.bf16.msra.mxu0 %v1625_v56 }
 0x1d3   : > { %4540 = vmatmul.mubr.bf16.gmra.mxu1 %v4835_v54  ;;  %4564 = vmatmul.mubr.bf16.vlgmr.msra.gmra.mxu0 %v4839_v57 }
 0x1d4   : > { %4543 = vmatprep.mubr.bf16.mxu1 %v4840_v58  ;;  %4567 = vmatprep.mubr.bf16.mxu0 %v4842_v7 }
 0x1db   : > { %4544 = vmatmul.mubr.bf16.gmra.mxu1 %v4841_v59  ;;  %4568 = vmatmul.mubr.bf16.gmra.mxu0 %v4843_v60 }
 0x1dc   : > { %4571 = vmatprep.mubr.bf16.mxu0 %v4844_v61 }
 0x1e3   : > { %4572 = vmatmul.mubr.bf16.gmra.mxu0 %v4845_v62 }
 0x1e4   : > { %4575 = vmatprep.mubr.bf16.mxu0 %v4846_v63 }
 0x1eb   : > { %4576 = vmatmul.mubr.bf16.gmra.mxu0 %v4847_v1 }
 0x201   : > { %v4469_v2 = vpop.f32.mrf.mxu1 }
 0x202   : > { %1003 = vst.msk [vmem:[#allocation2 + $0x10] sm:$0xff] %vm1000_vm0, %v4469_v2 }
 0x203   : > { %v937_v28 = vpop.f32.mrf.mxu1 }
 0x204   : > { %1001 = vst.msk [vmem:[#allocation2] sm:$0xff] %vm1000_vm0, %v937_v28 }
 0x205   : > { %v4470_v3 = vpop.f32.mrf.mxu1 }
 0x206   : > { %1004 = vst.msk [vmem:[#allocation2 + $0x18] sm:$0xff] %vm1000_vm0, %v4470_v3 }
 0x207   : > { %v940_v8 = vpop.f32.mrf.mxu1 }
 0x208   : > { %1002 = vst.msk [vmem:[#allocation2 + $0x8] sm:$0xff] %vm1000_vm0, %v940_v8  ;;  %v4848_v8 = vld [vmem:[%s6152_s6 + $0x38] sm:$0xff]  }
 0x209   : > { %v4473_v9 = vpop.f32.mrf.mxu1  ;;  %4579 = vmatprep.subr.bf16.mxu1 %v4848_v8 }
 0x20a   : > { %1007 = vst.msk [vmem:[#allocation2 + $0x30] sm:$0xff] %vm1000_vm0, %v4473_v9  ;;  %4580 = vmatpush3.bf16.msra.mxu1 %v4848_v8 }
 0x20b   : > { %v953_v10 = vpop.f32.mrf.mxu1 }
 0x20c   : > { %1005 = vst.msk [vmem:[#allocation2 + $0x20] sm:$0xff] %vm1000_vm0, %v953_v10  ;;  %v4849_v10 = vld [vmem:[%s6152_s6 + $0x30] sm:$0xff]  }
 0x20d   : > { %v4474_v11 = vpop.f32.mrf.mxu1  ;;  %4581 = vmatprep.subr.bf16.mxu1 %v4849_v10 }
 0x20e   : > { %1008 = vst.msk [vmem:[#allocation2 + $0x38] sm:$0xff] %vm1000_vm0, %v4474_v11  ;;  %4582 = vmatpush3.bf16.msra.mxu1 %v4849_v10  ;;  %v4850_v11 = vld [vmem:[%s6152_s6 + $0x28] sm:$0xff]  }
 0x20f   : > { %v956_v12 = vpop.f32.mrf.mxu1  ;;  %4583 = vmatprep.subr.bf16.mxu1 %v4850_v11 }
 0x210   : > { %1006 = vst.msk [vmem:[#allocation2 + $0x28] sm:$0xff] %vm1000_vm0, %v956_v12  ;;  %v4851_v12 = vld [vmem:[%s6152_s6 + $0x20] sm:$0xff]  }
 0x211   : > { %v4477_v17 = vpop.f32.mrf.mxu1 }
 0x212   : > { %1011 = vst.msk [vmem:[#allocation2 + $0x50] sm:$0xff] %vm1000_vm0, %v4477_v17  ;;  %4584 = vmatpush3.bf16.msra.mxu1 %v4850_v11  ;;  %v4852_v17 = vld [vmem:[%s6152_s6 + $0x18] sm:$0xff]  }
 0x213   : > { %v969_v18 = vpop.f32.mrf.mxu1  ;;  %4585 = vmatprep.subr.bf16.mxu1 %v4851_v12 }
 0x214   : > { %1009 = vst.msk [vmem:[#allocation2 + $0x40] sm:$0xff] %vm1000_vm0, %v969_v18  ;;  %v4853_v18 = vld [vmem:[%s6152_s6 + $0x10] sm:$0xff]  }
 0x215   : > { %v4478_v19 = vpop.f32.mrf.mxu1 }
 0x216   : > { %1012 = vst.msk [vmem:[#allocation2 + $0x58] sm:$0xff] %vm1000_vm0, %v4478_v19  ;;  %4586 = vmatpush3.bf16.msra.mxu1 %v4851_v12  ;;  %v4854_v19 = vld [vmem:[%s6152_s6 + $0x8] sm:$0xff]  }
 0x217   : > { %v972_v20 = vpop.f32.mrf.mxu1  ;;  %4587 = vmatprep.subr.bf16.mxu1 %v4852_v17 }
 0x218   : > { %1010 = vst.msk [vmem:[#allocation2 + $0x48] sm:$0xff] %vm1000_vm0, %v972_v20 }
 0x219   : > { %v4481_v23 = vpop.f32.mrf.mxu1 }
 0x21a   : > { %1015 = vst.msk [vmem:[#allocation2 + $0x70] sm:$0xff] %vm1000_vm0, %v4481_v23  ;;  %4588 = vmatpush3.bf16.msra.mxu1 %v4852_v17  ;;  %v4855_v23 = vld [vmem:[%s6152_s6] sm:$0xff]   ;;  %v4953_v17 = vld [vmem:[%s5069_s14 + $0x10] sm:$0xff] }
 0x21b   : > { %v985_v25 = vpop.f32.mrf.mxu1  ;;  %4589 = vmatprep.subr.bf16.mxu1 %v4853_v18 }
 0x21c   : > { %1013 = vst.msk [vmem:[#allocation2 + $0x60] sm:$0xff] %vm1000_vm0, %v985_v25 }
 0x21d   : > { %v4482_v26 = vpop.f32.mrf.mxu1 }
 0x21e   : > { %1016 = vst.msk [vmem:[#allocation2 + $0x78] sm:$0xff] %vm1000_vm0, %v4482_v26  ;;  %4590 = vmatpush3.bf16.msra.mxu1 %v4853_v18 }
 0x21f   : > { %v988_v29 = vpop.f32.mrf.mxu1  ;;  %4591 = vmatprep.subr.bf16.mxu1 %v4854_v19 }
 0x220   : > { %1014 = vst.msk [vmem:[#allocation2 + $0x68] sm:$0xff] %vm1000_vm0, %v988_v29 }
 0x222   : > { %4592 = vmatpush3.bf16.msra.mxu1 %v4854_v19  ;;  %v4954_v19 = vld [vmem:[%s5069_s14 + $0x8] sm:$0xff] }
 0x223   : > { %4593 = vmatprep.subr.bf16.mxu1 %v4855_v23 }
 0x226   : > { %4594 = vmatpush3.bf16.msra.mxu1 %v4855_v23  ;;  %v4955_v23 = vld [vmem:[%s5069_s14 + $0x18] sm:$0xff] }
 0x273   : > { %v4501_v30 = vpop.f32.mrf.mxu0 }
 0x274   : > { %1231 = vrot.lane.b32.xlu0 %v4501_v30, %s4979_s19 }
 0x275   : > { %v1148_v31 = vpop.f32.mrf.mxu0 }
 0x277   : > { %v4502_v32 = vpop.f32.mrf.mxu0 }
 0x278   : > { %1227 = vrot.lane.b32.xlu0 %v1148_v31, %s4979_s19 }
 0x279   : > { %v1151_v4 = vpop.f32.mrf.mxu0 }
 0x27b   : > { %v4505_v5 = vpop.f32.mrf.mxu0 }
 0x27d   : > { %v1164_v6 = vpop.f32.mrf.mxu0 }
 0x27f   : > { %v4506_v37 = vpop.f32.mrf.mxu0 }
 0x281   : > { %v1167_v38 = vpop.f32.mrf.mxu0 }
 0x283   : > { %v4533_v13 = vpop.f32.mrf.mxu1  ;;  %v4509_v39 = vpop.f32.mrf.mxu0 }
 0x284   : > { %1498 = vrot.lane.b32.xlu1 %v4533_v13, %s4980_s20 }
 0x285   : > { %v1415_v14 = vpop.f32.mrf.mxu1  ;;  %v1180_v15 = vpop.f32.mrf.mxu0 }
 0x286   : > { %1494 = vrot.lane.b32.xlu0 %v1415_v14, %s4980_s20 }
 0x287   : > { %v4534_v16 = vpop.f32.mrf.mxu1  ;;  %v4510_v40 = vpop.f32.mrf.mxu0 }
 0x288   : > { %1229 = vrot.lane.b32.xlu1 %v1151_v4, %s4979_s19 }
 0x289   : > { %v1418_v41 = vpop.f32.mrf.mxu1  ;;  %v1183_v34 = vpop.f32.mrf.mxu0 }
 0x28a   : > { %1233 = vrot.lane.b32.xlu0 %v4502_v32, %s4979_s19 }
 0x28b   : > { %v4537_v42 = vpop.f32.mrf.mxu1  ;;  %v4513_v36 = vpop.f32.mrf.mxu0 }
 0x28c   : > { %1496 = vrot.lane.b32.xlu1 %v1418_v41, %s4980_s20 }
 0x28d   : > { %v1431_v35 = vpop.f32.mrf.mxu1  ;;  %v1196_v53 = vpop.f32.mrf.mxu0 }
 0x28e   : > { %1500 = vrot.lane.b32.xlu0 %v4534_v16, %s4980_s20 }
 0x28f   : > { %v4538_v43 = vpop.f32.mrf.mxu1  ;;  %v4514_v45 = vpop.f32.mrf.mxu0 }
 0x290   : > { %1506 = vrot.lane.b32.xlu1 %v4537_v42, %s4980_s20 }
 0x291   : > { %v1434_v44 = vpop.f32.mrf.mxu1  ;;  %v1199_v47 = vpop.f32.mrf.mxu0 }
 0x292   : > { %1239 = vrot.lane.b32.xlu0 %v4505_v5, %s4979_s19 }
 0x293   : > { %v4541_v46 = vpop.f32.mrf.mxu1  ;;  %v4565_v48 = vpop.f32.mrf.mxu0 }
 0x294   : > { %1237 = vrot.lane.b32.xlu1 %v1167_v38, %s4979_s19 }
 0x295   : > { %v1447_v21 = vpop.f32.mrf.mxu1  ;;  %v1682_v27 = vpop.f32.mrf.mxu0 }
 0x296   : > { %1235 = vrot.lane.b32.xlu0 %v1164_v6, %s4979_s19 }
 0x297   : > { %v4542_v22 = vpop.f32.mrf.mxu1  ;;  %v4566_v33 = vpop.f32.mrf.mxu0 }
 0x298   : > { %1504 = vrot.lane.b32.xlu1 %v1434_v44, %s4980_s20 }
 0x299   : > { %v1450_v50 = vpop.f32.mrf.mxu1  ;;  %v1685_v52 = vpop.f32.mrf.mxu0 }
 0x29a   : > { %1502 = vrot.lane.b32.xlu0 %v1431_v35, %s4980_s20 }
 0x29b   : > { %v4569_v55 = vpop.f32.mrf.mxu0  ;;  %v4545_v56 = vpop.f32.mrf.mxu1 }
 0x29c   : > { %1514 = vrot.lane.b32.xlu1 %v4541_v46, %s4980_s20 }
 0x29d   : > { %v1698_v54 = vpop.f32.mrf.mxu0  ;;  %v1463_v57 = vpop.f32.mrf.mxu1 }
 0x29e   : > { %1241 = vrot.lane.b32.xlu0 %v4506_v37, %s4979_s19 }
 0x29f   : > { %v4570_v58 = vpop.f32.mrf.mxu0  ;;  %v4546_v7 = vpop.f32.mrf.mxu1 }
 0x2a0   : > { %1245 = vrot.lane.b32.xlu1 %v1183_v34, %s4979_s19 }
 0x2a1   : > { %v1701_v59 = vpop.f32.mrf.mxu0  ;;  %v1466_v60 = vpop.f32.mrf.mxu1 }
 0x2a2   : > { %1508 = vrot.lane.b32.xlu0 %v4538_v43, %s4980_s20 }
 0x2a3   : > { %v4573_v61 = vpop.f32.mrf.mxu0 }
 0x2a4   : > { %1512 = vrot.lane.b32.xlu1 %v1450_v50, %s4980_s20  ;;  %v5457_v50 = vld [vmem:[%s6151_s5] ss:$0 sm:$0xff] }
 0x2a5   : > { %v1714_v62 = vpop.f32.mrf.mxu0 }
 0x2a6   : > { %1247 = vrot.lane.b32.xlu0 %v4509_v39, %s4979_s19 }
 0x2a7   : > { %v4574_v63 = vpop.f32.mrf.mxu0 }
 0x2a8   : > { %1253 = vrot.lane.b32.xlu1 %v1199_v47, %s4979_s19 }
 0x2a9   : > { %v1717_v1 = vpop.f32.mrf.mxu0 }
 0x2aa   : > { %1243 = vrot.lane.b32.xlu0 %v1180_v15, %s4979_s19 }
 0x2ab   : > { %v4577_v2 = vpop.f32.mrf.mxu0 }
 0x2ac   : > { %1765 = vrot.lane.b32.xlu1 %v4565_v48, %s4978_s18 }
 0x2ad   : > { %v1730_v28 = vpop.f32.mrf.mxu0 }
 0x2ae   : > { %1510 = vrot.lane.b32.xlu0 %v1447_v21, %s4980_s20 }
 0x2af   : > { %v4578_v3 = vpop.f32.mrf.mxu0 }
 0x2b0   : > { %1761 = vrot.lane.b32.xlu1 %v1682_v27, %s4978_s18 }
 0x2b1   : > { %v1733_v9 = vpop.f32.mrf.mxu0 }
 0x2b2   : > { %1249 = vrot.lane.b32.xlu0 %v4510_v40, %s4979_s19 }
 0x2b4   : > { %1767 = vrot.lane.b32.xlu1 %v4566_v33, %s4978_s18 }
 0x2b6   : > { %1516 = vrot.lane.b32.xlu0 %v4542_v22, %s4980_s20 }
 0x2b8   : > { %1520 = vrot.lane.b32.xlu1 %v1466_v60, %s4980_s20 }
 0x2ba   : > { %1251 = vrot.lane.b32.xlu0 %v1196_v53, %s4979_s19 }
 0x2bc   : > { %1773 = vrot.lane.b32.xlu1 %v4569_v55, %s4978_s18 }
 0x2be   : > { %1763 = vrot.lane.b32.xlu0 %v1685_v52, %s4978_s18 }
 0x2c0   : > { %1769 = vrot.lane.b32.xlu1 %v1698_v54, %s4978_s18 }
 0x2c2   : > { %1518 = vrot.lane.b32.xlu0 %v1463_v57, %s4980_s20 }
 0x2c4   : > { %1775 = vrot.lane.b32.xlu1 %v4570_v58, %s4978_s18 }
 0x2c6   : > { %1771 = vrot.lane.b32.xlu0 %v1701_v59, %s4978_s18 }
 0x2c8   : > { %1522 = vrot.lane.b32.xlu1 %v4545_v56, %s4980_s20 }
 0x2ca   : > { %1255 = vrot.lane.b32.xlu0 %v4513_v36, %s4979_s19 }
 0x2cc   : > { %1781 = vrot.lane.b32.xlu1 %v4573_v61, %s4978_s18 }
 0x2ce   : > { %1779 = vrot.lane.b32.xlu0 %v1717_v1, %s4978_s18 }
 0x2d0   : > { %1777 = vrot.lane.b32.xlu1 %v1714_v62, %s4978_s18 }
 0x2d2   : > { %1257 = vrot.lane.b32.xlu0 %v4514_v45, %s4979_s19 }
 0x2d4   : > { %1783 = vrot.lane.b32.xlu1 %v4574_v63, %s4978_s18 }
 0x2d6   : > { %1787 = vrot.lane.b32.xlu0 %v1733_v9, %s4978_s18  ;;  %v4952_v9 = vld [vmem:[%s5069_s14] sm:$0xff] }
 0x2d8   : > { %1789 = vrot.lane.b32.xlu1 %v4577_v2, %s4978_s18 }
 0x2da   : > { %1524 = vrot.lane.b32.xlu0 %v4546_v7, %s4980_s20 }
 0x2dc   : > { %1785 = vrot.lane.b32.xlu1 %v1730_v28, %s4978_s18 }
 0x2e0   : > { %1791 = vrot.lane.b32.xlu1 %v4578_v3, %s4978_s18 }
 0x2e6   : > { %v1232_v20 = vpop.permute.xlu0 %1231 }
 0x2e7   : > { %1278 = vst.msk [vmem:[#allocation2 + $0x10] sm:$0xff] %vm1275_vm1, %v1232_v20 }
 0x2ea   : > { %v1228_v25 = vpop.permute.xlu0 %1227 }
 0x2eb   : > { %1276 = vst.msk [vmem:[#allocation2] sm:$0xff] %vm1275_vm1, %v1228_v25 }
 0x2f6   : > { %v1499_v26 = vpop.permute.xlu1 %1498 }
 0x2f7   : > { %1545 = vst.msk [vmem:[#allocation2 + $0x10] sm:$0xff] %vm1542_vm2, %v1499_v26 }
 0x2f8   : > { %v1495_v29 = vpop.permute.xlu0 %1494 }
 0x2f9   : > { %1543 = vst.msk [vmem:[#allocation2] sm:$0xff] %vm1542_vm2, %v1495_v29 }
 0x2fa   : > { %v1230_v30 = vpop.permute.xlu1 %1229 }
 0x2fb   : > { %1277 = vst.msk [vmem:[#allocation2 + $0x8] sm:$0xff] %vm1275_vm1, %v1230_v30 }
 0x2fc   : > { %v1234_v31 = vpop.permute.xlu0 %1233 }
 0x2fd   : > { %1279 = vst.msk [vmem:[#allocation2 + $0x18] sm:$0xff] %vm1275_vm1, %v1234_v31 }
 0x2fe   : > { %v1497_v32 = vpop.permute.xlu1 %1496 }
 0x2ff   : > { %1544 = vst.msk [vmem:[#allocation2 + $0x8] sm:$0xff] %vm1542_vm2, %v1497_v32 }
 0x300   : > { %v1501_v4 = vpop.permute.xlu0 %1500 }
 0x301   : > { %1546 = vst.msk [vmem:[#allocation2 + $0x18] sm:$0xff] %vm1542_vm2, %v1501_v4 }
 0x302   : > { %v1507_v5 = vpop.permute.xlu1 %1506 }
 0x304   : > { %v1240_v6 = vpop.permute.xlu0 %1239 }
 0x305   : > { %1282 = vst.msk [vmem:[#allocation2 + $0x30] sm:$0xff] %vm1275_vm1, %v1240_v6 }
 0x306   : > { %1549 = vst.msk [vmem:[#allocation2 + $0x30] sm:$0xff] %vm1542_vm2, %v1507_v5  ;;  %v1238_v37 = vpop.permute.xlu1 %1237 }
 0x307   : > { %1281 = vst.msk [vmem:[#allocation2 + $0x28] sm:$0xff] %vm1275_vm1, %v1238_v37 }
 0x308   : > { %v1236_v38 = vpop.permute.xlu0 %1235 }
 0x309   : > { %1280 = vst.msk [vmem:[#allocation2 + $0x20] sm:$0xff] %vm1275_vm1, %v1236_v38 }
 0x30a   : > { %v1505_v13 = vpop.permute.xlu1 %1504 }
 0x30b   : > { %1548 = vst.msk [vmem:[#allocation2 + $0x28] sm:$0xff] %vm1542_vm2, %v1505_v13 }
 0x30c   : > { %v1503_v39 = vpop.permute.xlu0 %1502 }
 0x30d   : > { %1547 = vst.msk [vmem:[#allocation2 + $0x20] sm:$0xff] %vm1542_vm2, %v1503_v39 }
 0x30e   : > { %v1515_v14 = vpop.permute.xlu1 %1514 }
 0x310   : > { %v1242_v15 = vpop.permute.xlu0 %1241 }
 0x311   : > { %1283 = vst.msk [vmem:[#allocation2 + $0x38] sm:$0xff] %vm1275_vm1, %v1242_v15 }
 0x312   : > { %v1246_v16 = vpop.permute.xlu1 %1245 }
 0x313   : > { %1285 = vst.msk [vmem:[#allocation2 + $0x48] sm:$0xff] %vm1275_vm1, %v1246_v16 }
 0x314   : > { %v1509_v40 = vpop.permute.xlu0 %1508 }
 0x315   : > { %1550 = vst.msk [vmem:[#allocation2 + $0x38] sm:$0xff] %vm1542_vm2, %v1509_v40 }
 0x316   : > { %v1513_v41 = vpop.permute.xlu1 %1512 }
 0x317   : > { %1552 = vst.msk [vmem:[#allocation2 + $0x48] sm:$0xff] %vm1542_vm2, %v1513_v41 }
 0x318   : > { %v1248_v34 = vpop.permute.xlu0 %1247 }
 0x319   : > { %1286 = vst.msk [vmem:[#allocation2 + $0x50] sm:$0xff] %vm1275_vm1, %v1248_v34 }
 0x31a   : > { %1553 = vst.msk [vmem:[#allocation2 + $0x50] sm:$0xff] %vm1542_vm2, %v1515_v14  ;;  %v1254_v42 = vpop.permute.xlu1 %1253 }
 0x31b   : > { %1289 = vst.msk [vmem:[#allocation2 + $0x68] sm:$0xff] %vm1275_vm1, %v1254_v42 }
 0x31c   : > { %v1244_v35 = vpop.permute.xlu0 %1243 }
 0x31d   : > { %1284 = vst.msk [vmem:[#allocation2 + $0x40] sm:$0xff] %vm1275_vm1, %v1244_v35 }
 0x31e   : > { %v1766_v36 = vpop.permute.xlu1 %1765 }
 0x31f   : > { %1812 = vst.msk [vmem:[#allocation2 + $0x10] sm:$0xff] %vm1809_vm3, %v1766_v36 }
 0x320   : > { %v1511_v43 = vpop.permute.xlu0 %1510 }
 0x321   : > { %1551 = vst.msk [vmem:[#allocation2 + $0x40] sm:$0xff] %vm1542_vm2, %v1511_v43 }
 0x322   : > { %v1762_v53 = vpop.permute.xlu1 %1761 }
 0x323   : > { %1810 = vst.msk [vmem:[#allocation2] sm:$0xff] %vm1809_vm3, %v1762_v53  ;;  %v4956_v53 = vld [vmem:[%s5069_s14 + $0x20] sm:$0xff] }
 0x324   : > { %v1250_v44 = vpop.permute.xlu0 %1249 }
 0x325   : > { %1287 = vst.msk [vmem:[#allocation2 + $0x58] sm:$0xff] %vm1275_vm1, %v1250_v44 }
 0x326   : > { %v1768_v45 = vpop.permute.xlu1 %1767  ;;  %v1828_v33 = vld [vmem:[#allocation2 + $0x10] sm:$0xff] }
 0x327   : > { %1813 = vst.msk [vmem:[#allocation2 + $0x18] sm:$0xff] %vm1809_vm3, %v1768_v45  ;;  %v1851_v57 = vadd.f32 %v5457_v50, %v1828_v33 }
 0x328   : > { %v1517_v46 = vpop.permute.xlu0 %1516 }
 0x329   : > { %1554 = vst.msk [vmem:[#allocation2 + $0x58] sm:$0xff] %vm1542_vm2, %v1517_v46  ;;  %v1867_v62 = vmax.f32 %v1851_v57, 0.0 }
 0x32a   : > { %v1521_v47 = vpop.permute.xlu1 %1520  ;;  %v1826_v27 = vld [vmem:[#allocation2] sm:$0xff] }
 0x32b   : > { %1556 = vst.msk [vmem:[#allocation2 + $0x68] sm:$0xff] %vm1542_vm2, %v1521_v47  ;;  %v1849_v56 = vadd.f32 %v5457_v50, %v1826_v27  ;;  %v5472_v18 = vadd.f32 %v4953_v17, %v1867_v62  ;;  %v4957_v47 = vld [vmem:[%s5069_s14 + $0x28] sm:$0xff] }
 0x32c   : > { %v1252_v21 = vpop.permute.xlu0 %1251 }
 0x32d   : > { %1288 = vst.msk [vmem:[#allocation2 + $0x60] sm:$0xff] %vm1275_vm1, %v1252_v21  ;;  %v1865_v59 = vmax.f32 %v1849_v56, 0.0  ;;  %v1935_v39 = vmul.f32 %v5472_v18, %v5472_v18 }
 0x32e   : > { %v1774_v48 = vpop.permute.xlu1 %1773  ;;  %v1829_v55 = vld [vmem:[#allocation2 + $0x18] sm:$0xff] }
 0x32f   : > { %1816 = vst.msk [vmem:[#allocation2 + $0x30] sm:$0xff] %vm1809_vm3, %v1774_v48  ;;  %v1852_v58 = vadd.f32 %v5457_v50, %v1829_v55  ;;  %v5468_v10 = vadd.f32 %v4952_v9, %v1865_v59  ;;  %v4958_v48 = vld [vmem:[%s5069_s14 + $0x30] sm:$0xff] }
 0x330   : > { %v1764_v22 = vpop.permute.xlu0 %1763 }
 0x331   : > { %1811 = vst.msk [vmem:[#allocation2 + $0x8] sm:$0xff] %vm1809_vm3, %v1764_v22  ;;  %v1868_v1 = vmax.f32 %v1852_v58, 0.0  ;;  %v1933_v4 = vmul.f32 %v5468_v10, %v5468_v10 }
 0x332   : > { %v1770_v52 = vpop.permute.xlu1 %1769 }
 0x333   : > { %1814 = vst.msk [vmem:[#allocation2 + $0x20] sm:$0xff] %vm1809_vm3, %v1770_v52  ;;  %v5479_v25 = vadd.f32 %v4955_v23, %v1868_v1  ;;  %v4959_v52 = vld [vmem:[%s5069_s14 + $0x38] sm:$0xff] }
 0x334   : > { %v1519_v54 = vpop.permute.xlu0 %1518 }
 0x335   : > { %1555 = vst.msk [vmem:[#allocation2 + $0x60] sm:$0xff] %vm1542_vm2, %v1519_v54  ;;  %v1936_v41 = vmul.f32 %v5479_v25, %v5479_v25 }
 0x336   : > { %v1776_v7 = vpop.permute.xlu1 %1775  ;;  %v1832_v3 = vld [vmem:[#allocation2 + $0x30] sm:$0xff] }
 0x337   : > { %1817 = vst.msk [vmem:[#allocation2 + $0x38] sm:$0xff] %vm1809_vm3, %v1776_v7  ;;  %v1855_v26 = vadd.f32 %v5457_v50, %v1832_v3 }
 0x338   : > { %v1772_v60 = vpop.permute.xlu0 %1771  ;;  %v1827_v61 = vld [vmem:[#allocation2 + $0x8] sm:$0xff] }
 0x339   : > { %1815 = vst.msk [vmem:[#allocation2 + $0x28] sm:$0xff] %vm1809_vm3, %v1772_v60  ;;  %v1850_v63 = vadd.f32 %v5457_v50, %v1827_v61  ;;  %v1871_v16 = vmax.f32 %v1855_v26, 0.0 }
 0x33a   : > { %v1523_v2 = vpop.permute.xlu1 %1522  ;;  %v1830_v28 = vld [vmem:[#allocation2 + $0x20] sm:$0xff] }
 0x33b   : > { %v1866_v8 = vmax.f32 %v1850_v63, 0.0  ;;  %v1853_v12 = vadd.f32 %v5457_v50, %v1830_v28  ;;  %v5508_v22 = vadd.f32 %v4958_v48, %v1871_v16 }
 0x33c   : > { %v1256_v11 = vpop.permute.xlu0 %1255 }
 0x33d   : > { %1290 = vst.msk [vmem:[#allocation2 + $0x70] sm:$0xff] %vm1275_vm1, %v1256_v11  ;;  %v5476_v20 = vadd.f32 %v4954_v19, %v1866_v8  ;;  %v1869_v38 = vmax.f32 %v1853_v12, 0.0  ;;  %v1939_v28 = vmul.f32 %v5508_v22, %v5508_v22 }
 0x33e   : > { %v1833_v29 = vld [vmem:[#allocation2 + $0x38] sm:$0xff]  ;;  %1557 = vst.msk [vmem:[#allocation2 + $0x70] sm:$0xff] %vm1542_vm2, %v1523_v2  ;;  %v1782_v30 = vpop.permute.xlu1 %1781 }
 0x33f   : > { %v1856_v31 = vadd.f32 %v5457_v50, %v1833_v29  ;;  %1820 = vst.msk [vmem:[#allocation2 + $0x50] sm:$0xff] %vm1809_vm3, %v1782_v30  ;;  %v1897_v32 = vadd.f32 %v5476_v20, %v5468_v10  ;;  %v1934_v5 = vmul.f32 %v5476_v20, %v5476_v20  ;;  %v5501_v44 = vadd.f32 %v4956_v53, %v1869_v38 }
 0x340   : > { %v1780_v6 = vpop.permute.xlu0 %1779  ;;  %v1831_v37 = vld [vmem:[#allocation2 + $0x28] sm:$0xff] }
 0x341   : > { %1819 = vst.msk [vmem:[#allocation2 + $0x48] sm:$0xff] %vm1809_vm3, %v1780_v6  ;;  %v1898_v13 = vadd.f32 %v1897_v32, %v5472_v18  ;;  %v1949_v14 = vadd.f32 %v1934_v5, %v1933_v4  ;;  %v1854_v15 = vadd.f32 %v5457_v50, %v1831_v37  ;;  %v1872_v34 = vmax.f32 %v1856_v31, 0.0 }
 0x342   : > { %v1778_v40 = vpop.permute.xlu1 %1777  ;;  %v1937_v59 = vmul.f32 %v5501_v44, %v5501_v44 }
 0x343   : > { %1818 = vst.msk [vmem:[#allocation2 + $0x40] sm:$0xff] %vm1809_vm3, %v1778_v40  ;;  %v1899_v42 = vadd.f32 %v1898_v13, %v5479_v25  ;;  %v1950_v35 = vadd.f32 %v1949_v14, %v1935_v39  ;;  %v1870_v36 = vmax.f32 %v1854_v15, 0.0  ;;  %v5511_v55 = vadd.f32 %v4959_v52, %v1872_v34  ;;  %v4960_v40 = vld [vmem:[%s5069_s14 + $0x50] sm:$0xff] }
 0x344   : > { %v1258_v43 = vpop.permute.xlu0 %1257 }
 0x345   : > { %1291 = vst.msk [vmem:[#allocation2 + $0x78] sm:$0xff] %vm1275_vm1, %v1258_v43  ;;  %v1900_v45 = vrot.slane %v1899_v42, 4  ;;  %v1951_v46 = vadd.f32 %v1950_v35, %v1936_v41  ;;  %v5505_v21 = vadd.f32 %v4957_v47, %v1870_v36  ;;  %v1940_v19 = vmul.f32 %v5511_v55, %v5511_v55  ;;  %v4962_v36 = vld [vmem:[%s5069_s14 + $0x48] sm:$0xff] }
 0x346   : > { %v1836_v27 = vld [vmem:[#allocation2 + $0x50] sm:$0xff]  ;;  %v1784_v33 = vpop.permute.xlu1 %1783 }
 0x347   : > { %1821 = vst.msk [vmem:[#allocation2 + $0x58] sm:$0xff] %vm1809_vm3, %v1784_v33  ;;  %v1901_v56 = vadd.f32 %v1900_v45, %v1899_v42  ;;  %v1952_v54 = vrot.slane %v1951_v46, 4  ;;  %v1906_v57 = vadd.f32 %v5505_v21, %v5501_v44  ;;  %v1859_v58 = vadd.f32 %v5457_v50, %v1836_v27  ;;  %v4961_v42 = vld [vmem:[%s5069_s14 + $0x40] sm:$0xff] }
 0x348   : > { %v1788_v7 = vpop.permute.xlu0 %1787  ;;  %v1938_v60 = vmul.f32 %v5505_v21, %v5505_v21  ;;  %v1835_v61 = vld [vmem:[#allocation2 + $0x48] sm:$0xff] }
 0x349   : > { %1823 = vst.msk [vmem:[#allocation2 + $0x68] sm:$0xff] %vm1809_vm3, %v1788_v7  ;;  %v1902_v62 = vrot.slane %v1901_v56, 2  ;;  %v1953_v63 = vadd.f32 %v1952_v54, %v1951_v46  ;;  %v1907_v1 = vadd.f32 %v1906_v57, %v5508_v22  ;;  %v1858_v9 = vadd.f32 %v5457_v50, %v1835_v61  ;;  %v4963_v54 = vld [vmem:[%s5069_s14 + $0x58] sm:$0xff] }
 0x34a   : > { %v1790_v2 = vpop.permute.xlu1 %1789  ;;  %v1958_v3 = vadd.f32 %v1938_v60, %v1937_v59  ;;  %v1834_v8 = vld [vmem:[#allocation2 + $0x40] sm:$0xff]  ;;  %v1875_v23 = vmax.f32 %v1859_v58, 0.0 }
 0x34b   : > { %1824 = vst.msk [vmem:[#allocation2 + $0x70] sm:$0xff] %vm1809_vm3, %v1790_v2  ;;  %v1903_v11 = vadd.f32 %v1902_v62, %v1901_v56  ;;  %v1954_v12 = vrot.slane %v1953_v63, 2  ;;  %v1908_v17 = vadd.f32 %v1907_v1, %v5511_v55  ;;  %v1857_v30 = vadd.f32 %v5457_v50, %v1834_v8 }
 0x34c   : > { %v1525_v26 = vpop.permute.xlu0 %1524  ;;  %v1959_v29 = vadd.f32 %v1958_v3, %v1939_v28  ;;  %v1874_v31 = vmax.f32 %v1858_v9, 0.0  ;;  %v5535_v41 = vadd.f32 %v4960_v40, %v1875_v23  ;;  %v4964_v40 = vld [vmem:[%s5069_s14 + $0x60] sm:$0xff] }
 0x34d   : > { %1558 = vst.msk [vmem:[#allocation2 + $0x78] sm:$0xff] %vm1542_vm2, %v1525_v26  ;;  %v1904_v32 = vrot.slane %v1903_v11, 1  ;;  %v1955_v4 = vadd.f32 %v1954_v12, %v1953_v63  ;;  %v1909_v5 = vrot.slane %v1908_v17, 4  ;;  %v1873_v13 = vmax.f32 %v1857_v30, 0.0 }
 0x34e   : > { %v1837_v6 = vld [vmem:[#allocation2 + $0x58] sm:$0xff]  ;;  %v1786_v37 = vpop.permute.xlu1 %1785  ;;  %v1960_v38 = vadd.f32 %v1959_v29, %v1940_v19  ;;  %v5541_v43 = vadd.f32 %v4962_v36, %v1874_v31  ;;  %v1943_v2 = vmul.f32 %v5535_v41, %v5535_v41 }
 0x34f   : > { %v1860_v39 = vadd.f32 %v5457_v50, %v1837_v6  ;;  %1822 = vst.msk [vmem:[#allocation2 + $0x60] sm:$0xff] %vm1809_vm3, %v1786_v37  ;;  %v1905_v14 = vadd.f32 %v1904_v32, %v1903_v11  ;;  %v1956_v15 = vrot.slane %v1955_v4, 1  ;;  %v1910_v16 = vadd.f32 %v1909_v5, %v1908_v17 }
 0x350   : > { %v1961_v34 = vrot.slane %v1960_v38, 4  ;;  %v5538_v35 = vadd.f32 %v4961_v42, %v1873_v13  ;;  %v1839_v48 = vld [vmem:[#allocation2 + $0x68] sm:$0xff]  ;;  %v1942_v60 = vmul.f32 %v5541_v43, %v5541_v43 }
 0x351   : > { %v1876_v53 = vmax.f32 %v1860_v39, 0.0  ;;  %v1957_v45 = vadd.f32 %v1956_v15, %v1955_v4  ;;  %v5543_v46 = vmul.f32 0.03125, %v1905_v14  ;;  %v1911_v47 = vrot.slane %v1910_v16, 2  ;;  %v4965_v42 = vld [vmem:[%s5069_s14 + $0x68] sm:$0xff] }
 0x352   : > { %v1792_v27 = vpop.permute.xlu1 %1791  ;;  %v1962_v33 = vadd.f32 %v1961_v34, %v1960_v38  ;;  %v1915_v52 = vadd.f32 %v5541_v43, %v5538_v35  ;;  %v1941_v56 = vmul.f32 %v5538_v35, %v5538_v35  ;;  %v1840_v58 = vld [vmem:[#allocation2 + $0x70] sm:$0xff]  ;;  %v1862_v61 = vadd.f32 %v5457_v50, %v1839_v48 }
 0x353   : > { %v5550_v57 = vadd.f32 %v4963_v54, %v1876_v53  ;;  %1825 = vst.msk [vmem:[#allocation2 + $0x78] sm:$0xff] %vm1809_vm3, %v1792_v27  ;;  %v1989_v7 = vmul.f32 0.03125, %v1957_v45  ;;  %v1993_v59 = vmul.f32 %v5543_v46, %v5543_v46  ;;  %v1912_v63 = vadd.f32 %v1911_v47, %v1910_v16  ;;  %v4966_v48 = vld [vmem:[%s5069_s14 + $0x70] sm:$0xff] }
 0x354   : > { %v1963_v1 = vrot.slane %v1962_v33, 2  ;;  %v1863_v28 = vadd.f32 %v5457_v50, %v1840_v58  ;;  %v1916_v3 = vadd.f32 %v1915_v52, %v5535_v41  ;;  %v1967_v9 = vadd.f32 %v1942_v60, %v1941_v56 }
 0x355   : > { %v1997_v62 = vsub.f32 %v1989_v7, %v1993_v59  ;;  %v1944_v8 = vmul.f32 %v5550_v57, %v5550_v57  ;;  %v1913_v17 = vrot.slane %v1912_v63, 1  ;;  %v1878_v30 = vmax.f32 %v1862_v61, 0.0 }
 0x356   : > { %v1838_v11 = vld [vmem:[#allocation2 + $0x60] sm:$0xff]  ;;  %v1964_v19 = vadd.f32 %v1963_v1, %v1962_v33  ;;  %v1917_v23 = vadd.f32 %v1916_v3, %v5550_v57  ;;  %v1968_v26 = vadd.f32 %v1967_v9, %v1943_v2  ;;  %v1879_v4 = vmax.f32 %v1863_v28, 0.0  ;;  %v4967_v33 = vld [vmem:[%s5069_s14 + $0x78] sm:$0xff]  ;;  %s442_s14 = scalar_lea.vmem %s6158_s12, %s4014_s28 }
 0x357   : > { %v2001_v12 = vadd.f32 1e-05, %v1997_v62  ;;  %v1861_v29 = vadd.f32 %v5457_v50, %v1838_v11  ;;  %v1914_v31 = vadd.f32 %v1913_v17, %v1912_v63  ;;  %v5573_v36 = vadd.f32 %v4965_v42, %v1878_v30 }
 0x358   : > { %v1965_v32 = vrot.slane %v1964_v19, 1  ;;  %v1918_v6 = vrot.slane %v1917_v23, 4  ;;  %v1969_v37 = vadd.f32 %v1968_v26, %v1944_v8  ;;  %v5578_v27 = vadd.f32 %v4966_v48, %v1879_v4 }
 0x359   : > { %4904 = vrsqrt.f32 %v2001_v12  ;;  %v1877_v38 = vmax.f32 %v1861_v29, 0.0  ;;  %v5567_v14 = vmul.f32 0.03125, %v1914_v31  ;;  %v1946_v60 = vmul.f32 %v5573_v36, %v5573_v36 }
 0x35a   : > { %v1841_v5 = vld [vmem:[#allocation2 + $0x78] sm:$0xff]  ;;  %v1966_v39 = vadd.f32 %v1965_v32, %v1964_v19  ;;  %v1919_v15 = vadd.f32 %v1918_v6, %v1917_v23  ;;  %v1970_v16 = vrot.slane %v1969_v37, 4  ;;  %v1947_v2 = vmul.f32 %v5578_v27, %v5578_v27 }
 0x35b   : > { %v1864_v13 = vadd.f32 %v5457_v50, %v1841_v5  ;;  %v5570_v34 = vadd.f32 %v4964_v40, %v1877_v38  ;;  %v1994_v47 = vmul.f32 %v5567_v14, %v5567_v14  ;;  %v2009_v9 = vsub.f32 %v5468_v10, %v5543_v46 }
 0x35c   : > { %v1990_v45 = vmul.f32 0.03125, %v1966_v39  ;;  %v1920_v50 = vrot.slane %v1919_v15, 2  ;;  %v1971_v54 = vadd.f32 %v1970_v16, %v1969_v37  ;;  %v2010_v19 = vsub.f32 %v5476_v20, %v5543_v46 }
 0x35d   : > { %v1880_v53 = vmax.f32 %v1864_v13, 0.0  ;;  %v1924_v58 = vadd.f32 %v5573_v36, %v5570_v34  ;;  %v1945_v59 = vmul.f32 %v5570_v34, %v5570_v34  ;;  %v2011_v23 = vsub.f32 %v5472_v18, %v5543_v46 }
 0x35e   : > { %v1998_v56 = vsub.f32 %v1990_v45, %v1994_v47  ;;  %v1921_v7 = vadd.f32 %v1920_v50, %v1919_v15  ;;  %v1972_v62 = vrot.slane %v1971_v54, 2  ;;  %v2012_v26 = vsub.f32 %v5479_v25, %v5543_v46  ;;  %v5610_v15 = vld [vmem:[%s6148_s2] ss:$0 sm:$0xff] }
 0x35f   : > { %v5581_v52 = vadd.f32 %v4967_v33, %v1880_v53  ;;  %v1925_v63 = vadd.f32 %v1924_v58, %v5578_v27  ;;  %v1976_v28 = vadd.f32 %v1946_v60, %v1945_v59  ;;  %v5619_v47 = vld [vmem:[%s6149_s3] ss:$0 sm:$0xff] }
 0x360   : > { %v2002_v61 = vadd.f32 1e-05, %v1998_v56  ;;  %v1922_v1 = vrot.slane %v1921_v7, 1  ;;  %v1973_v3 = vadd.f32 %v1972_v62, %v1971_v54 }
 0x361   : > { %v1926_v8 = vadd.f32 %v1925_v63, %v5581_v52  ;;  %v1948_v12 = vmul.f32 %v5581_v52, %v5581_v52  ;;  %v1977_v17 = vadd.f32 %v1976_v28, %v1947_v2  ;;  %v2014_v2 = vsub.f32 %v5505_v21, %v5567_v14 }
 0x362   : > { %4906 = vrsqrt.f32 %v2002_v61  ;;  %v1923_v11 = vadd.f32 %v1922_v1, %v1921_v7  ;;  %v1974_v29 = vrot.slane %v1973_v3, 1  ;;  %v2013_v1 = vsub.f32 %v5501_v44, %v5567_v14 }
 0x363   : > { %v1927_v32 = vrot.slane %v1926_v8, 4  ;;  %v1978_v39 = vadd.f32 %v1977_v17, %v1948_v12  ;;  %v2015_v28 = vsub.f32 %v5508_v22, %v5567_v14 }
 0x364   : > { %v5603_v31 = vmul.f32 0.03125, %v1923_v11  ;;  %v1975_v38 = vadd.f32 %v1974_v29, %v1973_v3  ;;  %v2016_v3 = vsub.f32 %v5511_v55, %v5567_v14 }
 0x365   : > { %v1928_v45 = vadd.f32 %v1927_v32, %v1926_v8  ;;  %v1979_v7 = vrot.slane %v1978_v39, 4 }
 0x366   : > { %v4905_v30 = vpop.eup %4904  ;;  %v1995_v13 = vmul.f32 %v5603_v31, %v5603_v31  ;;  %v1991_v53 = vmul.f32 0.03125, %v1975_v38 }
 0x367   : > { %v2025_v4 = vmul.f32 %v4905_v30, %v2009_v9  ;;  %v2026_v5 = vmul.f32 %v4905_v30, %v2010_v19  ;;  %v2027_v6 = vmul.f32 %v4905_v30, %v2011_v23  ;;  %v2028_v37 = vmul.f32 %v4905_v30, %v2012_v26 }
 0x368   : > { %v1999_v54 = vsub.f32 %v1991_v53, %v1995_v13  ;;  %v1929_v58 = vrot.slane %v1928_v45, 2  ;;  %v1980_v63 = vadd.f32 %v1979_v7, %v1978_v39 }
 0x369   : > { %v2041_v46 = vmul.f32 %v5610_v15, %v2025_v4  ;;  %v2042_v16 = vmul.f32 %v5610_v15, %v2026_v5  ;;  %v2043_v40 = vmul.f32 %v5610_v15, %v2027_v6  ;;  %v2044_v42 = vmul.f32 %v5610_v15, %v2028_v37 }
 0x36a   : > { %v2003_v61 = vadd.f32 1e-05, %v1999_v54  ;;  %v1930_v62 = vadd.f32 %v1929_v58, %v1928_v45  ;;  %v1981_v11 = vrot.slane %v1980_v63, 2 }
 0x36b   : > { %v2057_v48 = vadd.f32 %v5619_v47, %v2041_v46  ;;  %v2058_v50 = vadd.f32 %v5619_v47, %v2042_v16  ;;  %v2059_v33 = vadd.f32 %v5619_v47, %v2043_v40  ;;  %v2060_v56 = vadd.f32 %v5619_v47, %v2044_v42 }
 0x36c   : > { %4908 = vrsqrt.f32 %v2003_v61  ;;  %v1931_v9 = vrot.slane %v1930_v62, 1  ;;  %v1982_v29 = vadd.f32 %v1981_v11, %v1980_v63 }
 0x36d   : > { %v2073_v59 = vpack.c.bf16 %v2058_v50, %v2057_v48  ;;  %v2074_v60 = vpack.c.bf16 %v2060_v56, %v2059_v33  ;;  %v2017_v48 = vsub.f32 %v5538_v35, %v5603_v31  ;;  %v2018_v50 = vsub.f32 %v5541_v43, %v5603_v31 }
 0x36e   : > { %v1932_v26 = vadd.f32 %v1931_v9, %v1930_v62  ;;  %v1983_v14 = vrot.slane %v1982_v29, 1  ;;  %v2019_v33 = vsub.f32 %v5535_v41, %v5603_v31  ;;  %v2020_v56 = vsub.f32 %v5550_v57, %v5603_v31 }
 0x36f   : > { %4595 = vmatprep.mubr.bf16.mxu1 %v2073_v59  ;;  %v4907_v8 = vpop.eup %4906 }
 0x370   : > { %4596 = vmatmul.mubr.bf16.vlgmr.msra.gmra.mxu1 %v2074_v60  ;;  %v2029_v12 = vmul.f32 %v4907_v8, %v2013_v1  ;;  %v2030_v17 = vmul.f32 %v4907_v8, %v2014_v2  ;;  %v2031_v19 = vmul.f32 %v4907_v8, %v2015_v28  ;;  %v2032_v23 = vmul.f32 %v4907_v8, %v2016_v3 }
 0x371   : > { %v1988_v6 = vmul.f32 0.03125, %v1932_v26  ;;  %v1984_v46 = vadd.f32 %v1983_v14, %v1982_v29 }
 0x372   : > { %v2045_v30 = vmul.f32 %v5610_v15, %v2029_v12  ;;  %v2046_v32 = vmul.f32 %v5610_v15, %v2030_v17  ;;  %v2047_v4 = vmul.f32 %v5610_v15, %v2031_v19  ;;  %v2048_v5 = vmul.f32 %v5610_v15, %v2032_v23 }
 0x373   : > { %v1996_v16 = vmul.f32 %v1988_v6, %v1988_v6  ;;  %v1992_v53 = vmul.f32 0.03125, %v1984_v46  ;;  %v2021_v12 = vsub.f32 %v5570_v34, %v1988_v6  ;;  %v2022_v17 = vsub.f32 %v5573_v36, %v1988_v6 }
 0x374   : > { %v2061_v37 = vadd.f32 %v5619_v47, %v2045_v30  ;;  %v2062_v38 = vadd.f32 %v5619_v47, %v2046_v32  ;;  %v2063_v13 = vadd.f32 %v5619_v47, %v2047_v4  ;;  %v2064_v39 = vadd.f32 %v5619_v47, %v2048_v5 }
 0x375   : > { %v2000_v45 = vsub.f32 %v1992_v53, %v1996_v16  ;;  %v2023_v19 = vsub.f32 %v5578_v27, %v1988_v6  ;;  %v2024_v23 = vsub.f32 %v5581_v52, %v1988_v6 }
 0x376   : > { %v2075_v40 = vpack.c.bf16 %v2062_v38, %v2061_v37  ;;  %v2076_v42 = vpack.c.bf16 %v2064_v39, %v2063_v13 }
 0x377   : > { %v2004_v54 = vadd.f32 1e-05, %v2000_v45 }
 0x378   : > { %4599 = vmatprep.mubr.bf16.mxu1 %v2075_v40 }
 0x379   : > { %4600 = vmatmul.mubr.bf16.gmra.mxu1 %v2076_v42  ;;  %v4909_v58 = vpop.eup %4908  ;;  %4910 = vrsqrt.f32 %v2004_v54 }
 0x37a   : > { %v2033_v7 = vmul.f32 %v4909_v58, %v2017_v48  ;;  %v2034_v59 = vmul.f32 %v4909_v58, %v2018_v50  ;;  %v2035_v60 = vmul.f32 %v4909_v58, %v2019_v33  ;;  %v2036_v61 = vmul.f32 %v4909_v58, %v2020_v56 }
 0x37c   : > { %v2049_v62 = vmul.f32 %v5610_v15, %v2033_v7  ;;  %v2050_v63 = vmul.f32 %v5610_v15, %v2034_v59  ;;  %v2051_v1 = vmul.f32 %v5610_v15, %v2035_v60  ;;  %v2052_v2 = vmul.f32 %v5610_v15, %v2036_v61  ;;  %v4856_v61 = vld [vmem:[%s5140_s24] sm:$0xff]  }
 0x37d   : > { %4627 = vmatprep.mubr.bf16.mxu0 %v4856_v61 }
 0x37e   : > { %v2065_v28 = vadd.f32 %v5619_v47, %v2049_v62  ;;  %v2066_v3 = vadd.f32 %v5619_v47, %v2050_v63  ;;  %v2067_v31 = vadd.f32 %v5619_v47, %v2051_v1  ;;  %v2068_v8 = vadd.f32 %v5619_v47, %v2052_v2 }
 0x380   : > { %v2077_v9 = vpack.c.bf16 %v2066_v3, %v2065_v28  ;;  %v2078_v11 = vpack.c.bf16 %v2068_v8, %v2067_v31 }
 0x382   : > { %4603 = vmatprep.mubr.bf16.mxu1 %v2077_v9 }
 0x383   : > { %4604 = vmatmul.mubr.bf16.gmra.mxu1 %v2078_v11 }
 0x386   : > { %v4911_v26 = vpop.eup %4910 }
 0x387   : > { %v2037_v29 = vmul.f32 %v4911_v26, %v2021_v12  ;;  %v2038_v30 = vmul.f32 %v4911_v26, %v2022_v17  ;;  %v2039_v32 = vmul.f32 %v4911_v26, %v2023_v19  ;;  %v2040_v4 = vmul.f32 %v4911_v26, %v2024_v23  ;;  %v4862_v12 = vld [vmem:[%s5140_s24 + $0x40] sm:$0xff]   ;;  %v4857_v17 = vld [vmem:[%s5140_s24 + $0x8] sm:$0xff]   ;;  %v4858_v19 = vld [vmem:[%s5140_s24 + $0x10] sm:$0xff]  }
 0x388   : > { %v4859_v23 = vld [vmem:[%s5140_s24 + $0x18] sm:$0xff]   ;;  %v4860_v26 = vld [vmem:[%s5140_s24 + $0x20] sm:$0xff]  }
 0x389   : > { %v2053_v5 = vmul.f32 %v5610_v15, %v2037_v29  ;;  %v2054_v14 = vmul.f32 %v5610_v15, %v2038_v30  ;;  %v2055_v37 = vmul.f32 %v5610_v15, %v2039_v32  ;;  %v2056_v38 = vmul.f32 %v5610_v15, %v2040_v4  ;;  %v4861_v29 = vld [vmem:[%s5140_s24 + $0x28] sm:$0xff]   ;;  %v4864_v30 = vld [vmem:[%s5140_s24 + $0x30] sm:$0xff]   ;;  %v4865_v32 = vld [vmem:[%s5140_s24 + $0x38] sm:$0xff]  }
 0x38a   : > { %v4866_v4 = vld [vmem:[%s5140_s24 + $0x80] sm:$0xff]  }
 0x38b   : > { %v2069_v13 = vadd.f32 %v5619_v47, %v2053_v5  ;;  %v2070_v39 = vadd.f32 %v5619_v47, %v2054_v14  ;;  %v2071_v46 = vadd.f32 %v5619_v47, %v2055_v37  ;;  %v2072_v6 = vadd.f32 %v5619_v47, %v2056_v38 }
 0x38d   : > { %v2079_v16 = vpack.c.bf16 %v2070_v39, %v2069_v13  ;;  %v2080_v40 = vpack.c.bf16 %v2072_v6, %v2071_v46 }
 0x38f   : > { %4607 = vmatprep.mubr.bf16.mxu1 %v2079_v16 }
 0x390   : > { %4608 = vmatmul.mubr.bf16.gmra.mxu1 %v2080_v40 }
 0x391   : > { %4659 = vmatprep.mubr.bf16.mxu1 %v4862_v12 }
 0x430   : > { %v4597_v42 = vpop.f32.mrf.mxu1 }
 0x432   : > { %v2179_v53 = vpop.f32.mrf.mxu1 }
 0x434   : > { %v4598_v45 = vpop.f32.mrf.mxu1 }
 0x435   : > { %v2243_v9 = vpack.c.bf16 %v4598_v45, %v4597_v42 }
 0x436   : > { %v2182_v48 = vpop.f32.mrf.mxu1 }
 0x437   : > { %v2242_v11 = vpack.c.bf16 %v2182_v48, %v2179_v53 }
 0x439   : > { %v4601_v50 = vpop.f32.mrf.mxu1 }
 0x43b   : > { %v2195_v33 = vpop.f32.mrf.mxu1 }
 0x43d   : > { %v4602_v15 = vpop.f32.mrf.mxu1 }
 0x43e   : > { %v2245_v31 = vpack.c.bf16 %v4602_v15, %v4601_v50  ;;  %v4868_v15 = vld [vmem:[%s5140_s24 + $0x50] sm:$0xff]  }
 0x43f   : > { %v2198_v56 = vpop.f32.mrf.mxu1 }
 0x440   : > { %v2244_v8 = vpack.c.bf16 %v2198_v56, %v2195_v33  ;;  %v4863_v33 = vld [vmem:[%s5140_s24 + $0x48] sm:$0xff]  }
 0x443   : > { %v4605_v54 = vpop.f32.mrf.mxu1 }
 0x445   : > { %v2211_v58 = vpop.f32.mrf.mxu1 }
 0x447   : > { %v4606_v7 = vpop.f32.mrf.mxu1 }
 0x448   : > { %v2247_v28 = vpack.c.bf16 %v4606_v7, %v4605_v54  ;;  %v4869_v7 = vld [vmem:[%s5140_s24 + $0x58] sm:$0xff]  }
 0x449   : > { %v2214_v59 = vpop.f32.mrf.mxu1 }
 0x44a   : > { %v2246_v3 = vpack.c.bf16 %v2214_v59, %v2211_v58  ;;  %v4872_v59 = vld [vmem:[%s5140_s24 + $0x60] sm:$0xff]  }
 0x450   : > { %v4609_v60 = vpop.f32.mrf.mxu1 }
 0x452   : > { %v2227_v47 = vpop.f32.mrf.mxu1 }
 0x454   : > { %v4610_v62 = vpop.f32.mrf.mxu1 }
 0x455   : > { %v2249_v63 = vpack.c.bf16 %v4610_v62, %v4609_v60  ;;  %v4867_v62 = vld [vmem:[%s5140_s24 + $0x88] sm:$0xff]  }
 0x456   : > { %v2230_v1 = vpop.f32.mrf.mxu1 }
 0x457   : > { %v2248_v2 = vpack.c.bf16 %v2230_v1, %v2227_v47  ;;  %2513 = vrot.lane.b32.xlu0 %v2249_v63, %s4978_s18  ;;  %4611 = vmatprep.subr.bf16.mxu0 %v2249_v63 }
 0x458   : > { %4612 = vmatpush3.bf16.msra.mxu0 %v2249_v63 }
 0x459   : > { %2511 = vrot.lane.b32.xlu1 %v2248_v2, %s4978_s18  ;;  %4613 = vmatprep.subr.bf16.mxu0 %v2248_v2 }
 0x45b   : > { %2509 = vrot.lane.b32.xlu0 %v2247_v28, %s4978_s18 }
 0x45c   : > { %4614 = vmatpush3.bf16.msra.mxu0 %v2248_v2 }
 0x45d   : > { %2507 = vrot.lane.b32.xlu1 %v2246_v3, %s4978_s18  ;;  %4615 = vmatprep.subr.bf16.mxu0 %v2247_v28 }
 0x45f   : > { %2505 = vrot.lane.b32.xlu0 %v2245_v31, %s4978_s18 }
 0x460   : > { %4616 = vmatpush3.bf16.msra.mxu0 %v2247_v28 }
 0x461   : > { %2503 = vrot.lane.b32.xlu1 %v2244_v8, %s4978_s18  ;;  %4617 = vmatprep.subr.bf16.mxu0 %v2246_v3 }
 0x463   : > { %2501 = vrot.lane.b32.xlu0 %v2243_v9, %s4978_s18 }
 0x464   : > { %4618 = vmatpush3.bf16.msra.mxu0 %v2246_v3 }
 0x465   : > { %2499 = vrot.lane.b32.xlu1 %v2242_v11, %s4978_s18  ;;  %4619 = vmatprep.subr.bf16.mxu0 %v2245_v31 }
 0x467   : > { %2778 = vrot.lane.b32.xlu0 %v2249_v63, %s4980_s20 }
 0x468   : > { %4620 = vmatpush3.bf16.msra.mxu0 %v2245_v31 }
 0x469   : > { %3043 = vrot.lane.b32.xlu1 %v2249_v63, %s4979_s19  ;;  %4621 = vmatprep.subr.bf16.mxu0 %v2244_v8  ;;  %v4873_v63 = vld [vmem:[%s5140_s24 + $0x68] sm:$0xff]  }
 0x46b   : > { %2776 = vrot.lane.b32.xlu0 %v2248_v2, %s4980_s20 }
 0x46c   : > { %4622 = vmatpush3.bf16.msra.mxu0 %v2244_v8 }
 0x46d   : > { %3041 = vrot.lane.b32.xlu1 %v2248_v2, %s4979_s19  ;;  %4623 = vmatprep.subr.bf16.mxu0 %v2243_v9  ;;  %v4870_v2 = vld [vmem:[%s5140_s24 + $0x90] sm:$0xff]  }
 0x46f   : > { %2774 = vrot.lane.b32.xlu0 %v2247_v28, %s4980_s20 }
 0x470   : > { %4624 = vmatpush3.bf16.msra.mxu0 %v2243_v9 }
 0x471   : > { %3039 = vrot.lane.b32.xlu1 %v2247_v28, %s4979_s19  ;;  %4625 = vmatprep.subr.bf16.mxu0 %v2242_v11  ;;  %v4876_v28 = vld [vmem:[%s5140_s24 + $0x70] sm:$0xff]  }
 0x473   : > { %2772 = vrot.lane.b32.xlu0 %v2246_v3, %s4980_s20 }
 0x474   : > { %4626 = vmatpush3.bf16.msra.mxu0 %v2242_v11 }
 0x475   : > { %3037 = vrot.lane.b32.xlu1 %v2246_v3, %s4979_s19 }
 0x477   : > { %2770 = vrot.lane.b32.xlu0 %v2245_v31, %s4980_s20  ;;  %4628 = vmatmul.mubr.bf16.vlgmr.msra.gmra.mxu0 %v4857_v17  ;;  %v4875_v17 = vld [vmem:[%s5140_s24 + $0xa8] sm:$0xff]  }
 0x478   : > { %4631 = vmatprep.mubr.bf16.mxu0 %v4858_v19  ;;  %v4881_v19 = vld [vmem:[%s5140_s24 + $0xc8] sm:$0xff]  }
 0x479   : > { %3035 = vrot.lane.b32.xlu1 %v2245_v31, %s4979_s19  ;;  %v4871_v31 = vld [vmem:[%s5140_s24 + $0x98] sm:$0xff]  }
 0x47b   : > { %2768 = vrot.lane.b32.xlu0 %v2244_v8, %s4980_s20 }
 0x47d   : > { %3033 = vrot.lane.b32.xlu1 %v2244_v8, %s4979_s19  ;;  %v4877_v8 = vld [vmem:[%s5140_s24 + $0x78] sm:$0xff]  }
 0x47f   : > { %2766 = vrot.lane.b32.xlu0 %v2243_v9, %s4980_s20  ;;  %4632 = vmatmul.mubr.bf16.gmra.mxu0 %v4859_v23  ;;  %v4878_v23 = vld [vmem:[%s5140_s24 + $0xb0] sm:$0xff]  }
 0x480   : > { %4635 = vmatprep.mubr.bf16.mxu0 %v4860_v26  ;;  %v4882_v26 = vld [vmem:[%s5140_s24 + $0xd0] sm:$0xff]  }
 0x481   : > { %3031 = vrot.lane.b32.xlu1 %v2243_v9, %s4979_s19  ;;  %v4874_v9 = vld [vmem:[%s5140_s24 + $0xa0] sm:$0xff]  }
 0x483   : > { %2764 = vrot.lane.b32.xlu0 %v2242_v11, %s4980_s20 }
 0x485   : > { %3029 = vrot.lane.b32.xlu1 %v2242_v11, %s4979_s19  ;;  %v4880_v11 = vld [vmem:[%s5140_s24 + $0xc0] sm:$0xff]  }
 0x487   : > { %4636 = vmatmul.mubr.bf16.gmra.mxu0 %v4861_v29  ;;  %v4879_v29 = vld [vmem:[%s5140_s24 + $0xb8] sm:$0xff]  }
 0x488   : > { %4639 = vmatprep.mubr.bf16.mxu0 %v4864_v30  ;;  %v4883_v30 = vld [vmem:[%s5140_s24 + $0xd8] sm:$0xff]  }
 0x48f   : > { %4640 = vmatmul.mubr.bf16.gmra.mxu0 %v4865_v32  ;;  %v4884_v32 = vld [vmem:[%s5140_s24 + $0xe0] sm:$0xff]  }
 0x490   : > { %4691 = vmatprep.mubr.bf16.mxu0 %v4866_v4  ;;  %v4885_v4 = vld [vmem:[%s5140_s24 + $0xe8] sm:$0xff]  }
 0x4c9   : > { %v2514_v5 = vpop.permute.xlu0 %2513 }
 0x4ca   : > { %4643 = vmatprep.subr.bf16.mxu1 %v2514_v5 }
 0x4cb   : > { %4644 = vmatpush3.bf16.msra.mxu1 %v2514_v5  ;;  %v2512_v14 = vpop.permute.xlu1 %2511  ;;  %v4886_v5 = vld [vmem:[%s5140_s24 + $0xf0] sm:$0xff]  }
 0x4cc   : > { %4645 = vmatprep.subr.bf16.mxu1 %v2512_v14 }
 0x4cd   : > { %v2510_v37 = vpop.permute.xlu0 %2509 }
 0x4cf   : > { %4646 = vmatpush3.bf16.msra.mxu1 %v2512_v14  ;;  %v2508_v38 = vpop.permute.xlu1 %2507  ;;  %v4887_v14 = vld [vmem:[%s5140_s24 + $0xf8] sm:$0xff]  }
 0x4d0   : > { %4647 = vmatprep.subr.bf16.mxu1 %v2510_v37 }
 0x4d1   : > { %v2506_v13 = vpop.permute.xlu0 %2505 }
 0x4d3   : > { %4648 = vmatpush3.bf16.msra.mxu1 %v2510_v37  ;;  %v2504_v39 = vpop.permute.xlu1 %2503 }
 0x4d4   : > { %4649 = vmatprep.subr.bf16.mxu1 %v2508_v38 }
 0x4d5   : > { %v2502_v46 = vpop.permute.xlu0 %2501 }
 0x4d7   : > { %4650 = vmatpush3.bf16.msra.mxu1 %v2508_v38  ;;  %v2500_v6 = vpop.permute.xlu1 %2499 }
 0x4d8   : > { %4651 = vmatprep.subr.bf16.mxu1 %v2506_v13 }
 0x4d9   : > { %v2779_v16 = vpop.permute.xlu0 %2778 }
 0x4da   : > { %4675 = vmatprep.subr.bf16.mxu0 %v2779_v16 }
 0x4db   : > { %4652 = vmatpush3.bf16.msra.mxu1 %v2506_v13  ;;  %v3044_v40 = vpop.permute.xlu1 %3043  ;;  %4676 = vmatpush3.bf16.msra.mxu0 %v2779_v16 }
 0x4dc   : > { %4653 = vmatprep.subr.bf16.mxu1 %v2504_v39 }
 0x4dd   : > { %v2777_v42 = vpop.permute.xlu0 %2776 }
 0x4de   : > { %4677 = vmatprep.subr.bf16.mxu0 %v2777_v42 }
 0x4df   : > { %4654 = vmatpush3.bf16.msra.mxu1 %v2504_v39  ;;  %v3042_v53 = vpop.permute.xlu1 %3041  ;;  %4678 = vmatpush3.bf16.msra.mxu0 %v2777_v42 }
 0x4e0   : > { %4655 = vmatprep.subr.bf16.mxu1 %v2502_v46 }
 0x4e1   : > { %v2775_v45 = vpop.permute.xlu0 %2774 }
 0x4e2   : > { %4679 = vmatprep.subr.bf16.mxu0 %v2775_v45 }
 0x4e3   : > { %4656 = vmatpush3.bf16.msra.mxu1 %v2502_v46  ;;  %4680 = vmatpush3.bf16.msra.mxu0 %v2775_v45  ;;  %v3040_v48 = vpop.permute.xlu1 %3039 }
 0x4e4   : > { %4657 = vmatprep.subr.bf16.mxu1 %v2500_v6 }
 0x4e5   : > { %v2773_v50 = vpop.permute.xlu0 %2772 }
 0x4e6   : > { %4681 = vmatprep.subr.bf16.mxu0 %v2773_v50 }
 0x4e7   : > { %4658 = vmatpush3.bf16.msra.mxu1 %v2500_v6  ;;  %4682 = vmatpush3.bf16.msra.mxu0 %v2773_v50  ;;  %v3038_v54 = vpop.permute.xlu1 %3037 }
 0x4e8   : > { %4707 = vmatprep.subr.bf16.mxu1 %v3044_v40 }
 0x4e9   : > { %v2771_v56 = vpop.permute.xlu0 %2770 }
 0x4ea   : > { %4683 = vmatprep.subr.bf16.mxu0 %v2771_v56  ;;  %4660 = vmatmul.mubr.bf16.vlgmr.msra.gmra.mxu1 %v4863_v33 }
 0x4eb   : > { %4708 = vmatpush3.bf16.msra.mxu1 %v3044_v40  ;;  %4684 = vmatpush3.bf16.msra.mxu0 %v2771_v56  ;;  %v3036_v60 = vpop.permute.xlu1 %3035 }
 0x4ec   : > { %4709 = vmatprep.subr.bf16.mxu1 %v3042_v53  ;;  %4663 = vmatprep.mubr.bf16.mxu1 %v4868_v15 }
 0x4ed   : > { %v2769_v58 = vpop.permute.xlu0 %2768 }
 0x4ee   : > { %4685 = vmatprep.subr.bf16.mxu0 %v2769_v58 }
 0x4ef   : > { %4710 = vmatpush3.bf16.msra.mxu1 %v3042_v53  ;;  %4686 = vmatpush3.bf16.msra.mxu0 %v2769_v58  ;;  %v3034_v1 = vpop.permute.xlu1 %3033 }
 0x4f0   : > { %4711 = vmatprep.subr.bf16.mxu1 %v3040_v48 }
 0x4f1   : > { %v2767_v61 = vpop.permute.xlu0 %2766 }
 0x4f2   : > { %4687 = vmatprep.subr.bf16.mxu0 %v2767_v61  ;;  %4664 = vmatmul.mubr.bf16.gmra.mxu1 %v4869_v7 }
 0x4f3   : > { %4712 = vmatpush3.bf16.msra.mxu1 %v3040_v48  ;;  %4688 = vmatpush3.bf16.msra.mxu0 %v2767_v61  ;;  %v3032_v3 = vpop.permute.xlu1 %3031 }
 0x4f4   : > { %4713 = vmatprep.subr.bf16.mxu1 %v3038_v54  ;;  %4667 = vmatprep.mubr.bf16.mxu1 %v4872_v59 }
 0x4f5   : > { %v2765_v47 = vpop.permute.xlu0 %2764 }
 0x4f6   : > { %4689 = vmatprep.subr.bf16.mxu0 %v2765_v47 }
 0x4f7   : > { %4714 = vmatpush3.bf16.msra.mxu1 %v3038_v54  ;;  %4690 = vmatpush3.bf16.msra.mxu0 %v2765_v47  ;;  %v3030_v12 = vpop.permute.xlu1 %3029 }
 0x4f8   : > { %4715 = vmatprep.subr.bf16.mxu1 %v3036_v60 }
 0x4fa   : > { %4692 = vmatmul.mubr.bf16.vlgmr.msra.gmra.mxu0 %v4867_v62  ;;  %4668 = vmatmul.mubr.bf16.gmra.mxu1 %v4873_v63 }
 0x4fb   : > { %4716 = vmatpush3.bf16.msra.mxu1 %v3036_v60  ;;  %4695 = vmatprep.mubr.bf16.mxu0 %v4870_v2 }
 0x4fc   : > { %4717 = vmatprep.subr.bf16.mxu1 %v3034_v1  ;;  %4671 = vmatprep.mubr.bf16.mxu1 %v4876_v28 }
 0x4ff   : > { %4718 = vmatpush3.bf16.msra.mxu1 %v3034_v1 }
 0x500   : > { %4719 = vmatprep.subr.bf16.mxu1 %v3032_v3 }
 0x502   : > { %4696 = vmatmul.mubr.bf16.gmra.mxu0 %v4871_v31  ;;  %4672 = vmatmul.mubr.bf16.gmra.mxu1 %v4877_v8 }
 0x503   : > { %4720 = vmatpush3.bf16.msra.mxu1 %v3032_v3  ;;  %4699 = vmatprep.mubr.bf16.mxu0 %v4874_v9 }
 0x504   : > { %4721 = vmatprep.subr.bf16.mxu1 %v3030_v12  ;;  %4723 = vmatprep.mubr.bf16.mxu1 %v4880_v11 }
 0x507   : > { %4722 = vmatpush3.bf16.msra.mxu1 %v3030_v12 }
 0x50a   : > { %4700 = vmatmul.mubr.bf16.gmra.mxu0 %v4875_v17  ;;  %4724 = vmatmul.mubr.bf16.vlgmr.msra.gmra.mxu1 %v4881_v19 }
 0x50b   : > { %4703 = vmatprep.mubr.bf16.mxu0 %v4878_v23  ;;  %4727 = vmatprep.mubr.bf16.mxu1 %v4882_v26 }
 0x512   : > { %4704 = vmatmul.mubr.bf16.gmra.mxu0 %v4879_v29  ;;  %4728 = vmatmul.mubr.bf16.gmra.mxu1 %v4883_v30 }
 0x513   : > { %4731 = vmatprep.mubr.bf16.mxu1 %v4884_v32 }
 0x51a   : > { %4732 = vmatmul.mubr.bf16.gmra.mxu1 %v4885_v4 }
 0x51b   : > { %4735 = vmatprep.mubr.bf16.mxu1 %v4886_v5 }
 0x522   : > { %4736 = vmatmul.mubr.bf16.gmra.mxu1 %v4887_v14 }
 0x537   : > { %v4629_v37 = vpop.f32.mrf.mxu0 }
 0x538   : > { %2413 = vst.msk [vmem:[#allocation2 + $0x10] sm:$0xff] %vm1000_vm0, %v4629_v37  ;;  %v4888_v37 = vld [vmem:[%s6154_s8 + $0x38] sm:$0xff]  }
 0x539   : > { %v2348_v38 = vpop.f32.mrf.mxu0  ;;  %4739 = vmatprep.subr.bf16.mxu0 %v4888_v37 }
 0x53a   : > { %2411 = vst.msk [vmem:[#allocation2] sm:$0xff] %vm1000_vm0, %v2348_v38  ;;  %4740 = vmatpush3.bf16.msra.mxu0 %v4888_v37 }
 0x53b   : > { %v4630_v13 = vpop.f32.mrf.mxu0 }
 0x53c   : > { %2414 = vst.msk [vmem:[#allocation2 + $0x18] sm:$0xff] %vm1000_vm0, %v4630_v13 }
 0x53d   : > { %v2351_v39 = vpop.f32.mrf.mxu0 }
 0x53e   : > { %2412 = vst.msk [vmem:[#allocation2 + $0x8] sm:$0xff] %vm1000_vm0, %v2351_v39  ;;  %v4889_v39 = vld [vmem:[%s6154_s8 + $0x30] sm:$0xff]  }
 0x53f   : > { %v4633_v46 = vpop.f32.mrf.mxu0  ;;  %4741 = vmatprep.subr.bf16.mxu0 %v4889_v39 }
 0x540   : > { %2417 = vst.msk [vmem:[#allocation2 + $0x30] sm:$0xff] %vm1000_vm0, %v4633_v46  ;;  %4742 = vmatpush3.bf16.msra.mxu0 %v4889_v39 }
 0x541   : > { %v2364_v6 = vpop.f32.mrf.mxu0 }
 0x542   : > { %2415 = vst.msk [vmem:[#allocation2 + $0x20] sm:$0xff] %vm1000_vm0, %v2364_v6 }
 0x543   : > { %v4634_v16 = vpop.f32.mrf.mxu0 }
 0x544   : > { %2418 = vst.msk [vmem:[#allocation2 + $0x38] sm:$0xff] %vm1000_vm0, %v4634_v16  ;;  %v4890_v16 = vld [vmem:[%s6154_s8 + $0x28] sm:$0xff]  }
 0x545   : > { %v2367_v40 = vpop.f32.mrf.mxu0  ;;  %4743 = vmatprep.subr.bf16.mxu0 %v4890_v16 }
 0x546   : > { %2416 = vst.msk [vmem:[#allocation2 + $0x28] sm:$0xff] %vm1000_vm0, %v2367_v40  ;;  %4744 = vmatpush3.bf16.msra.mxu0 %v4890_v16 }
 0x547   : > { %v4637_v42 = vpop.f32.mrf.mxu0 }
 0x548   : > { %2421 = vst.msk [vmem:[#allocation2 + $0x50] sm:$0xff] %vm1000_vm0, %v4637_v42 }
 0x549   : > { %v2380_v53 = vpop.f32.mrf.mxu0 }
 0x54a   : > { %2419 = vst.msk [vmem:[#allocation2 + $0x40] sm:$0xff] %vm1000_vm0, %v2380_v53  ;;  %v4891_v53 = vld [vmem:[%s6154_s8 + $0x20] sm:$0xff]  }
 0x54b   : > { %v4638_v45 = vpop.f32.mrf.mxu0  ;;  %4745 = vmatprep.subr.bf16.mxu0 %v4891_v53 }
 0x54c   : > { %2422 = vst.msk [vmem:[#allocation2 + $0x58] sm:$0xff] %vm1000_vm0, %v4638_v45  ;;  %4746 = vmatpush3.bf16.msra.mxu0 %v4891_v53 }
 0x54d   : > { %v2383_v48 = vpop.f32.mrf.mxu0 }
 0x54e   : > { %2420 = vst.msk [vmem:[#allocation2 + $0x48] sm:$0xff] %vm1000_vm0, %v2383_v48 }
 0x54f   : > { %v4641_v50 = vpop.f32.mrf.mxu0 }
 0x550   : > { %2425 = vst.msk [vmem:[#allocation2 + $0x70] sm:$0xff] %vm1000_vm0, %v4641_v50  ;;  %v4892_v50 = vld [vmem:[%s6154_s8 + $0x18] sm:$0xff]  }
 0x551   : > { %v2396_v33 = vpop.f32.mrf.mxu0  ;;  %4747 = vmatprep.subr.bf16.mxu0 %v4892_v50 }
 0x552   : > { %2423 = vst.msk [vmem:[#allocation2 + $0x60] sm:$0xff] %vm1000_vm0, %v2396_v33  ;;  %4748 = vmatpush3.bf16.msra.mxu0 %v4892_v50 }
 0x553   : > { %v4642_v15 = vpop.f32.mrf.mxu0 }
 0x554   : > { %2426 = vst.msk [vmem:[#allocation2 + $0x78] sm:$0xff] %vm1000_vm0, %v4642_v15 }
 0x555   : > { %v2399_v56 = vpop.f32.mrf.mxu0 }
 0x556   : > { %2424 = vst.msk [vmem:[#allocation2 + $0x68] sm:$0xff] %vm1000_vm0, %v2399_v56  ;;  %v4893_v56 = vld [vmem:[%s6154_s8 + $0x10] sm:$0xff]  }
 0x557   : > { %4749 = vmatprep.subr.bf16.mxu0 %v4893_v56 }
 0x558   : > { %4750 = vmatpush3.bf16.msra.mxu0 %v4893_v56 }
 0x5aa   : > { %v4661_v54 = vpop.f32.mrf.mxu1 }
 0x5ab   : > { %2640 = vrot.lane.b32.xlu0 %v4661_v54, %s4979_s19 }
 0x5ac   : > { %v2557_v58 = vpop.f32.mrf.mxu1 }
 0x5ae   : > { %v4662_v7 = vpop.f32.mrf.mxu1 }
 0x5af   : > { %2642 = vrot.lane.b32.xlu1 %v4662_v7, %s4979_s19  ;;  %v4894_v7 = vld [vmem:[%s6154_s8 + $0x8] sm:$0xff]  }
 0x5b0   : > { %v2560_v59 = vpop.f32.mrf.mxu1  ;;  %4751 = vmatprep.subr.bf16.mxu0 %v4894_v7 }
 0x5b1   : > { %4752 = vmatpush3.bf16.msra.mxu0 %v4894_v7 }
 0x5b2   : > { %v4665_v60 = vpop.f32.mrf.mxu1 }
 0x5b4   : > { %v2573_v61 = vpop.f32.mrf.mxu1 }
 0x5b6   : > { %v4666_v47 = vpop.f32.mrf.mxu1 }
 0x5b8   : > { %v2576_v63 = vpop.f32.mrf.mxu1 }
 0x5ba   : > { %v4693_v62 = vpop.f32.mrf.mxu0  ;;  %v4669_v2 = vpop.f32.mrf.mxu1 }
 0x5bb   : > { %2905 = vrot.lane.b32.xlu0 %v4693_v62, %s4980_s20 }
 0x5bc   : > { %v2822_v1 = vpop.f32.mrf.mxu0  ;;  %v2589_v3 = vpop.f32.mrf.mxu1 }
 0x5be   : > { %v4694_v28 = vpop.f32.mrf.mxu0  ;;  %v4670_v8 = vpop.f32.mrf.mxu1 }
 0x5bf   : > { %2636 = vrot.lane.b32.xlu0 %v2557_v58, %s4979_s19  ;;  %2907 = vrot.lane.b32.xlu1 %v4694_v28, %s4980_s20 }
 0x5c0   : > { %v2825_v31 = vpop.f32.mrf.mxu0  ;;  %v2592_v11 = vpop.f32.mrf.mxu1 }
 0x5c2   : > { %v4697_v9 = vpop.f32.mrf.mxu0  ;;  %v4673_v17 = vpop.f32.mrf.mxu1 }
 0x5c3   : > { %2901 = vrot.lane.b32.xlu0 %v2822_v1, %s4980_s20  ;;  %2638 = vrot.lane.b32.xlu1 %v2560_v59, %s4979_s19 }
 0x5c4   : > { %v2838_v12 = vpop.f32.mrf.mxu0  ;;  %v2605_v23 = vpop.f32.mrf.mxu1 }
 0x5c6   : > { %v4698_v19 = vpop.f32.mrf.mxu0  ;;  %v4674_v26 = vpop.f32.mrf.mxu1 }
 0x5c7   : > { %2648 = vrot.lane.b32.xlu0 %v4665_v60, %s4979_s19  ;;  %2903 = vrot.lane.b32.xlu1 %v2825_v31, %s4980_s20  ;;  %v4895_v60 = vld [vmem:[%s6154_s8] sm:$0xff]  }
 0x5c8   : > { %v2841_v29 = vpop.f32.mrf.mxu0  ;;  %v2608_v32 = vpop.f32.mrf.mxu1  ;;  %4753 = vmatprep.subr.bf16.mxu0 %v4895_v60 }
 0x5c9   : > { %4754 = vmatpush3.bf16.msra.mxu0 %v4895_v60 }
 0x5ca   : > { %v4701_v30 = vpop.f32.mrf.mxu0  ;;  %v4725_v4 = vpop.f32.mrf.mxu1 }
 0x5cb   : > { %2650 = vrot.lane.b32.xlu1 %v4666_v47, %s4979_s19  ;;  %2913 = vrot.lane.b32.xlu0 %v4697_v9, %s4980_s20 }
 0x5cc   : > { %v2854_v5 = vpop.f32.mrf.mxu0  ;;  %v3087_v14 = vpop.f32.mrf.mxu1 }
 0x5ce   : > { %v4702_v38 = vpop.f32.mrf.mxu0  ;;  %v4726_v13 = vpop.f32.mrf.mxu1 }
 0x5cf   : > { %2644 = vrot.lane.b32.xlu0 %v2573_v61, %s4979_s19  ;;  %2915 = vrot.lane.b32.xlu1 %v4698_v19, %s4980_s20 }
 0x5d0   : > { %v2857_v46 = vpop.f32.mrf.mxu0  ;;  %v3090_v6 = vpop.f32.mrf.mxu1 }
 0x5d2   : > { %v4705_v40 = vpop.f32.mrf.mxu0  ;;  %v4729_v42 = vpop.f32.mrf.mxu1 }
 0x5d3   : > { %2909 = vrot.lane.b32.xlu0 %v2838_v12, %s4980_s20  ;;  %2646 = vrot.lane.b32.xlu1 %v2576_v63, %s4979_s19 }
 0x5d4   : > { %v2870_v45 = vpop.f32.mrf.mxu0  ;;  %v3103_v48 = vpop.f32.mrf.mxu1 }
 0x5d6   : > { %v4706_v33 = vpop.f32.mrf.mxu0  ;;  %v4730_v15 = vpop.f32.mrf.mxu1 }
 0x5d7   : > { %2656 = vrot.lane.b32.xlu0 %v4669_v2, %s4979_s19  ;;  %2911 = vrot.lane.b32.xlu1 %v2841_v29, %s4980_s20 }
 0x5d8   : > { %v2873_v54 = vpop.f32.mrf.mxu0  ;;  %v3106_v58 = vpop.f32.mrf.mxu1 }
 0x5da   : > { %v4733_v59 = vpop.f32.mrf.mxu1 }
 0x5db   : > { %2658 = vrot.lane.b32.xlu1 %v4670_v8, %s4979_s19  ;;  %2921 = vrot.lane.b32.xlu0 %v4701_v30, %s4980_s20 }
 0x5dc   : > { %v3119_v61 = vpop.f32.mrf.mxu1 }
 0x5de   : > { %v4734_v47 = vpop.f32.mrf.mxu1 }
 0x5df   : > { %2652 = vrot.lane.b32.xlu0 %v2589_v3, %s4979_s19  ;;  %2923 = vrot.lane.b32.xlu1 %v4702_v38, %s4980_s20 }
 0x5e0   : > { %v3122_v62 = vpop.f32.mrf.mxu1 }
 0x5e2   : > { %v4737_v63 = vpop.f32.mrf.mxu1 }
 0x5e3   : > { %2917 = vrot.lane.b32.xlu0 %v2854_v5, %s4980_s20  ;;  %2654 = vrot.lane.b32.xlu1 %v2592_v11, %s4979_s19 }
 0x5e4   : > { %v3135_v1 = vpop.f32.mrf.mxu1 }
 0x5e6   : > { %v4738_v2 = vpop.f32.mrf.mxu1 }
 0x5e7   : > { %2664 = vrot.lane.b32.xlu0 %v4673_v17, %s4979_s19  ;;  %2919 = vrot.lane.b32.xlu1 %v2857_v46, %s4980_s20 }
 0x5e8   : > { %v3138_v28 = vpop.f32.mrf.mxu1 }
 0x5eb   : > { %2660 = vrot.lane.b32.xlu0 %v2605_v23, %s4979_s19  ;;  %2666 = vrot.lane.b32.xlu1 %v4674_v26, %s4979_s19 }
 0x5ef   : > { %2662 = vrot.lane.b32.xlu1 %v2608_v32, %s4979_s19  ;;  %2925 = vrot.lane.b32.xlu0 %v2870_v45, %s4980_s20 }
 0x5f3   : > { %3170 = vrot.lane.b32.xlu0 %v4725_v4, %s4978_s18  ;;  %2927 = vrot.lane.b32.xlu1 %v2873_v54, %s4980_s20 }
 0x5f7   : > { %3166 = vrot.lane.b32.xlu0 %v3087_v14, %s4978_s18  ;;  %3172 = vrot.lane.b32.xlu1 %v4726_v13, %s4978_s18 }
 0x5fb   : > { %3178 = vrot.lane.b32.xlu0 %v4729_v42, %s4978_s18  ;;  %3168 = vrot.lane.b32.xlu1 %v3090_v6, %s4978_s18 }
 0x5ff   : > { %3174 = vrot.lane.b32.xlu0 %v3103_v48, %s4978_s18  ;;  %3180 = vrot.lane.b32.xlu1 %v4730_v15, %s4978_s18 }
 0x603   : > { %3186 = vrot.lane.b32.xlu0 %v4733_v59, %s4978_s18  ;;  %3176 = vrot.lane.b32.xlu1 %v3106_v58, %s4978_s18  ;;  %v5851_v59 = vld [vmem:[%s6153_s7] ss:$0 sm:$0xff] }
 0x607   : > { %3182 = vrot.lane.b32.xlu0 %v3119_v61, %s4978_s18  ;;  %3188 = vrot.lane.b32.xlu1 %v4734_v47, %s4978_s18 }
 0x60b   : > { %2929 = vrot.lane.b32.xlu0 %v4705_v40, %s4980_s20  ;;  %3184 = vrot.lane.b32.xlu1 %v3122_v62, %s4978_s18 }
 0x60f   : > { %3190 = vrot.lane.b32.xlu0 %v3135_v1, %s4978_s18  ;;  %2931 = vrot.lane.b32.xlu1 %v4706_v33, %s4980_s20 }
 0x613   : > { %3194 = vrot.lane.b32.xlu0 %v4737_v63, %s4978_s18  ;;  %3192 = vrot.lane.b32.xlu1 %v3138_v28, %s4978_s18 }
 0x617   : > { %3196 = vrot.lane.b32.xlu1 %v4738_v2, %s4978_s18 }
 0x61d   : > { %v2641_v3 = vpop.permute.xlu0 %2640 }
 0x61e   : > { %2686 = vst.msk [vmem:[#allocation2 + $0x10] sm:$0xff] %vm1275_vm1, %v2641_v3 }
 0x621   : > { %v2643_v31 = vpop.permute.xlu1 %2642 }
 0x622   : > { %2687 = vst.msk [vmem:[#allocation2 + $0x18] sm:$0xff] %vm1275_vm1, %v2643_v31 }
 0x62d   : > { %v2906_v8 = vpop.permute.xlu0 %2905 }
 0x62e   : > { %2951 = vst.msk [vmem:[#allocation2 + $0x10] sm:$0xff] %vm1542_vm2, %v2906_v8 }
 0x631   : > { %v2637_v9 = vpop.permute.xlu0 %2636  ;;  %v2908_v11 = vpop.permute.xlu1 %2907 }
 0x632   : > { %2684 = vst.msk [vmem:[#allocation2] sm:$0xff] %vm1275_vm1, %v2637_v9 }
 0x633   : > { %2952 = vst.msk [vmem:[#allocation2 + $0x18] sm:$0xff] %vm1542_vm2, %v2908_v11 }
 0x635   : > { %v2902_v12 = vpop.permute.xlu0 %2901  ;;  %v2639_v17 = vpop.permute.xlu1 %2638 }
 0x636   : > { %2949 = vst.msk [vmem:[#allocation2] sm:$0xff] %vm1542_vm2, %v2902_v12 }
 0x637   : > { %2685 = vst.msk [vmem:[#allocation2 + $0x8] sm:$0xff] %vm1275_vm1, %v2639_v17 }
 0x639   : > { %v2649_v19 = vpop.permute.xlu0 %2648  ;;  %v2904_v23 = vpop.permute.xlu1 %2903 }
 0x63a   : > { %2690 = vst.msk [vmem:[#allocation2 + $0x30] sm:$0xff] %vm1275_vm1, %v2649_v19 }
 0x63b   : > { %2950 = vst.msk [vmem:[#allocation2 + $0x8] sm:$0xff] %vm1542_vm2, %v2904_v23 }
 0x63d   : > { %v2651_v26 = vpop.permute.xlu1 %2650  ;;  %v2914_v29 = vpop.permute.xlu0 %2913 }
 0x63e   : > { %2691 = vst.msk [vmem:[#allocation2 + $0x38] sm:$0xff] %vm1275_vm1, %v2651_v26 }
 0x63f   : > { %2955 = vst.msk [vmem:[#allocation2 + $0x30] sm:$0xff] %vm1542_vm2, %v2914_v29 }
 0x641   : > { %v2645_v30 = vpop.permute.xlu0 %2644  ;;  %v2916_v32 = vpop.permute.xlu1 %2915 }
 0x642   : > { %2688 = vst.msk [vmem:[#allocation2 + $0x20] sm:$0xff] %vm1275_vm1, %v2645_v30 }
 0x643   : > { %2956 = vst.msk [vmem:[#allocation2 + $0x38] sm:$0xff] %vm1542_vm2, %v2916_v32 }
 0x645   : > { %v2910_v4 = vpop.permute.xlu0 %2909  ;;  %v2647_v5 = vpop.permute.xlu1 %2646 }
 0x646   : > { %2953 = vst.msk [vmem:[#allocation2 + $0x20] sm:$0xff] %vm1542_vm2, %v2910_v4 }
 0x647   : > { %2689 = vst.msk [vmem:[#allocation2 + $0x28] sm:$0xff] %vm1275_vm1, %v2647_v5 }
 0x649   : > { %v2657_v14 = vpop.permute.xlu0 %2656  ;;  %v2912_v37 = vpop.permute.xlu1 %2911 }
 0x64a   : > { %2694 = vst.msk [vmem:[#allocation2 + $0x50] sm:$0xff] %vm1275_vm1, %v2657_v14 }
 0x64b   : > { %2954 = vst.msk [vmem:[#allocation2 + $0x28] sm:$0xff] %vm1542_vm2, %v2912_v37 }
 0x64d   : > { %v2659_v38 = vpop.permute.xlu1 %2658  ;;  %v2922_v13 = vpop.permute.xlu0 %2921 }
 0x64e   : > { %2695 = vst.msk [vmem:[#allocation2 + $0x58] sm:$0xff] %vm1275_vm1, %v2659_v38 }
 0x64f   : > { %2959 = vst.msk [vmem:[#allocation2 + $0x50] sm:$0xff] %vm1542_vm2, %v2922_v13 }
 0x651   : > { %v2653_v39 = vpop.permute.xlu0 %2652  ;;  %v2924_v46 = vpop.permute.xlu1 %2923 }
 0x652   : > { %2692 = vst.msk [vmem:[#allocation2 + $0x40] sm:$0xff] %vm1275_vm1, %v2653_v39 }
 0x653   : > { %2960 = vst.msk [vmem:[#allocation2 + $0x58] sm:$0xff] %vm1542_vm2, %v2924_v46 }
 0x655   : > { %v2918_v6 = vpop.permute.xlu0 %2917  ;;  %v2655_v16 = vpop.permute.xlu1 %2654 }
 0x656   : > { %2957 = vst.msk [vmem:[#allocation2 + $0x40] sm:$0xff] %vm1542_vm2, %v2918_v6 }
 0x657   : > { %2693 = vst.msk [vmem:[#allocation2 + $0x48] sm:$0xff] %vm1275_vm1, %v2655_v16 }
 0x659   : > { %v2665_v40 = vpop.permute.xlu0 %2664  ;;  %v2920_v42 = vpop.permute.xlu1 %2919 }
 0x65a   : > { %2698 = vst.msk [vmem:[#allocation2 + $0x70] sm:$0xff] %vm1275_vm1, %v2665_v40 }
 0x65b   : > { %2958 = vst.msk [vmem:[#allocation2 + $0x48] sm:$0xff] %vm1542_vm2, %v2920_v42 }
 0x65d   : > { %v2661_v53 = vpop.permute.xlu0 %2660  ;;  %v2667_v45 = vpop.permute.xlu1 %2666 }
 0x65e   : > { %2696 = vst.msk [vmem:[#allocation2 + $0x60] sm:$0xff] %vm1275_vm1, %v2661_v53  ;;  %2699 = vst.msk [vmem:[#allocation2 + $0x78] sm:$0xff] %vm1275_vm1, %v2667_v45 }
 0x661   : > { %v2663_v48 = vpop.permute.xlu1 %2662  ;;  %v2926_v50 = vpop.permute.xlu0 %2925 }
 0x662   : > { %2697 = vst.msk [vmem:[#allocation2 + $0x68] sm:$0xff] %vm1275_vm1, %v2663_v48 }
 0x663   : > { %2961 = vst.msk [vmem:[#allocation2 + $0x60] sm:$0xff] %vm1542_vm2, %v2926_v50 }
 0x665   : > { %v3171_v33 = vpop.permute.xlu0 %3170  ;;  %v2928_v15 = vpop.permute.xlu1 %2927 }
 0x666   : > { %3216 = vst.msk [vmem:[#allocation2 + $0x10] sm:$0xff] %vm1809_vm3, %v3171_v33 }
 0x667   : > { %2962 = vst.msk [vmem:[#allocation2 + $0x68] sm:$0xff] %vm1542_vm2, %v2928_v15 }
 0x669   : > { %v3167_v56 = vpop.permute.xlu0 %3166  ;;  %v3173_v54 = vpop.permute.xlu1 %3172 }
 0x66a   : > { %3214 = vst.msk [vmem:[#allocation2] sm:$0xff] %vm1809_vm3, %v3167_v56  ;;  %3217 = vst.msk [vmem:[#allocation2 + $0x18] sm:$0xff] %vm1809_vm3, %v3173_v54 }
 0x66d   : > { %v3179_v58 = vpop.permute.xlu0 %3178  ;;  %v3169_v7 = vpop.permute.xlu1 %3168  ;;  %v3232_v60 = vld [vmem:[#allocation2 + $0x10] sm:$0xff] }
 0x66e   : > { %3220 = vst.msk [vmem:[#allocation2 + $0x30] sm:$0xff] %vm1809_vm3, %v3179_v58  ;;  %3215 = vst.msk [vmem:[#allocation2 + $0x8] sm:$0xff] %vm1809_vm3, %v3169_v7  ;;  %v3255_v28 = vadd.f32 %v5851_v59, %v3232_v60 }
 0x670   : > { %v3271_v17 = vmax.f32 %v3255_v28, 0.0 }
 0x671   : > { %v3175_v61 = vpop.permute.xlu0 %3174  ;;  %v3181_v47 = vpop.permute.xlu1 %3180  ;;  %v3230_v62 = vld [vmem:[#allocation2] sm:$0xff]  ;;  %v3233_v63 = vld [vmem:[#allocation2 + $0x18] sm:$0xff] }
 0x672   : > { %3218 = vst.msk [vmem:[#allocation2 + $0x20] sm:$0xff] %vm1809_vm3, %v3175_v61  ;;  %3221 = vst.msk [vmem:[#allocation2 + $0x38] sm:$0xff] %vm1809_vm3, %v3181_v47  ;;  %v3253_v1 = vadd.f32 %v5851_v59, %v3230_v62  ;;  %v3256_v2 = vadd.f32 %v5851_v59, %v3233_v63  ;;  %v5875_v13 = vadd.f32 %v3271_v17, %v5472_v18 }
 0x674   : > { %v3272_v9 = vmax.f32 %v3256_v2, 0.0  ;;  %v3269_v12 = vmax.f32 %v3253_v1, 0.0 }
 0x675   : > { %v3187_v3 = vpop.permute.xlu0 %3186  ;;  %v3177_v31 = vpop.permute.xlu1 %3176  ;;  %v3231_v8 = vld [vmem:[#allocation2 + $0x8] sm:$0xff]  ;;  %v3236_v23 = vld [vmem:[#allocation2 + $0x30] sm:$0xff] }
 0x676   : > { %3224 = vst.msk [vmem:[#allocation2 + $0x50] sm:$0xff] %vm1809_vm3, %v3187_v3  ;;  %3219 = vst.msk [vmem:[#allocation2 + $0x28] sm:$0xff] %vm1809_vm3, %v3177_v31  ;;  %v3254_v11 = vadd.f32 %v5851_v59, %v3231_v8  ;;  %v5862_v30 = vadd.f32 %v3272_v9, %v5479_v25  ;;  %v5867_v5 = vadd.f32 %v3269_v12, %v5468_v10 }
 0x677   : > { %v3259_v25 = vadd.f32 %v5851_v59, %v3236_v23 }
 0x678   : > { %v3270_v19 = vmax.f32 %v3254_v11, 0.0  ;;  %v3302_v10 = vpack.c.bf16 %v5862_v30, %v5875_v13 }
 0x679   : > { %v3183_v26 = vpop.permute.xlu0 %3182  ;;  %v3189_v29 = vpop.permute.xlu1 %3188  ;;  %v3234_v32 = vld [vmem:[#allocation2 + $0x20] sm:$0xff]  ;;  %v3237_v4 = vld [vmem:[#allocation2 + $0x38] sm:$0xff]  ;;  %v3275_v42 = vmax.f32 %v3259_v25, 0.0 }
 0x67a   : > { %3222 = vst.msk [vmem:[#allocation2 + $0x40] sm:$0xff] %vm1809_vm3, %v3183_v26  ;;  %3225 = vst.msk [vmem:[#allocation2 + $0x58] sm:$0xff] %vm1809_vm3, %v3189_v29  ;;  %v5870_v14 = vadd.f32 %v3270_v19, %v5476_v20  ;;  %v3257_v37 = vadd.f32 %v5851_v59, %v3234_v32  ;;  %v3260_v38 = vadd.f32 %v5851_v59, %v3237_v4 }
 0x67b   : > { %v5899_v61 = vadd.f32 %v3275_v42, %v5508_v22 }
 0x67c   : > { %v3301_v39 = vpack.c.bf16 %v5870_v14, %v5867_v5  ;;  %v3276_v20 = vmax.f32 %v3260_v38, 0.0  ;;  %v3273_v40 = vmax.f32 %v3257_v37, 0.0 }
 0x67d   : > { %v2930_v46 = vpop.permute.xlu0 %2929  ;;  %v3185_v6 = vpop.permute.xlu1 %3184  ;;  %v3235_v16 = vld [vmem:[#allocation2 + $0x28] sm:$0xff]  ;;  %v3240_v45 = vld [vmem:[#allocation2 + $0x50] sm:$0xff] }
 0x67e   : > { %2963 = vst.msk [vmem:[#allocation2 + $0x70] sm:$0xff] %vm1542_vm2, %v2930_v46  ;;  %4755 = vmatprep.mubr.bf16.mxu0 %v3301_v39  ;;  %v3258_v18 = vadd.f32 %v5851_v59, %v3235_v16  ;;  %v5886_v33 = vadd.f32 %v3276_v20, %v5511_v55  ;;  %v5891_v54 = vadd.f32 %v3273_v40, %v5501_v44 }
 0x67f   : > { %3223 = vst.msk [vmem:[#allocation2 + $0x48] sm:$0xff] %vm1809_vm3, %v3185_v6  ;;  %4756 = vmatmul.mubr.bf16.vlgmr.msra.gmra.mxu0 %v3302_v10  ;;  %v3263_v55 = vadd.f32 %v5851_v59, %v3240_v45 }
 0x680   : > { %v3274_v53 = vmax.f32 %v3258_v18, 0.0  ;;  %v3304_v44 = vpack.c.bf16 %v5886_v33, %v5899_v61 }
 0x681   : > { %v3191_v48 = vpop.permute.xlu0 %3190  ;;  %v2932_v50 = vpop.permute.xlu1 %2931  ;;  %v3238_v15 = vld [vmem:[#allocation2 + $0x40] sm:$0xff]  ;;  %v3241_v56 = vld [vmem:[#allocation2 + $0x58] sm:$0xff]  ;;  %v3279_v28 = vmax.f32 %v3263_v55, 0.0 }
 0x682   : > { %3226 = vst.msk [vmem:[#allocation2 + $0x60] sm:$0xff] %vm1809_vm3, %v3191_v48  ;;  %v5894_v58 = vadd.f32 %v3274_v53, %v5505_v21  ;;  %v3261_v7 = vadd.f32 %v5851_v59, %v3238_v15  ;;  %v3264_v60 = vadd.f32 %v5851_v59, %v3241_v56 }
 0x683   : > { %2964 = vst.msk [vmem:[#allocation2 + $0x78] sm:$0xff] %vm1542_vm2, %v2932_v50  ;;  %v5921_v19 = vadd.f32 %v3279_v28, %v5535_v41 }
 0x684   : > { %v3303_v47 = vpack.c.bf16 %v5894_v58, %v5891_v54  ;;  %v3280_v21 = vmax.f32 %v3264_v60, 0.0  ;;  %v3277_v2 = vmax.f32 %v3261_v7, 0.0 }
 0x685   : > { %v3195_v62 = vpop.permute.xlu0 %3194  ;;  %v3193_v63 = vpop.permute.xlu1 %3192 }
 0x686   : > { %v3239_v1 = vld [vmem:[#allocation2 + $0x48] sm:$0xff]  ;;  %3228 = vst.msk [vmem:[#allocation2 + $0x70] sm:$0xff] %vm1809_vm3, %v3195_v62  ;;  %3227 = vst.msk [vmem:[#allocation2 + $0x68] sm:$0xff] %vm1809_vm3, %v3193_v63  ;;  %4759 = vmatprep.mubr.bf16.mxu0 %v3303_v47  ;;  %v5910_v8 = vadd.f32 %v3280_v21, %v5550_v57  ;;  %v5914_v11 = vadd.f32 %v3277_v2, %v5538_v35 }
 0x687   : > { %v3262_v22 = vadd.f32 %v5851_v59, %v3239_v1  ;;  %4760 = vmatmul.mubr.bf16.gmra.mxu0 %v3304_v44 }
 0x688   : > { %v3306_v57 = vpack.c.bf16 %v5910_v8, %v5921_v19 }
 0x689   : > { %v3278_v3 = vmax.f32 %v3262_v22, 0.0  ;;  %v3197_v31 = vpop.permute.xlu1 %3196  ;;  %v3242_v9 = vld [vmem:[#allocation2 + $0x60] sm:$0xff] }
 0x68a   : > { %3229 = vst.msk [vmem:[#allocation2 + $0x78] sm:$0xff] %vm1809_vm3, %v3197_v31  ;;  %v3265_v17 = vadd.f32 %v5851_v59, %v3242_v9 }
 0x68b   : > { %v5917_v12 = vadd.f32 %v3278_v3, %v5541_v43 }
 0x68c   : > { %v3281_v32 = vmax.f32 %v3265_v17, 0.0 }
 0x68d   : > { %v3305_v23 = vpack.c.bf16 %v5917_v12, %v5914_v11  ;;  %v3243_v26 = vld [vmem:[#allocation2 + $0x68] sm:$0xff]  ;;  %v3244_v29 = vld [vmem:[#allocation2 + $0x70] sm:$0xff] }
 0x68e   : > { %v3266_v35 = vadd.f32 %v5851_v59, %v3243_v26  ;;  %v3267_v43 = vadd.f32 %v5851_v59, %v3244_v29  ;;  %v5930_v41 = vadd.f32 %v3281_v32, %v5570_v34 }
 0x68f   : > { %4763 = vmatprep.mubr.bf16.mxu0 %v3305_v23 }
 0x690   : > { %4764 = vmatmul.mubr.bf16.gmra.mxu0 %v3306_v57  ;;  %v3282_v4 = vmax.f32 %v3266_v35, 0.0  ;;  %v3283_v39 = vmax.f32 %v3267_v43, 0.0 }
 0x691   : > { %v3245_v37 = vld [vmem:[#allocation2 + $0x78] sm:$0xff] }
 0x692   : > { %v5933_v38 = vadd.f32 %v3282_v4, %v5573_v36  ;;  %v3268_v25 = vadd.f32 %v5851_v59, %v3245_v37  ;;  %v5939_v10 = vadd.f32 %v3283_v39, %v5578_v27  ;;  %v3650_v36 = vld [vmem:[%s6156_s10] sm:$0xf] }
 0x693   : > { %4771 = vmatprep.subr.msk.mxu1 %vm3699_vm4, %v3650_v36  ;;  %v5952_v27 = vld [vmem:[%s6155_s9] ss:$0 sm:$0xff] }
 0x694   : > { %v3307_v46 = vpack.c.bf16 %v5933_v38, %v5930_v41  ;;  %v3284_v6 = vmax.f32 %v3268_v25, 0.0  ;;  %4772 = vmatpush3.msk.msra.mxu1 %vm3699_vm4, %v3650_v36 }
 0x696   : > { %4767 = vmatprep.mubr.bf16.mxu0 %v3307_v46  ;;  %v5942_v16 = vadd.f32 %v3284_v6, %v5581_v52 }
 0x698   : > { %v3308_v34 = vpack.c.bf16 %v5942_v16, %v5939_v10 }
 0x69a   : > { %4768 = vmatmul.mubr.bf16.gmra.mxu0 %v3308_v34 }
 0x73f   : > { %v4757_v59 = vpop.f32.mrf.mxu0 }
 0x740   : > { %v3423_v42 = vadd.f32 %v4757_v59, %v5952_v27 }
 0x741   : > { %v3414_v20 = vpop.f32.mrf.mxu0 }
 0x742   : > { %v3415_v18 = vadd.f32 %v5952_v27, %v3414_v20  ;;  %v3481_v60 = vsel %vm3477_vm5, %v3423_v42, -inf }
 0x743   : > { %v4758_v52 = vpop.f32.mrf.mxu0 }
 0x744   : > { %v3478_v48 = vsel %vm3477_vm5, %v3415_v18, -inf  ;;  %v3426_v50 = vadd.f32 %v4758_v52, %v5952_v27 }
 0x745   : > { %v3417_v40 = vpop.f32.mrf.mxu0 }
 0x746   : > { %v3418_v53 = vadd.f32 %v5952_v27, %v3417_v40  ;;  %v3483_v62 = vsel %vm3477_vm5, %v3426_v50, -inf }
 0x747   : > { %v4761_v45 = vpop.f32.mrf.mxu0 }
 0x748   : > { %v3479_v15 = vsel %vm3477_vm5, %v3418_v53, -inf  ;;  %v5966_v21 = vadd.f32 %v4761_v45, %v5952_v27 }
 0x749   : > { %v3480_v56 = vmax.f32 %v3478_v48, %v3479_v15  ;;  %v3430_v7 = vpop.f32.mrf.mxu0 }
 0x74a   : > { %v5963_v63 = vadd.f32 %v5952_v27, %v3430_v7  ;;  %v3494_v26 = vsel %vm3477_vm5, %v5966_v21, -inf }
 0x74b   : > { %v3482_v55 = vmax.f32 %v3480_v56, %v3481_v60  ;;  %v4762_v47 = vpop.f32.mrf.mxu0 }
 0x74c   : > { %v3491_v3 = vsel %vm3477_vm5, %v5963_v63, -inf  ;;  %v5974_v31 = vadd.f32 %v4762_v47, %v5952_v27 }
 0x74d   : > { %v3484_v44 = vmax.f32 %v3482_v55, %v3483_v62  ;;  %v3433_v1 = vpop.f32.mrf.mxu0 }
 0x74e   : > { %v5969_v22 = vadd.f32 %v5952_v27, %v3433_v1  ;;  %v3496_v43 = vsel %vm3477_vm5, %v5974_v31, -inf }
 0x74f   : > { %v3485_v2 = vrot.slane %v3484_v44, 4 }
 0x750   : > { %v4765_v28 = vpop.f32.mrf.mxu0  ;;  %v3492_v9 = vsel %vm3477_vm5, %v5969_v22, -inf }
 0x751   : > { %v3486_v17 = vmax.f32 %v3484_v44, %v3485_v2  ;;  %v3493_v23 = vmax.f32 %v3491_v3, %v3492_v9  ;;  %v5986_v46 = vadd.f32 %v4765_v28, %v5952_v27 }
 0x752   : > { %v3446_v57 = vpop.f32.mrf.mxu0 }
 0x753   : > { %v3487_v29 = vrot.slane %v3486_v17, 2  ;;  %v3495_v35 = vmax.f32 %v3493_v23, %v3494_v26  ;;  %v5983_v4 = vadd.f32 %v5952_v27, %v3446_v57  ;;  %v3507_v15 = vsel %vm3477_vm5, %v5986_v46, -inf }
 0x754   : > { %v4766_v32 = vpop.f32.mrf.mxu0 }
 0x755   : > { %v3488_v37 = vmax.f32 %v3486_v17, %v3487_v29  ;;  %v3497_v25 = vmax.f32 %v3495_v35, %v3496_v43  ;;  %v3504_v59 = vsel %vm3477_vm5, %v5983_v4, -inf  ;;  %v5994_v20 = vadd.f32 %v4766_v32, %v5952_v27 }
 0x756   : > { %v3449_v39 = vpop.f32.mrf.mxu0 }
 0x757   : > { %v5989_v6 = vadd.f32 %v5952_v27, %v3449_v39  ;;  %v3489_v34 = vrot.slane %v3488_v37, 1  ;;  %v3498_v36 = vrot.slane %v3497_v25, 4  ;;  %v3509_v44 = vsel %vm3477_vm5, %v5994_v20, -inf }
 0x759   : > { %v3505_v52 = vsel %vm3477_vm5, %v5989_v6, -inf  ;;  %v3490_v40 = vmax.f32 %v3488_v37, %v3489_v34  ;;  %v3499_v45 = vmax.f32 %v3497_v25, %v3498_v36 }
 0x75a   : > { %v3506_v48 = vmax.f32 %v3504_v59, %v3505_v52  ;;  %v4769_v56 = vpop.f32.mrf.mxu0 }
 0x75b   : > { %v3530_v7 = vsub.f32 %v3415_v18, %v3490_v40  ;;  %v3531_v60 = vsub.f32 %v3418_v53, %v3490_v40  ;;  %v3532_v55 = vsub.f32 %v3423_v42, %v3490_v40  ;;  %v3533_v47 = vsub.f32 %v3426_v50, %v3490_v40 }
 0x75c   : > { %v3500_v62 = vrot.slane %v3499_v45, 2  ;;  %v3508_v1 = vmax.f32 %v3506_v48, %v3507_v15  ;;  %v3462_v2 = vpop.f32.mrf.mxu0  ;;  %v6006_v50 = vadd.f32 %v4769_v56, %v5952_v27 }
 0x75d   : > { %v3546_v28 = vmul.f32 1.442695, %v3530_v7  ;;  %v3548_v3 = vmul.f32 1.442695, %v3531_v60  ;;  %v3550_v9 = vmul.f32 1.442695, %v3532_v55  ;;  %v6003_v29 = vadd.f32 %v5952_v27, %v3462_v2 }
 0x75e   : > { %v3552_v17 = vmul.f32 1.442695, %v3533_v47  ;;  %v3501_v23 = vmax.f32 %v3499_v45, %v3500_v62  ;;  %v3510_v57 = vmax.f32 %v3508_v1, %v3509_v44  ;;  %v4770_v26 = vpop.f32.mrf.mxu0  ;;  %v3520_v45 = vsel %vm3477_vm5, %v6006_v50, -inf }
 0x75f   : > { %4912 = vpow2.f32 %v3546_v28  ;;  %v3517_v37 = vsel %vm3477_vm5, %v6003_v29, -inf  ;;  %v6014_v25 = vadd.f32 %v4770_v26, %v5952_v27 }
 0x760   : > { %4914 = vpow2.f32 %v3548_v3  ;;  %v3502_v18 = vrot.slane %v3501_v23, 1  ;;  %v3511_v42 = vrot.slane %v3510_v57, 4  ;;  %v3465_v53 = vpop.f32.mrf.mxu0 }
 0x761   : > { %4916 = vpow2.f32 %v3550_v9  ;;  %v6009_v35 = vadd.f32 %v5952_v27, %v3465_v53 }
 0x762   : > { %4918 = vpow2.f32 %v3552_v17  ;;  %v3503_v32 = vmax.f32 %v3501_v23, %v3502_v18  ;;  %v3512_v43 = vmax.f32 %v3510_v57, %v3511_v42 }
 0x763   : > { %v3518_v39 = vsel %vm3477_vm5, %v6009_v35, -inf }
 0x764   : > { %v3534_v34 = vsub.f32 %v5963_v63, %v3503_v32  ;;  %v3535_v36 = vsub.f32 %v5969_v22, %v3503_v32  ;;  %v3536_v59 = vsub.f32 %v5966_v21, %v3503_v32  ;;  %v3537_v52 = vsub.f32 %v5974_v31, %v3503_v32 }
 0x765   : > { %v3513_v40 = vrot.slane %v3512_v43, 2  ;;  %v3519_v48 = vmax.f32 %v3517_v37, %v3518_v39  ;;  %v3522_v63 = vsel %vm3477_vm5, %v6014_v25, -inf }
 0x766   : > { %v3554_v15 = vmul.f32 1.442695, %v3534_v34  ;;  %v3556_v56 = vmul.f32 1.442695, %v3535_v36  ;;  %v3558_v27 = vmul.f32 1.442695, %v3536_v59 }
 0x767   : > { %v3560_v7 = vmul.f32 1.442695, %v3537_v52  ;;  %v3514_v60 = vmax.f32 %v3512_v43, %v3513_v40  ;;  %v3521_v55 = vmax.f32 %v3519_v48, %v3520_v45 }
 0x768   : > { %4920 = vpow2.f32 %v3554_v15 }
 0x769   : > { %4922 = vpow2.f32 %v3556_v56  ;;  %v3515_v22 = vrot.slane %v3514_v60, 1  ;;  %v3523_v21 = vmax.f32 %v3521_v55, %v3522_v63 }
 0x76a   : > { %4924 = vpow2.f32 %v3558_v27 }
 0x76b   : > { %4926 = vpow2.f32 %v3560_v7  ;;  %v3516_v31 = vmax.f32 %v3514_v60, %v3515_v22  ;;  %v3524_v47 = vrot.slane %v3523_v21, 4 }
 0x76c   : > { %v6026_v62 = vpop.eup %4912 }
 0x76d   : > { %v6028_v44 = vpop.eup %4914  ;;  %v3578_v1 = vsel %vm3477_vm5, %v6026_v62, 0.0  ;;  %v3538_v2 = vsub.f32 %v5983_v4, %v3516_v31  ;;  %v3539_v28 = vsub.f32 %v5989_v6, %v3516_v31  ;;  %v3540_v3 = vsub.f32 %v5986_v46, %v3516_v31 }
 0x76e   : > { %v6035_v9 = vpop.eup %4916  ;;  %v3579_v17 = vsel %vm3477_vm5, %v6028_v44, 0.0  ;;  %v3541_v23 = vsub.f32 %v5994_v20, %v3516_v31  ;;  %v3525_v57 = vmax.f32 %v3523_v21, %v3524_v47 }
 0x76f   : > { %v6040_v26 = vpop.eup %4918  ;;  %v3580_v18 = vadd.f32 %v3579_v17, %v3578_v1  ;;  %v3562_v42 = vmul.f32 1.442695, %v3538_v2  ;;  %v3564_v53 = vmul.f32 1.442695, %v3539_v28  ;;  %v3581_v4 = vsel %vm3477_vm5, %v6035_v9, 0.0 }
 0x770   : > { %v3566_v32 = vmul.f32 1.442695, %v3540_v3  ;;  %v3568_v6 = vmul.f32 1.442695, %v3541_v23  ;;  %v3526_v43 = vrot.slane %v3525_v57, 2  ;;  %v3583_v37 = vsel %vm3477_vm5, %v6040_v26, 0.0 }
 0x771   : > { %v3582_v46 = vadd.f32 %v3581_v4, %v3580_v18  ;;  %4928 = vpow2.f32 %v3562_v42 }
 0x772   : > { %4930 = vpow2.f32 %v3564_v53  ;;  %v3527_v39 = vmax.f32 %v3525_v57, %v3526_v43 }
 0x773   : > { %v3584_v20 = vadd.f32 %v3583_v37, %v3582_v46  ;;  %4932 = vpow2.f32 %v3566_v32 }
 0x774   : > { %4934 = vpow2.f32 %v3568_v6  ;;  %v3528_v34 = vrot.slane %v3527_v39, 1 }
 0x775   : > { %v6046_v36 = vpop.eup %4920  ;;  %v3585_v59 = vrot.slane %v3584_v20, 4 }
 0x776   : > { %v6048_v52 = vpop.eup %4922  ;;  %v3591_v40 = vsel %vm3477_vm5, %v6046_v36, 0.0  ;;  %v3529_v45 = vmax.f32 %v3527_v39, %v3528_v34 }
 0x777   : > { %v6052_v48 = vpop.eup %4924  ;;  %v3586_v15 = vadd.f32 %v3585_v59, %v3584_v20  ;;  %v3592_v56 = vsel %vm3477_vm5, %v6048_v52, 0.0 }
 0x778   : > { %v6056_v27 = vpop.eup %4926  ;;  %v3593_v7 = vadd.f32 %v3592_v56, %v3591_v40  ;;  %v3542_v60 = vsub.f32 %v6003_v29, %v3529_v45  ;;  %v3543_v55 = vsub.f32 %v6009_v35, %v3529_v45  ;;  %v3594_v22 = vsel %vm3477_vm5, %v6052_v48, 0.0 }
 0x779   : > { %v3587_v63 = vrot.slane %v3586_v15, 2  ;;  %v3544_v21 = vsub.f32 %v6006_v50, %v3529_v45  ;;  %v3545_v31 = vsub.f32 %v6014_v25, %v3529_v45  ;;  %v3596_v3 = vsel %vm3477_vm5, %v6056_v27, 0.0 }
 0x77a   : > { %v3595_v47 = vadd.f32 %v3594_v22, %v3593_v7  ;;  %v3570_v1 = vmul.f32 1.442695, %v3542_v60  ;;  %v3572_v2 = vmul.f32 1.442695, %v3543_v55 }
 0x77b   : > { %v3588_v28 = vadd.f32 %v3587_v63, %v3586_v15  ;;  %v3574_v17 = vmul.f32 1.442695, %v3544_v21  ;;  %v3576_v23 = vmul.f32 1.442695, %v3545_v31 }
 0x77c   : > { %v3597_v29 = vadd.f32 %v3596_v3, %v3595_v47  ;;  %4936 = vpow2.f32 %v3570_v1 }
 0x77d   : > { %v3589_v35 = vrot.slane %v3588_v28, 1  ;;  %4938 = vpow2.f32 %v3572_v2 }
 0x77e   : > { %v6066_v57 = vpop.eup %4928  ;;  %v3598_v18 = vrot.slane %v3597_v29, 4  ;;  %4940 = vpow2.f32 %v3574_v17 }
 0x77f   : > { %v6068_v50 = vpop.eup %4930  ;;  %v3590_v25 = vadd.f32 %v3589_v35, %v3588_v28  ;;  %v3604_v42 = vsel %vm3477_vm5, %v6066_v57, 0.0  ;;  %4942 = vpow2.f32 %v3576_v23 }
 0x780   : > { %v4933_v53 = vpop.eup %4932  ;;  %v3599_v4 = vadd.f32 %v3598_v18, %v3597_v29  ;;  %v3605_v32 = vsel %vm3477_vm5, %v6068_v50, 0.0 }
 0x781   : > { %v4935_v6 = vpop.eup %4934  ;;  %4944 = vrcp.f32 %v3590_v25  ;;  %v3606_v43 = vadd.f32 %v3605_v32, %v3604_v42  ;;  %v3607_v37 = vsel %vm3477_vm5, %v4933_v53, 0.0 }
 0x782   : > { %v3600_v46 = vrot.slane %v3599_v4, 2  ;;  %v3609_v34 = vsel %vm3477_vm5, %v4935_v6, 0.0 }
 0x783   : > { %v3608_v39 = vadd.f32 %v3607_v37, %v3606_v43 }
 0x784   : > { %v3601_v20 = vadd.f32 %v3600_v46, %v3599_v4 }
 0x785   : > { %v3610_v59 = vadd.f32 %v3609_v34, %v3608_v39 }
 0x786   : > { %v3602_v40 = vrot.slane %v3601_v20, 1 }
 0x787   : > { %v3611_v45 = vrot.slane %v3610_v59, 4 }
 0x788   : > { %v3603_v15 = vadd.f32 %v3602_v40, %v3601_v20 }
 0x789   : > { %v4937_v56 = vpop.eup %4936  ;;  %v3612_v7 = vadd.f32 %v3611_v45, %v3610_v59 }
 0x78a   : > { %v4939_v60 = vpop.eup %4938  ;;  %4946 = vrcp.f32 %v3603_v15  ;;  %v3617_v55 = vsel %vm3477_vm5, %v4937_v56, 0.0 }
 0x78b   : > { %v4941_v63 = vpop.eup %4940  ;;  %v3613_v22 = vrot.slane %v3612_v7, 2  ;;  %v3618_v21 = vsel %vm3477_vm5, %v4939_v60, 0.0 }
 0x78c   : > { %v4943_v31 = vpop.eup %4942  ;;  %v3619_v47 = vadd.f32 %v3618_v21, %v3617_v55  ;;  %v3620_v2 = vsel %vm3477_vm5, %v4941_v63, 0.0 }
 0x78d   : > { %v3614_v1 = vadd.f32 %v3613_v22, %v3612_v7  ;;  %v3622_v23 = vsel %vm3477_vm5, %v4943_v31, 0.0 }
 0x78e   : > { %v4945_v28 = vpop.eup %4944  ;;  %v3621_v3 = vadd.f32 %v3620_v2, %v3619_v47 }
 0x78f   : > { %v3615_v17 = vrot.slane %v3614_v1, 1  ;;  %v3634_v29 = vmul.f32 %v4945_v28, %v6026_v62  ;;  %v3635_v35 = vmul.f32 %v4945_v28, %v6028_v44  ;;  %v3636_v42 = vmul.f32 %v4945_v28, %v6035_v9 }
 0x790   : > { %v3623_v18 = vadd.f32 %v3622_v23, %v3621_v3  ;;  %v3637_v43 = vmul.f32 %v4945_v28, %v6040_v26 }
 0x791   : > { %v3616_v25 = vadd.f32 %v3615_v17, %v3614_v1  ;;  %4773 = vmatprep.mubr.msk.f32.mxu1 %vm3477_vm5, %v3634_v29 }
 0x792   : > { %v3624_v4 = vrot.slane %v3623_v18, 4  ;;  %4774 = vmatmul.mubr.msk.f32.vlgmr.msra.gmra.mxu1 %vm3477_vm5, %v3635_v35 }
 0x793   : > { %4948 = vrcp.f32 %v3616_v25  ;;  %4776 = vmatprep.mubr.msk.f32.mxu1 %vm3477_vm5, %v3636_v42 }
 0x794   : > { %v3625_v32 = vadd.f32 %v3624_v4, %v3623_v18 }
 0x796   : > { %v3626_v46 = vrot.slane %v3625_v32, 2  ;;  %4777 = vmatmul.mubr.msk.f32.gmra.mxu1 %vm3477_vm5, %v3637_v43 }
 0x797   : > { %v4947_v62 = vpop.eup %4946 }
 0x798   : > { %v3627_v44 = vadd.f32 %v3626_v46, %v3625_v32  ;;  %v3638_v37 = vmul.f32 %v4947_v62, %v6046_v36  ;;  %v3639_v39 = vmul.f32 %v4947_v62, %v6048_v52  ;;  %v3640_v9 = vmul.f32 %v4947_v62, %v6052_v48 }
 0x799   : > { %v3641_v26 = vmul.f32 %v4947_v62, %v6056_v27 }
 0x79a   : > { %v3628_v20 = vrot.slane %v3627_v44, 1  ;;  %4779 = vmatprep.mubr.msk.f32.mxu1 %vm3477_vm5, %v3638_v37 }
 0x79b   : > { %4780 = vmatmul.mubr.msk.f32.gmra.mxu1 %vm3477_vm5, %v3639_v39 }
 0x79c   : > { %v3629_v34 = vadd.f32 %v3628_v20, %v3627_v44  ;;  %4782 = vmatprep.mubr.msk.f32.mxu1 %vm3477_vm5, %v3640_v9 }
 0x79e   : > { %4950 = vrcp.f32 %v3629_v34 }
 0x79f   : > { %4783 = vmatmul.mubr.msk.f32.gmra.mxu1 %vm3477_vm5, %v3641_v26 }
 0x7a0   : > { %v4949_v59 = vpop.eup %4948 }
 0x7a1   : > { %v3642_v36 = vmul.f32 %v4949_v59, %v6066_v57  ;;  %v3643_v52 = vmul.f32 %v4949_v59, %v6068_v50  ;;  %v3644_v40 = vmul.f32 %v4949_v59, %v4933_v53  ;;  %v3645_v48 = vmul.f32 %v4949_v59, %v4935_v6 }
 0x7a2   : > { %v655_v53 = vsel %vm654_vm6, %v5190_v51, %v5188_v49 }
 0x7a3   : > { %4785 = vmatprep.mubr.msk.f32.mxu1 %vm3477_vm5, %v3642_v36  ;;  %v657_v6 = vsel %vm656_vm7, %v5196_v0, %v655_v53 }
 0x7a4   : > { %4786 = vmatmul.mubr.msk.f32.gmra.mxu1 %vm3477_vm5, %v3643_v52 }
 0x7a5   : > { %4788 = vmatprep.mubr.msk.f32.mxu1 %vm3477_vm5, %v3644_v40 }
 0x7a8   : > { %4789 = vmatmul.mubr.msk.f32.gmra.mxu1 %vm3477_vm5, %v3645_v48 }
 0x7ab   : > { %v4951_v27 = vpop.eup %4950 }
 0x7ac   : > { %v3646_v45 = vmul.f32 %v4951_v27, %v4937_v56  ;;  %v3647_v15 = vmul.f32 %v4951_v27, %v4939_v60  ;;  %v3648_v57 = vmul.f32 %v4951_v27, %v4941_v63  ;;  %v3649_v50 = vmul.f32 %v4951_v27, %v4943_v31 }
 0x7ad   : > { %v659_v56 = vsel %vm658_vm8, %v5200_v24, %v657_v6 }
 0x7ae   : > { %4791 = vmatprep.mubr.msk.f32.mxu1 %vm3477_vm5, %v3646_v45  ;;  %661 = vst [vmem:[%s442_s14] sm:$0xf] %v659_v56 }
 0x7af   : > { %4792 = vmatmul.mubr.msk.f32.gmra.mxu1 %vm3477_vm5, %v3647_v15 }
 0x7b0   : > { %4794 = vmatprep.mubr.msk.f32.mxu1 %vm3477_vm5, %v3648_v57 }
 0x7b3   : > { %4795 = vmatmul.mubr.msk.f32.gmra.mxu1 %vm3477_vm5, %v3649_v50 }
 0x852   : > { %v4775_v7 = vpop.f32.mrf.mxu1 }
 0x853   : > { %v3849_v2 = vmul.f32 %v4775_v7, %v5870_v14 }
 0x854   : > { %v3769_v60 = vpop.f32.mrf.mxu1 }
 0x855   : > { %v3848_v31 = vmul.f32 %v3769_v60, %v5867_v5 }
 0x856   : > { %v4778_v55 = vpop.f32.mrf.mxu1 }
 0x857   : > { %v3864_v17 = vadd.f32 %v3849_v2, %v3848_v31 }
 0x858   : > { %v3779_v63 = vpop.f32.mrf.mxu1 }
 0x859   : > { %v3850_v24 = vmul.f32 %v3779_v63, %v5875_v13 }
 0x85b   : > { %v4781_v49 = vpop.f32.mrf.mxu1  ;;  %v3865_v18 = vadd.f32 %v3864_v17, %v3850_v24 }
 0x85c   : > { %v3853_v47 = vmul.f32 %v4781_v49, %v5894_v58  ;;  %v3851_v58 = vmul.f32 %v4778_v55, %v5862_v30 }
 0x85d   : > { %v3789_v51 = vpop.f32.mrf.mxu1 }
 0x85e   : > { %v3852_v0 = vmul.f32 %v3789_v51, %v5891_v54  ;;  %v3866_v4 = vadd.f32 %v3865_v18, %v3851_v58 }
 0x85f   : > { %v4784_v22 = vpop.f32.mrf.mxu1 }
 0x860   : > { %v3873_v28 = vadd.f32 %v3853_v47, %v3852_v0  ;;  %v3855_v54 = vmul.f32 %v4784_v22, %v5886_v33  ;;  %v3867_v44 = vrot.slane %v3866_v4, 4 }
 0x861   : > { %v3799_v21 = vpop.f32.mrf.mxu1 }
 0x862   : > { %v3854_v1 = vmul.f32 %v3799_v21, %v5899_v61  ;;  %v3868_v9 = vadd.f32 %v3867_v44, %v3866_v4 }
 0x864   : > { %v4787_v3 = vpop.f32.mrf.mxu1  ;;  %v3874_v23 = vadd.f32 %v3873_v28, %v3854_v1  ;;  %v3869_v52 = vrot.slane %v3868_v9, 2 }
 0x865   : > { %v3857_v5 = vmul.f32 %v4787_v3, %v5917_v12 }
 0x866   : > { %v3809_v29 = vpop.f32.mrf.mxu1  ;;  %v3875_v61 = vadd.f32 %v3874_v23, %v3855_v54 }
 0x867   : > { %v3856_v35 = vmul.f32 %v3809_v29, %v5914_v11 }
 0x868   : > { %v4790_v25 = vpop.f32.mrf.mxu1  ;;  %v3876_v46 = vrot.slane %v3875_v61, 4 }
 0x869   : > { %v3882_v14 = vadd.f32 %v3857_v5, %v3856_v35  ;;  %v3859_v32 = vmul.f32 %v4790_v25, %v5910_v8 }
 0x86a   : > { %v3819_v42 = vpop.f32.mrf.mxu1  ;;  %v3877_v39 = vadd.f32 %v3876_v46, %v3875_v61 }
 0x86b   : > { %v3858_v13 = vmul.f32 %v3819_v42, %v5921_v19 }
 0x86c   : > { %v3878_v19 = vrot.slane %v3877_v39, 2 }
 0x86d   : > { %v3883_v43 = vadd.f32 %v3882_v14, %v3858_v13 }
 0x86e   : > { %v3879_v27 = vadd.f32 %v3878_v19, %v3877_v39 }
 0x86f   : > { %v3884_v62 = vadd.f32 %v3883_v43, %v3859_v32  ;;  %v4793_v11 = vpop.f32.mrf.mxu1 }
 0x870   : > { %v3861_v34 = vmul.f32 %v4793_v11, %v5933_v38  ;;  %v3880_v50 = vrot.slane %v3879_v27, 1 }
 0x871   : > { %v3885_v37 = vrot.slane %v3884_v62, 4  ;;  %v3829_v33 = vpop.f32.mrf.mxu1 }
 0x872   : > { %v3860_v12 = vmul.f32 %v3829_v33, %v5930_v41  ;;  %v3870_v41 = vadd.f32 %v3869_v52, %v3868_v9  ;;  %v3881_v7 = vadd.f32 %v3880_v50, %v3879_v27 }
 0x873   : > { %v3886_v20 = vadd.f32 %v3885_v37, %v3884_v62  ;;  %v4796_v30 = vpop.f32.mrf.mxu1 }
 0x874   : > { %v3891_v59 = vadd.f32 %v3861_v34, %v3860_v12  ;;  %v3863_v40 = vmul.f32 %v4796_v30, %v5942_v16  ;;  %v3871_v38 = vrot.slane %v3870_v41, 1 }
 0x875   : > { %v3839_v26 = vpop.f32.mrf.mxu1  ;;  %v3887_v36 = vrot.slane %v3886_v20, 2 }
 0x876   : > { %v3862_v8 = vmul.f32 %v3839_v26, %v5939_v10  ;;  %v3872_v10 = vadd.f32 %v3871_v38, %v3870_v41 }
 0x877   : > { %v3888_v15 = vadd.f32 %v3887_v36, %v3886_v20 }
 0x878   : > { %v3892_v48 = vadd.f32 %v3891_v59, %v3862_v8  ;;  %v3904_v49 = vsel %vm654_vm6, %v3881_v7, %v3872_v10 }
 0x879   : > { %v3889_v6 = vrot.slane %v3888_v15, 1 }
 0x87a   : > { %v3893_v45 = vadd.f32 %v3892_v48, %v3863_v40 }
 0x87b   : > { %v3890_v55 = vadd.f32 %v3889_v6, %v3888_v15 }
 0x87c   : > { %v3894_v57 = vrot.slane %v3893_v45, 4 }
 0x87d   : > { %v3905_v51 = vsel %vm656_vm7, %v3890_v55, %v3904_v49 }
 0x87e   : > { %v3895_v53 = vadd.f32 %v3894_v57, %v3893_v45 }
 0x880   : > { %v3896_v56 = vrot.slane %v3895_v53, 2 }
 0x882   : > { %v3897_v60 = vadd.f32 %v3896_v56, %v3895_v53 }
 0x884   : > { %v3898_v63 = vrot.slane %v3897_v60, 1 }
 0x886   : > { %v3899_v16 = vadd.f32 %v3898_v63, %v3897_v60 }
 0x888   : > { %v3906_v22 = vsel %vm658_vm8, %v3899_v16, %v3905_v51 }
 0x889   : > { %3908 = vst [vmem:[%s438_s16] sm:$0xf] %v3906_v22 }
 0x88a PF: > { %s23_s21 = sadd.s32 1, %s4976_s21  }
 0x88b   : > { %p20_p4 = scmp.ge.s32.totalorder %s23_s21, 4  }
 0x88d   :  { %22 = sbr.rel (!%p20_p4) target bundleno = 1 (0x1), region = 112 }

</bundles_post_ra>
